<compile_context>
chip_gen: v6e
topology: v6e:2x2x1
jax: 0.10.0
libtpu: 0.0.40
codegen_flags: <defaults>
</compile_context>

<pallas_src>
import jax
import jax.numpy as jnp
from jax.experimental import pallas as pl
from jax.experimental.pallas import tpu as pltpu

IN_FEATURES = 28 * 28      # 784 (kept unpadded; Mosaic handles the non-128-aligned K)
HIDDEN = 512
NUM_CLASSES = 10
OUT_PAD = 128              # lane-dense output block
NEG_BIG = jnp.float32(-1e30)


def _round_up(n, m):
    return ((n + m - 1) // m) * m


def _choose_tm(b_pad, tm_max=512):
    """Batch tile: multiple of 8, <= tm_max, and chosen so the grid has >=2 steps whenever
    possible so v7x's two TensorCores both get work ('parallel' batch axis)."""
    if b_pad <= 8:
        return b_pad
    return min(tm_max, _round_up(pl.cdiv(b_pad, 2), 8))


# ---------------------------------------------------------------------------------------------
# Kernel
# ---------------------------------------------------------------------------------------------
def mlp_kernel(x_ref, w1_ref, b1_ref, w2_ref, b2_ref, w3_ref, b3_ref, o_ref):
    x = x_ref[...]                                                        # (TM, 784) bf16

    h1 = jnp.dot(x, w1_ref[...], preferred_element_type=jnp.float32) + b1_ref[...]
    h1 = jnp.maximum(h1, 0.0).astype(jnp.bfloat16)                        # (TM, 512) bf16

    h2 = jnp.dot(h1, w2_ref[...], preferred_element_type=jnp.float32) + b2_ref[...]
    h2 = jnp.maximum(h2, 0.0).astype(jnp.bfloat16)                        # (TM, 512) bf16

    # (TM, 128) f32 logits; padded class lanes carry -1e30 from the (float32) padded bias.
    logits = jnp.dot(h2, w3_ref[...], preferred_element_type=jnp.float32) + b3_ref[...]

    # Numerically-stable softmax over the 128 lanes; padded lanes contribute exp()==0.
    # Exact normalization (no approx reciprocal) per review; cost is negligible here.
    m = jnp.max(logits, axis=1, keepdims=True)
    e = jnp.exp(logits - m)
    denom = jnp.sum(e, axis=1, keepdims=True)
    o_ref[...] = (e / denom).astype(o_ref.dtype)                          # bf16 store


# ---------------------------------------------------------------------------------------------
# Parameters
# ---------------------------------------------------------------------------------------------
def init_params(key):
    """PyTorch-style init: U(-1/sqrt(fan_in), 1/sqrt(fan_in)).
    Weights stored as (in_features, out_features) f32; biases as (1, out_features) f32."""
    dims = [(IN_FEATURES, HIDDEN), (HIDDEN, HIDDEN), (HIDDEN, NUM_CLASSES)]
    params = []
    for fan_in, fan_out in dims:
        key, kw, kb = jax.random.split(key, 3)
        bound = 1.0 / jnp.sqrt(fan_in)
        w = jax.random.uniform(kw, (fan_in, fan_out), jnp.float32, -bound, bound)
        b = jax.random.uniform(kb, (1, fan_out), jnp.float32, -bound, bound)
        params += [w, b]
    return tuple(params)


def pack_params(params):
    """One-time: weights -> bf16 (f32 MXU accumulation in-kernel); only the class dim of the
    last layer is padded to 128 lanes for an unmasked, lane-dense output store."""
    w1, b1, w2, b2, w3, b3 = params
    w1p = w1.astype(jnp.bfloat16)                                          # (784, 512) unpadded
    w2p = w2.astype(jnp.bfloat16)                                          # (512, 512)
    w3p = jnp.zeros((HIDDEN, OUT_PAD), jnp.bfloat16).at[:, :NUM_CLASSES].set(
        w3.astype(jnp.bfloat16))                                           # (512, 128)
    b1p = b1.reshape(1, HIDDEN).astype(jnp.float32)
    b2p = b2.reshape(1, HIDDEN).astype(jnp.float32)
    # Padded class lanes get a huge negative bias -> exp() == 0 in the softmax.
    # NOTE: b3p must stay float32 (do not cast to a narrower dtype later).
    b3p = jnp.full((1, OUT_PAD), NEG_BIG, jnp.float32).at[0, :NUM_CLASSES].set(
        b3.reshape(-1).astype(jnp.float32))
    return (w1p, b1p, w2p, b2p, w3p, b3p)


# ---------------------------------------------------------------------------------------------
# pallas_call wrapper
# ---------------------------------------------------------------------------------------------
def _const_spec(shape, single_buffer):
    """Grid-constant (VMEM-resident) block; single-buffered when supported, since a second
    pipeline buffer for a revisited block is wasted VMEM."""
    idx = lambda i: (0, 0)
    if single_buffer:
        return pl.BlockSpec(shape, idx, pipeline_mode=pl.Buffered(1))
    return pl.BlockSpec(shape, idx)


def _mlp_pallas_call(x2d, packed, tm, single_buffer_weights):
    w1, b1, w2, b2, w3, b3 = packed
    b_pad = x2d.shape[0]
    grid = pl.cdiv(b_pad, tm)          # trailing partial batch block is allowed

    cost = pl.CostEstimate(
        flops=2 * b_pad * (IN_FEATURES * HIDDEN + HIDDEN * HIDDEN + HIDDEN * OUT_PAD),
        transcendentals=b_pad * OUT_PAD,
        bytes_accessed=(x2d.size * x2d.dtype.itemsize
                        + sum(int(a.size) * a.dtype.itemsize for a in packed)
                        + b_pad * OUT_PAD * 2),
    )

    return pl.pallas_call(
        mlp_kernel,
        out_shape=jax.ShapeDtypeStruct((b_pad, OUT_PAD), jnp.bfloat16),
        grid=(grid,),
        in_specs=[
            pl.BlockSpec((tm, IN_FEATURES), lambda i: (i, 0)),   # streamed activations
            _const_spec(w1.shape, single_buffer_weights),
            _const_spec(b1.shape, single_buffer_weights),
            _const_spec(w2.shape, single_buffer_weights),
            _const_spec(b2.shape, single_buffer_weights),
            _const_spec(w3.shape, single_buffer_weights),
            _const_spec(b3.shape, single_buffer_weights),
        ],
        out_specs=pl.BlockSpec((tm, OUT_PAD), lambda i: (i, 0)),  # lane-dense output
        compiler_params=pltpu.CompilerParams(
            dimension_semantics=("parallel",)),                   # v7x: both TCs share the batch
        cost_estimate=cost,
    )(x2d, w1, b1, w2, b2, w3, b3)


def mlp_forward(x, packed, *, tm_max=512):
    """x: (B, 1, 28, 28) or (B, 784). Returns (B, 10) softmax probabilities (float32)."""
    B = x.shape[0]
    x2d = x.reshape(B, -1).astype(jnp.bfloat16)                   # nn.Flatten() + bf16 MXU input
    assert x2d.shape[1] == IN_FEATURES

    b_pad = _round_up(B, 8)                                       # sublane granularity only
    if b_pad != B:
        x2d = jnp.pad(x2d, ((0, b_pad - B), (0, 0)))
    tm = _choose_tm(b_pad, tm_max)

    try:
        out = _mlp_pallas_call(x2d, packed, tm, single_buffer_weights=True)
    except Exception:
        # Fallback for jax builds where BlockSpec.pipeline_mode / pl.Buffered(1) is not
        # accepted by the TPU lowering; only costs ~1.4 MiB of duplicated weight buffers.
        out = _mlp_pallas_call(x2d, packed, tm, single_buffer_weights=False)

    return out[:B, :NUM_CLASSES].astype(jnp.float32)


# ---------------------------------------------------------------------------------------------
# Self-test
# ---------------------------------------------------------------------------------------------
def _ref_forward(x, packed):
    """Plain-JAX reference with the same bf16 weights / f32 accumulation."""
    w1, b1, w2, b2, w3, b3 = packed
    xf = x.reshape(x.shape[0], -1).astype(jnp.bfloat16)
    h = jnp.maximum(jnp.dot(xf, w1, preferred_element_type=jnp.float32) + b1, 0.0)
    h = jnp.maximum(jnp.dot(h.astype(jnp.bfloat16), w2,
                            preferred_element_type=jnp.float32) + b2, 0.0)
    logits = jnp.dot(h.astype(jnp.bfloat16), w3[:, :NUM_CLASSES],
                     preferred_element_type=jnp.float32) + b3[:, :NUM_CLASSES]
    return jax.nn.softmax(logits, axis=1)


if __name__ == "__main__":
    key = jax.random.PRNGKey(0)
    kx1, kx2, kp = jax.random.split(key, 3)

    params = init_params(kp)
    packed = pack_params(params)
    assert packed[5].dtype == jnp.float32  # b3 must stay f32 (carries the -1e30 pad lanes)

    # Small image-shaped batch (matches nn.Flatten on (B, 1, 28, 28)).
    B = 8
    x = jax.random.normal(kx1, (B, 1, 28, 28), jnp.float32)
    out = jax.block_until_ready(mlp_forward(x, packed))
    assert out.shape == (B, NUM_CLASSES)
    assert bool(jnp.allclose(jnp.sum(out, axis=1), 1.0, atol=1e-2))
    assert bool(jnp.allclose(out, _ref_forward(x, packed), atol=1e-2))

    # Batch that is not a multiple of 8 / of the tile: exercises the batch-pad + trailing
    # partial-block path and the >=2-step grid.
    B2 = 20
    x2 = jax.random.normal(kx2, (B2, IN_FEATURES), jnp.float32)
    out2 = jax.block_until_ready(mlp_forward(x2, packed))
    assert out2.shape == (B2, NUM_CLASSES)
    assert bool(jnp.allclose(jnp.sum(out2, axis=1), 1.0, atol=1e-2))
    assert bool(jnp.allclose(out2, _ref_forward(x2, packed), atol=1e-2))

    print("KERNEL_OK")
</pallas_src>

<mosaic_0001>
module attributes {stable_mosaic.version = 11 : i64} {
  func.func @mlp_kernel(%arg0: i32, %arg1: memref<8x784xbf16, #tpu.memory_space<vmem>>, %arg2: memref<784x512xbf16, #tpu.memory_space<vmem>>, %arg3: memref<1x512xf32, #tpu.memory_space<vmem>>, %arg4: memref<512x512xbf16, #tpu.memory_space<vmem>>, %arg5: memref<1x512xf32, #tpu.memory_space<vmem>>, %arg6: memref<512x128xbf16, #tpu.memory_space<vmem>>, %arg7: memref<1x128xf32, #tpu.memory_space<vmem>>, %arg8: memref<8x128xbf16, #tpu.memory_space<vmem>>) attributes {dimension_semantics = [#tpu.dimension_semantics<parallel>], iteration_bounds = array<i64: 1>, scalar_prefetch = 0 : i64, scratch_operands = 0 : i64, tpu.core_type = #tpu.core_type<tc>, window_params = [{transform_indices = @transform_0, window_bounds = array<i64: 8, 784>}, {pipeline_mode = #tpu.pipeline_mode<synchronous>, transform_indices = @transform_1, window_bounds = array<i64: 784, 512>}, {pipeline_mode = #tpu.pipeline_mode<synchronous>, transform_indices = @transform_2, window_bounds = array<i64: 1, 512>}, {pipeline_mode = #tpu.pipeline_mode<synchronous>, transform_indices = @transform_3, window_bounds = array<i64: 512, 512>}, {pipeline_mode = #tpu.pipeline_mode<synchronous>, transform_indices = @transform_4, window_bounds = array<i64: 1, 512>}, {pipeline_mode = #tpu.pipeline_mode<synchronous>, transform_indices = @transform_5, window_bounds = array<i64: 512, 128>}, {pipeline_mode = #tpu.pipeline_mode<synchronous>, transform_indices = @transform_6, window_bounds = array<i64: 1, 128>}, {transform_indices = @transform_7, window_bounds = array<i64: 8, 128>}]} {
    %c0 = arith.constant 0 : index
    %c0_0 = arith.constant 0 : index
    %0 = vector.load %arg1[%c0, %c0_0] : memref<8x784xbf16, #tpu.memory_space<vmem>>, vector<8x784xbf16>
    %c0_1 = arith.constant 0 : index
    %c0_2 = arith.constant 0 : index
    %1 = vector.load %arg2[%c0_1, %c0_2] : memref<784x512xbf16, #tpu.memory_space<vmem>>, vector<784x512xbf16>
    %cst = arith.constant dense<0.000000e+00> : vector<8x512xf32>
    %2 = tpu.matmul %0, %1, %cst {dimension_numbers = #tpu.dot_dimension_numbers<[1], [0], [0], [1], [0, 0, 1, 1], [], []>} : vector<8x784xbf16>, vector<784x512xbf16>, vector<8x512xf32> -> vector<8x512xf32>
    %c0_3 = arith.constant 0 : index
    %c0_4 = arith.constant 0 : index
    %3 = vector.load %arg3[%c0_3, %c0_4] : memref<1x512xf32, #tpu.memory_space<vmem>>, vector<1x512xf32>
    %4 = vector.broadcast %3 : vector<1x512xf32> to vector<8x512xf32>
    %5 = arith.addf %2, %4 : vector<8x512xf32>
    %cst_5 = arith.constant 0.000000e+00 : f32
    %6 = vector.broadcast %cst_5 : f32 to vector<8x512xf32>
    %7 = arith.maximumf %5, %6 : vector<8x512xf32>
    %8 = arith.truncf %7 : vector<8x512xf32> to vector<8x512xbf16>
    %c0_6 = arith.constant 0 : index
    %c0_7 = arith.constant 0 : index
    %9 = vector.load %arg4[%c0_6, %c0_7] : memref<512x512xbf16, #tpu.memory_space<vmem>>, vector<512x512xbf16>
    %cst_8 = arith.constant dense<0.000000e+00> : vector<8x512xf32>
    %10 = tpu.matmul %8, %9, %cst_8 {dimension_numbers = #tpu.dot_dimension_numbers<[1], [0], [0], [1], [0, 0, 1, 1], [], []>} : vector<8x512xbf16>, vector<512x512xbf16>, vector<8x512xf32> -> vector<8x512xf32>
    %c0_9 = arith.constant 0 : index
    %c0_10 = arith.constant 0 : index
    %11 = vector.load %arg5[%c0_9, %c0_10] : memref<1x512xf32, #tpu.memory_space<vmem>>, vector<1x512xf32>
    %12 = vector.broadcast %11 : vector<1x512xf32> to vector<8x512xf32>
    %13 = arith.addf %10, %12 : vector<8x512xf32>
    %cst_11 = arith.constant 0.000000e+00 : f32
    %14 = vector.broadcast %cst_11 : f32 to vector<8x512xf32>
    %15 = arith.maximumf %13, %14 : vector<8x512xf32>
    %16 = arith.truncf %15 : vector<8x512xf32> to vector<8x512xbf16>
    %c0_12 = arith.constant 0 : index
    %c0_13 = arith.constant 0 : index
    %17 = vector.load %arg6[%c0_12, %c0_13] : memref<512x128xbf16, #tpu.memory_space<vmem>>, vector<512x128xbf16>
    %cst_14 = arith.constant dense<0.000000e+00> : vector<8x128xf32>
    %18 = tpu.matmul %16, %17, %cst_14 {dimension_numbers = #tpu.dot_dimension_numbers<[1], [0], [0], [1], [0, 0, 1, 1], [], []>} : vector<8x512xbf16>, vector<512x128xbf16>, vector<8x128xf32> -> vector<8x128xf32>
    %c0_15 = arith.constant 0 : index
    %c0_16 = arith.constant 0 : index
    %19 = vector.load %arg7[%c0_15, %c0_16] : memref<1x128xf32, #tpu.memory_space<vmem>>, vector<1x128xf32>
    %20 = vector.broadcast %19 : vector<1x128xf32> to vector<8x128xf32>
    %21 = arith.addf %18, %20 : vector<8x128xf32>
    %cst_17 = arith.constant dense<0xFF800000> : vector<8xf32>
    %22 = vector.multi_reduction <maximumf>, %21, %cst_17 [1] : vector<8x128xf32> to vector<8xf32>
    %23 = vector.shape_cast %22 : vector<8xf32> to vector<8x1xf32>
    %24 = vector.broadcast %23 : vector<8x1xf32> to vector<8x128xf32>
    %25 = arith.subf %21, %24 : vector<8x128xf32>
    %26 = math.exp %25 : vector<8x128xf32>
    %cst_18 = arith.constant dense<0.000000e+00> : vector<8xf32>
    %27 = vector.multi_reduction <add>, %26, %cst_18 [1] : vector<8x128xf32> to vector<8xf32>
    %28 = vector.shape_cast %27 : vector<8xf32> to vector<8x1xf32>
    %29 = vector.broadcast %28 : vector<8x1xf32> to vector<8x128xf32>
    %30 = arith.divf %26, %29 : vector<8x128xf32>
    %31 = arith.truncf %30 : vector<8x128xf32> to vector<8x128xbf16>
    %c0_19 = arith.constant 0 : index
    %c0_20 = arith.constant 0 : index
    %32 = vector.load %arg8[%c0_19, %c0_20] : memref<8x128xbf16, #tpu.memory_space<vmem>>, vector<8x128xbf16>
    tpu.vector_store %arg8[%c0_19, %c0_20], %31 {strides = array<i32>} : memref<8x128xbf16, #tpu.memory_space<vmem>>, vector<8x128xbf16>,
    return
  }
  func.func @transform_0(%arg0: i32) -> (i32, i32) {
    %c0_i32 = arith.constant 0 : i32
    %c0_i32_0 = arith.constant 0 : i32
    return %arg0, %c0_i32 : i32, i32
  }
  func.func @transform_1(%arg0: i32) -> (i32, i32) {
    %c0_i32 = arith.constant 0 : i32
    %c0_i32_0 = arith.constant 0 : i32
    %c0_i32_1 = arith.constant 0 : i32
    return %c0_i32, %c0_i32_0 : i32, i32
  }
  func.func @transform_2(%arg0: i32) -> (i32, i32) {
    %c0_i32 = arith.constant 0 : i32
    %c0_i32_0 = arith.constant 0 : i32
    %c0_i32_1 = arith.constant 0 : i32
    return %c0_i32, %c0_i32_0 : i32, i32
  }
  func.func @transform_3(%arg0: i32) -> (i32, i32) {
    %c0_i32 = arith.constant 0 : i32
    %c0_i32_0 = arith.constant 0 : i32
    %c0_i32_1 = arith.constant 0 : i32
    return %c0_i32, %c0_i32_0 : i32, i32
  }
  func.func @transform_4(%arg0: i32) -> (i32, i32) {
    %c0_i32 = arith.constant 0 : i32
    %c0_i32_0 = arith.constant 0 : i32
    %c0_i32_1 = arith.constant 0 : i32
    return %c0_i32, %c0_i32_0 : i32, i32
  }
  func.func @transform_5(%arg0: i32) -> (i32, i32) {
    %c0_i32 = arith.constant 0 : i32
    %c0_i32_0 = arith.constant 0 : i32
    %c0_i32_1 = arith.constant 0 : i32
    return %c0_i32, %c0_i32_0 : i32, i32
  }
  func.func @transform_6(%arg0: i32) -> (i32, i32) {
    %c0_i32 = arith.constant 0 : i32
    %c0_i32_0 = arith.constant 0 : i32
    %c0_i32_1 = arith.constant 0 : i32
    return %c0_i32, %c0_i32_0 : i32, i32
  }
  func.func @transform_7(%arg0: i32) -> (i32, i32) {
    %c0_i32 = arith.constant 0 : i32
    %c0_i32_0 = arith.constant 0 : i32
    return %arg0, %c0_i32 : i32, i32
  }
}

module attributes {stable_mosaic.version = 11 : i64} {
  func.func @mlp_kernel(%arg0: i32, %arg1: memref<8x784xbf16, #tpu.memory_space<vmem>>, %arg2: memref<784x512xbf16, #tpu.memory_space<vmem>>, %arg3: memref<1x512xf32, #tpu.memory_space<vmem>>, %arg4: memref<512x512xbf16, #tpu.memory_space<vmem>>, %arg5: memref<1x512xf32, #tpu.memory_space<vmem>>, %arg6: memref<512x128xbf16, #tpu.memory_space<vmem>>, %arg7: memref<1x128xf32, #tpu.memory_space<vmem>>, %arg8: memref<8x128xbf16, #tpu.memory_space<vmem>>) attributes {dimension_semantics = [#tpu.dimension_semantics<parallel>], iteration_bounds = array<i64: 1>, scalar_prefetch = 0 : i64, scratch_operands = 0 : i64, tpu.core_type = #tpu.core_type<tc>, window_params = [{transform_indices = @transform_0, window_bounds = array<i64: 8, 784>}, {pipeline_mode = #tpu.pipeline_mode<synchronous>, transform_indices = @transform_1, window_bounds = array<i64: 784, 512>}, {pipeline_mode = #tpu.pipeline_mode<synchronous>, transform_indices = @transform_2, window_bounds = array<i64: 1, 512>}, {pipeline_mode = #tpu.pipeline_mode<synchronous>, transform_indices = @transform_3, window_bounds = array<i64: 512, 512>}, {pipeline_mode = #tpu.pipeline_mode<synchronous>, transform_indices = @transform_4, window_bounds = array<i64: 1, 512>}, {pipeline_mode = #tpu.pipeline_mode<synchronous>, transform_indices = @transform_5, window_bounds = array<i64: 512, 128>}, {pipeline_mode = #tpu.pipeline_mode<synchronous>, transform_indices = @transform_6, window_bounds = array<i64: 1, 128>}, {transform_indices = @transform_7, window_bounds = array<i64: 8, 128>}]} {
    %c0 = arith.constant 0 : index
    %c0_0 = arith.constant 0 : index
    %0 = vector.load %arg1[%c0, %c0_0] : memref<8x784xbf16, #tpu.memory_space<vmem>>, vector<8x784xbf16>
    %c0_1 = arith.constant 0 : index
    %c0_2 = arith.constant 0 : index
    %1 = vector.load %arg2[%c0_1, %c0_2] : memref<784x512xbf16, #tpu.memory_space<vmem>>, vector<784x512xbf16>
    %cst = arith.constant dense<0.000000e+00> : vector<8x512xf32>
    %2 = tpu.matmul %0, %1, %cst {dimension_numbers = #tpu.dot_dimension_numbers<[1], [0], [0], [1], [0, 0, 1, 1], [], []>} : vector<8x784xbf16>, vector<784x512xbf16>, vector<8x512xf32> -> vector<8x512xf32>
    %c0_3 = arith.constant 0 : index
    %c0_4 = arith.constant 0 : index
    %3 = vector.load %arg3[%c0_3, %c0_4] : memref<1x512xf32, #tpu.memory_space<vmem>>, vector<1x512xf32>
    %4 = vector.broadcast %3 : vector<1x512xf32> to vector<8x512xf32>
    %5 = arith.addf %2, %4 : vector<8x512xf32>
    %cst_5 = arith.constant 0.000000e+00 : f32
    %6 = vector.broadcast %cst_5 : f32 to vector<8x512xf32>
    %7 = arith.maximumf %5, %6 : vector<8x512xf32>
    %8 = arith.truncf %7 : vector<8x512xf32> to vector<8x512xbf16>
    %c0_6 = arith.constant 0 : index
    %c0_7 = arith.constant 0 : index
    %9 = vector.load %arg4[%c0_6, %c0_7] : memref<512x512xbf16, #tpu.memory_space<vmem>>, vector<512x512xbf16>
    %cst_8 = arith.constant dense<0.000000e+00> : vector<8x512xf32>
    %10 = tpu.matmul %8, %9, %cst_8 {dimension_numbers = #tpu.dot_dimension_numbers<[1], [0], [0], [1], [0, 0, 1, 1], [], []>} : vector<8x512xbf16>, vector<512x512xbf16>, vector<8x512xf32> -> vector<8x512xf32>
    %c0_9 = arith.constant 0 : index
    %c0_10 = arith.constant 0 : index
    %11 = vector.load %arg5[%c0_9, %c0_10] : memref<1x512xf32, #tpu.memory_space<vmem>>, vector<1x512xf32>
    %12 = vector.broadcast %11 : vector<1x512xf32> to vector<8x512xf32>
    %13 = arith.addf %10, %12 : vector<8x512xf32>
    %cst_11 = arith.constant 0.000000e+00 : f32
    %14 = vector.broadcast %cst_11 : f32 to vector<8x512xf32>
    %15 = arith.maximumf %13, %14 : vector<8x512xf32>
    %16 = arith.truncf %15 : vector<8x512xf32> to vector<8x512xbf16>
    %c0_12 = arith.constant 0 : index
    %c0_13 = arith.constant 0 : index
    %17 = vector.load %arg6[%c0_12, %c0_13] : memref<512x128xbf16, #tpu.memory_space<vmem>>, vector<512x128xbf16>
    %cst_14 = arith.constant dense<0.000000e+00> : vector<8x128xf32>
    %18 = tpu.matmul %16, %17, %cst_14 {dimension_numbers = #tpu.dot_dimension_numbers<[1], [0], [0], [1], [0, 0, 1, 1], [], []>} : vector<8x512xbf16>, vector<512x128xbf16>, vector<8x128xf32> -> vector<8x128xf32>
    %c0_15 = arith.constant 0 : index
    %c0_16 = arith.constant 0 : index
    %19 = vector.load %arg7[%c0_15, %c0_16] : memref<1x128xf32, #tpu.memory_space<vmem>>, vector<1x128xf32>
    %20 = vector.broadcast %19 : vector<1x128xf32> to vector<8x128xf32>
    %21 = arith.addf %18, %20 : vector<8x128xf32>
    %cst_17 = arith.constant dense<0xFF800000> : vector<8xf32>
    %22 = vector.multi_reduction <maximumf>, %21, %cst_17 [1] : vector<8x128xf32> to vector<8xf32>
    %23 = vector.shape_cast %22 : vector<8xf32> to vector<8x1xf32>
    %24 = vector.broadcast %23 : vector<8x1xf32> to vector<8x128xf32>
    %25 = arith.subf %21, %24 : vector<8x128xf32>
    %26 = math.exp %25 : vector<8x128xf32>
    %cst_18 = arith.constant dense<0.000000e+00> : vector<8xf32>
    %27 = vector.multi_reduction <add>, %26, %cst_18 [1] : vector<8x128xf32> to vector<8xf32>
    %28 = vector.shape_cast %27 : vector<8xf32> to vector<8x1xf32>
    %29 = vector.broadcast %28 : vector<8x1xf32> to vector<8x128xf32>
    %30 = arith.divf %26, %29 : vector<8x128xf32>
    %31 = arith.truncf %30 : vector<8x128xf32> to vector<8x128xbf16>
    %c0_19 = arith.constant 0 : index
    %c0_20 = arith.constant 0 : index
    %32 = vector.load %arg8[%c0_19, %c0_20] : memref<8x128xbf16, #tpu.memory_space<vmem>>, vector<8x128xbf16>
    tpu.vector_store %arg8[%c0_19, %c0_20], %31 {strides = array<i32>} : memref<8x128xbf16, #tpu.memory_space<vmem>>, vector<8x128xbf16>,
    return
  }
  func.func @transform_0(%arg0: i32) -> (i32, i32) {
    %c0_i32 = arith.constant 0 : i32
    %c0_i32_0 = arith.constant 0 : i32
    return %arg0, %c0_i32 : i32, i32
  }
  func.func @transform_1(%arg0: i32) -> (i32, i32) {
    %c0_i32 = arith.constant 0 : i32
    %c0_i32_0 = arith.constant 0 : i32
    %c0_i32_1 = arith.constant 0 : i32
    return %c0_i32, %c0_i32_0 : i32, i32
  }
  func.func @transform_2(%arg0: i32) -> (i32, i32) {
    %c0_i32 = arith.constant 0 : i32
    %c0_i32_0 = arith.constant 0 : i32
    %c0_i32_1 = arith.constant 0 : i32
    return %c0_i32, %c0_i32_0 : i32, i32
  }
  func.func @transform_3(%arg0: i32) -> (i32, i32) {
    %c0_i32 = arith.constant 0 : i32
    %c0_i32_0 = arith.constant 0 : i32
    %c0_i32_1 = arith.constant 0 : i32
    return %c0_i32, %c0_i32_0 : i32, i32
  }
  func.func @transform_4(%arg0: i32) -> (i32, i32) {
    %c0_i32 = arith.constant 0 : i32
    %c0_i32_0 = arith.constant 0 : i32
    %c0_i32_1 = arith.constant 0 : i32
    return %c0_i32, %c0_i32_0 : i32, i32
  }
  func.func @transform_5(%arg0: i32) -> (i32, i32) {
    %c0_i32 = arith.constant 0 : i32
    %c0_i32_0 = arith.constant 0 : i32
    %c0_i32_1 = arith.constant 0 : i32
    return %c0_i32, %c0_i32_0 : i32, i32
  }
  func.func @transform_6(%arg0: i32) -> (i32, i32) {
    %c0_i32 = arith.constant 0 : i32
    %c0_i32_0 = arith.constant 0 : i32
    %c0_i32_1 = arith.constant 0 : i32
    return %c0_i32, %c0_i32_0 : i32, i32
  }
  func.func @transform_7(%arg0: i32) -> (i32, i32) {
    %c0_i32 = arith.constant 0 : i32
    %c0_i32_0 = arith.constant 0 : i32
    return %arg0, %c0_i32 : i32, i32
  }
}

</mosaic_0001>

<bundles_post_ra>
// kernel: tpu_custom_call.1
= control target key start
LH: loop header
LB: loop body
LE: loop exit
PB: predicated region body
PF: predicated region fallthrough
CT: control target
= control target key end

     0   :  { %12 = vsyncpa [#allocation3], 0  ;;  %s4221_s0 = inlined_call_operand.hbm [shape: bf16[8,784], index: 0, kind: input, shape index: {}]   ;;  %s4222_s1 = inlined_call_operand.hbm [shape: bf16[784,512], index: 1, kind: input, shape index: {}]   ;;  %s4223_s2 = inlined_call_operand.hbm [shape: f32[1,512], index: 2, kind: input, shape index: {}]   ;;  %s4224_s3 = inlined_call_operand.hbm [shape: bf16[512,512], index: 3, kind: input, shape index: {}]   ;;  %s4225_s4 = inlined_call_operand.vmem [shape: f32[1,512], index: 4, kind: input, shape index: {}]   ;;  %s4226_s5 = inlined_call_operand.hbm [shape: bf16[512,128], index: 5, kind: input, shape index: {}]   ;;  %s4227_s6 = inlined_call_operand.vmem [shape: f32[1,128], index: 6, kind: input, shape index: {}]   ;;  %s4228_s7 = inlined_call_operand.hbm [shape: bf16[8,128], index: 7, kind: output, shape index: {}]  }
   0x1   :  { %13 = vsyncpa [#allocation6], 0 }
   0x2   :  { %14 = vsyncpa [#allocation9], 0 }
   0x3   :  { %15 = vsyncpa [#allocation4], 0  ;;  %s4070_s24 = smov [#allocation5]  }
   0x4   :  { %s31_s25 = sshll.u32 %s4070_s24, 4  ;;  %s32_s25 = int_to_ptr.vmem [resolvable:$true] %s31_s25 }
   0x5   :  { %s3950_s26 = scalar_lea.vmem %s32_s25, 25088  ;;  %p3955_p1 = scmp.lt.s32.totalorder %s32_s25, %s32_s25 }
   0x6   :  { %p3951_p0 = scmp.ne.s32.totalorder %s32_s25, %s3950_s26  ;;  %p3956_p2 = scmp.lt.s32.totalorder %s3950_s26, %s3950_s26 }
   0x8   :  { %p3957_p3 = por %p3956_p2, %p3955_p1 }
   0xa   :  { %p3958_p4 = pnand %p3957_p3, %p3951_p0 }
   0xc   :  { %3961 = shalt.err (!%p3958_p4)
}
   0xd   :  { %s4071_s27 = smov 256   ;;  %s4072_s28 = smov 16  }
   0xe   :  { %37 = dma.hbm_to_vmem [thread:$0]  %s4222_s1, 25088, %s32_s25, [#allocation6], %s4071_s27, %s4071_s27, %s4072_s28  }
   0xf   :  { %s4073_s8 = smov [#allocation8]   ;;  %s4074_s10 = smov [#allocation2]  }
  0x10   :  { %s53_s9 = sshll.u32 %s4073_s8, 4  ;;  %s22_s11 = sshll.u32 %s4074_s10, 4  ;;  %s54_s9 = int_to_ptr.vmem [resolvable:$true] %s53_s9  ;;  %s23_s11 = int_to_ptr.vmem [resolvable:$true] %s22_s11 }
  0x11   :  { %s3970_s12 = scalar_lea.vmem %s54_s9, 16384  ;;  %p3975_p6 = scmp.lt.s32.totalorder %s54_s9, %s54_s9 }
  0x12   :  { %p3971_p5 = scmp.ne.s32.totalorder %s54_s9, %s3970_s12  ;;  %p3976_p7 = scmp.lt.s32.totalorder %s3970_s12, %s3970_s12 }
  0x14   :  { %p3977_p8 = por %p3976_p7, %p3975_p6 }
  0x16   :  { %p3978_p9 = pnand %p3977_p8, %p3971_p5 }
  0x18   :  { %3981 = shalt.err (!%p3978_p9)
}
  0x19   :  { %59 = dma.hbm_to_vmem [thread:$0]  %s4224_s3, 16384, %s54_s9, [#allocation9], %s4071_s27, %s4071_s27, %s4072_s28  }
  0x1a   :  { %s3990_s15 = scalar_lea.vmem %s23_s11, 448  ;;  %p3995_p11 = scmp.lt.s32.totalorder %s23_s11, %s23_s11 }
  0x1b   :  { %p3991_p10 = scmp.ne.s32.totalorder %s23_s11, %s3990_s15  ;;  %p3996_p12 = scmp.lt.s32.totalorder %s3990_s15, %s3990_s15 }
  0x1d   :  { %p3997_p13 = por %p3996_p12, %p3995_p11 }
  0x1f   :  { %p3998_p0 = pnand %p3997_p13, %p3991_p10 }
  0x21   :  { %4001 = shalt.err (!%p3998_p0)
}
  0x22   :  { %25 = dma.hbm_to_vmem [thread:$0]  %s4221_s0, 448, %s23_s11, [#allocation3]  }
  0x23   :  { %s4075_s17 = smov [#allocation7]   ;;  %s4076_s19 = smov [#allocation10]  }
  0x24   :  { %s44_s18 = sshll.u32 %s4075_s17, 4  ;;  %s67_s20 = sshll.u32 %s4076_s19, 4  ;;  %s45_s18 = int_to_ptr.vmem [resolvable:$true] %s44_s18  ;;  %s68_s20 = int_to_ptr.vmem [resolvable:$true] %s67_s20 }
  0x25   :  { %s4010_s21 = scalar_lea.vmem %s45_s18, 64  ;;  %p4015_p2 = scmp.lt.s32.totalorder %s45_s18, %s45_s18 }
  0x26   :  { %p4011_p1 = scmp.ne.s32.totalorder %s45_s18, %s4010_s21  ;;  %p4016_p3 = scmp.lt.s32.totalorder %s4010_s21, %s4010_s21 }
  0x28   :  { %p4017_p4 = por %p4016_p3, %p4015_p2 }
  0x2a   :  { %p4018_p5 = pnand %p4017_p4, %p4011_p1 }
  0x2c   :  { %4021 = shalt.err (!%p4018_p5)
}
  0x2d   :  { %47 = dma.hbm_to_vmem [thread:$0]  %s4223_s2, 64, %s45_s18, [#allocation6]  }
  0x2e   :  { %s4030_s23 = scalar_lea.vmem %s68_s20, 4096  ;;  %p4035_p7 = scmp.lt.s32.totalorder %s68_s20, %s68_s20 }
  0x2f   :  { %p4031_p6 = scmp.ne.s32.totalorder %s68_s20, %s4030_s23  ;;  %p4036_p8 = scmp.lt.s32.totalorder %s4030_s23, %s4030_s23 }
  0x31   :  { %p4037_p9 = por %p4036_p8, %p4035_p7 }
  0x33   :  { %p4038_p10 = pnand %p4037_p9, %p4031_p6 }
  0x35   :  { %4041 = shalt.err (!%p4038_p10)
}
  0x36   :  { %s4077_s0 = smov 64   ;;  %s4078_s24 = smov 4  }
  0x37   :  { %73 = dma.hbm_to_vmem [thread:$0]  %s4226_s5, 4096, %s68_s20, [#allocation9], %s4077_s0, %s4077_s0, %s4078_s24  }
  0x38   :  { %4062 = dma.done.wait [#allocation3], 448  }
  0x39   :  { %4063 = vsyncadd [#allocation3], 4294966848 }
  0x3a   :  { %4064 = dma.done.wait [#allocation6], 25152  }
  0x3b   :  { %4065 = vsyncadd [#allocation6], 4294942144 }
  0x3c   :  { %4066 = dma.done.wait [#allocation9], 20480  }
  0x3d   :  { %4067 = vsyncadd [#allocation9], 4294946816  ;;  %v3412_v0 = vld [vmem:[#allocation5 + $0xe4] ss:$16 sps:$4 sm:$0xff]   ;;  %v3416_v2 = vld [vmem:[#allocation5 + $0xe0] ss:$16 sps:$4 sm:$0xff]  }
  0x3e   :  { %v3414_v1 = vld [vmem:[#allocation5 + $0x2e4] ss:$16 sps:$4 sm:$0xff]   ;;  %1322 = vmatprep.subr.bf16.mxu0 %v3412_v0  ;;  %v3417_v3 = vld [vmem:[#allocation5 + $0x2e0] ss:$16 sps:$4 sm:$0xff]   ;;  %vm1318_vm0 = vcmask 130048   ;;  %s4080_s28 = smov [#allocation11]  }
  0x3f   :  { %1363 = vmatprep.subr.bf16.mxu1 %v3414_v1  ;;  %v3418_v4 = vld [vmem:[#allocation5 + $0xc4] ss:$16 sps:$4 sm:$0xff]   ;;  %1323 = vmatpush1.bf16.msra.mxu0 %v3416_v2  ;;  %v3422_v6 = vld [vmem:[#allocation5 + $0xc0] ss:$16 sps:$4 sm:$0xff]   ;;  %s2980_s29 = sshll.u32 %s4080_s28, 4  ;;  %s2981_s29 = int_to_ptr.vmem [resolvable:$true] %s2980_s29 }
  0x40   :  { %1364 = vmatpush1.bf16.msra.mxu1 %v3417_v3  ;;  %v3420_v5 = vld [vmem:[#allocation5 + $0x2c4] ss:$16 sps:$4 sm:$0xff]   ;;  %1324 = vmatprep.subr.bf16.mxu0 %v3418_v4  ;;  %v3423_v7 = vld [vmem:[#allocation5 + $0x2c0] ss:$16 sps:$4 sm:$0xff]   ;;  %p4047_p12 = scmp.lt.s32.totalorder %s2981_s29, %s2981_s29 }
  0x41   :  { %1365 = vmatprep.subr.bf16.mxu1 %v3420_v5  ;;  %v3424_v8 = vld [vmem:[#allocation5 + $0xa4] ss:$16 sps:$4 sm:$0xff]   ;;  %v3428_v10 = vld [vmem:[#allocation5 + $0xa0] ss:$16 sps:$4 sm:$0xff]  }
  0x42   :  { %v3426_v9 = vld [vmem:[#allocation5 + $0x2a4] ss:$16 sps:$4 sm:$0xff]   ;;  %v3429_v11 = vld [vmem:[#allocation5 + $0x2a0] ss:$16 sps:$4 sm:$0xff]  }
  0x43   :  { %1325 = vmatpush1.bf16.msra.mxu0 %v3422_v6  ;;  %v3430_v12 = vld [vmem:[#allocation5 + $0x84] ss:$16 sps:$4 sm:$0xff]   ;;  %v3434_v14 = vld [vmem:[#allocation5 + $0x80] ss:$16 sps:$4 sm:$0xff]  }
  0x44   :  { %1366 = vmatpush1.bf16.msra.mxu1 %v3423_v7  ;;  %1326 = vmatprep.subr.bf16.mxu0 %v3424_v8  ;;  %v3432_v13 = vld [vmem:[#allocation5 + $0x284] ss:$16 sps:$4 sm:$0xff]   ;;  %v3435_v15 = vld [vmem:[#allocation5 + $0x280] ss:$16 sps:$4 sm:$0xff]  }
  0x45   :  { %1367 = vmatprep.subr.bf16.mxu1 %v3426_v9  ;;  %v3436_v16 = vld [vmem:[#allocation5 + $0x64] ss:$16 sps:$4 sm:$0xff]   ;;  %v3440_v18 = vld [vmem:[#allocation5 + $0x60] ss:$16 sps:$4 sm:$0xff]  }
  0x46   :  { %v3438_v17 = vld [vmem:[#allocation5 + $0x264] ss:$16 sps:$4 sm:$0xff]   ;;  %v3441_v19 = vld [vmem:[#allocation5 + $0x260] ss:$16 sps:$4 sm:$0xff]  }
  0x47   :  { %1327 = vmatpush1.bf16.msra.mxu0 %v3428_v10  ;;  %v3442_v20 = vld [vmem:[#allocation5 + $0x44] ss:$16 sps:$4 sm:$0xff]   ;;  %v3446_v22 = vld [vmem:[#allocation5 + $0x40] ss:$16 sps:$4 sm:$0xff]  }
  0x48   :  { %1368 = vmatpush1.bf16.msra.mxu1 %v3429_v11  ;;  %1328 = vmatprep.subr.bf16.mxu0 %v3430_v12  ;;  %v3444_v21 = vld [vmem:[#allocation5 + $0x244] ss:$16 sps:$4 sm:$0xff]   ;;  %v3447_v23 = vld [vmem:[#allocation5 + $0x240] ss:$16 sps:$4 sm:$0xff]   ;;  %v3523_v11 = vld [vmem:[#allocation5 + $0xec] ss:$16 sps:$4 sm:$0xff]  }
  0x49   :  { %1369 = vmatprep.subr.bf16.mxu1 %v3432_v13  ;;  %v3448_v24 = vld [vmem:[#allocation5 + $0x24] ss:$16 sps:$4 sm:$0xff]   ;;  %v3452_v26 = vld [vmem:[#allocation5 + $0x20] ss:$16 sps:$4 sm:$0xff]   ;;  %v4079_v13 = vmov 0  }
  0x4a   :  { %v3450_v25 = vld [vmem:[#allocation5 + $0x224] ss:$16 sps:$4 sm:$0xff]   ;;  %v3453_v27 = vld [vmem:[#allocation5 + $0x220] ss:$16 sps:$4 sm:$0xff]  }
  0x4b   :  { %1329 = vmatpush1.bf16.msra.mxu0 %v3434_v14  ;;  %v3454_v28 = vld [vmem:[#allocation5 + $0x4] ss:$16 sps:$4 sm:$0xff]   ;;  %v3458_v30 = vld [vmem:[#allocation5] ss:$16 sps:$4 sm:$0xff]  }
  0x4c   :  { %1370 = vmatpush1.bf16.msra.mxu1 %v3435_v15  ;;  %1330 = vmatprep.subr.bf16.mxu0 %v3436_v16  ;;  %v3456_v29 = vld [vmem:[#allocation5 + $0x204] ss:$16 sps:$4 sm:$0xff]   ;;  %v3459_v31 = vld [vmem:[#allocation5 + $0x200] ss:$16 sps:$4 sm:$0xff]   ;;  %v3521_v15 = vld [vmem:[#allocation5 + $0xe8] ss:$16 sps:$4 sm:$0xff]  }
  0x4d   :  { %1371 = vmatprep.subr.bf16.mxu1 %v3438_v17  ;;  %v3460_v32 = vld [vmem:[#allocation5 + $0x1e4] ss:$16 sps:$4 sm:$0xff]   ;;  %v3464_v34 = vld [vmem:[#allocation5 + $0x1e0] ss:$16 sps:$4 sm:$0xff]   ;;  %v3527_v17 = vld [vmem:[#allocation2 + $0x18] ss:$0 sps:$4 sm:$0xff]  }
  0x4e   :  { %v3462_v33 = vld [vmem:[#allocation5 + $0x3e4] ss:$16 sps:$4 sm:$0xff]   ;;  %v3465_v35 = vld [vmem:[#allocation5 + $0x3e0] ss:$16 sps:$4 sm:$0xff]  }
  0x4f   :  { %1331 = vmatpush1.bf16.msra.mxu0 %v3440_v18  ;;  %v3466_v36 = vld [vmem:[#allocation5 + $0x1c4] ss:$16 sps:$4 sm:$0xff]   ;;  %v3470_v38 = vld [vmem:[#allocation5 + $0x1c0] ss:$16 sps:$4 sm:$0xff]   ;;  %v3530_v18 = vld [vmem:[#allocation5 + $0xcc] ss:$16 sps:$4 sm:$0xff]  }
  0x50   :  { %1372 = vmatpush1.bf16.msra.mxu1 %v3441_v19  ;;  %1332 = vmatprep.subr.bf16.mxu0 %v3442_v20  ;;  %v3468_v37 = vld [vmem:[#allocation5 + $0x3c4] ss:$16 sps:$4 sm:$0xff]   ;;  %v3471_v39 = vld [vmem:[#allocation5 + $0x3c0] ss:$16 sps:$4 sm:$0xff]   ;;  %v3528_v20 = vld [vmem:[#allocation5 + $0xc8] ss:$16 sps:$4 sm:$0xff]  }
  0x51   :  { %1373 = vmatprep.subr.bf16.mxu1 %v3444_v21  ;;  %v3472_v40 = vld [vmem:[#allocation5 + $0x1a4] ss:$16 sps:$4 sm:$0xff]   ;;  %v3476_v42 = vld [vmem:[#allocation5 + $0x1a0] ss:$16 sps:$4 sm:$0xff]  }
  0x52   :  { %v3474_v41 = vld [vmem:[#allocation5 + $0x3a4] ss:$16 sps:$4 sm:$0xff]   ;;  %v3477_v43 = vld [vmem:[#allocation5 + $0x3a0] ss:$16 sps:$4 sm:$0xff]  }
  0x53   :  { %1333 = vmatpush1.bf16.msra.mxu0 %v3446_v22  ;;  %v3478_v44 = vld [vmem:[#allocation5 + $0x184] ss:$16 sps:$4 sm:$0xff]   ;;  %v93_v48 = vld [vmem:[#allocation2 + $0x8] sm:$0xff] }
  0x54   :  { %1374 = vmatpush1.bf16.msra.mxu1 %v3447_v23  ;;  %1334 = vmatprep.subr.bf16.mxu0 %v3448_v24  ;;  %v3480_v45 = vld [vmem:[#allocation5 + $0x384] ss:$16 sps:$4 sm:$0xff]   ;;  %v3482_v49 = vld [vmem:[#allocation5 + $0x180] ss:$16 sps:$4 sm:$0xff]   ;;  %v4138_v51 = vcombine.high %v93_v48, %v93_v48  ;;  %v4144_v7 = vcombine.low %v93_v48, %v93_v48  ;;  %v3536_v22 = vld [vmem:[#allocation5 + $0xac] ss:$16 sps:$4 sm:$0xff]  }
  0x55   :  { %1375 = vmatprep.subr.bf16.mxu1 %v3450_v25  ;;  %v92_v46 = vld [vmem:[#allocation2] sm:$0xff]  ;;  %v3483_v50 = vld [vmem:[#allocation5 + $0x380] ss:$16 sps:$4 sm:$0xff]   ;;  %v3572_v48 = vld [vmem:[#allocation5 + $0x1ec] ss:$16 sps:$4 sm:$0xff]  }
  0x56   :  { %v4136_v47 = vcombine.high %v92_v46, %v92_v46  ;;  %v3484_v52 = vld [vmem:[#allocation5 + $0x164] ss:$16 sps:$4 sm:$0xff]   ;;  %1395 = vmatprep.mubr.bf16.mxu1 %v4138_v51  ;;  %v3488_v54 = vld [vmem:[#allocation5 + $0x160] ss:$16 sps:$4 sm:$0xff]   ;;  %v4142_v6 = vcombine.low %v92_v46, %v92_v46  ;;  %v3534_v24 = vld [vmem:[#allocation5 + $0xa8] ss:$16 sps:$4 sm:$0xff]  }
  0x57   :  { %1335 = vmatpush1.bf16.msra.mxu0 %v3452_v26  ;;  %v3486_v53 = vld [vmem:[#allocation5 + $0x364] ss:$16 sps:$4 sm:$0xff]   ;;  %v3489_v55 = vld [vmem:[#allocation5 + $0x360] ss:$16 sps:$4 sm:$0xff]   ;;  %v3542_v26 = vld [vmem:[#allocation5 + $0x8c] ss:$16 sps:$4 sm:$0xff]  }
  0x58   :  { %1376 = vmatpush1.bf16.msra.mxu1 %v3453_v27  ;;  %1336 = vmatprep.subr.bf16.mxu0 %v3454_v28  ;;  %v3490_v56 = vld [vmem:[#allocation5 + $0x144] ss:$16 sps:$4 sm:$0xff]   ;;  %v3494_v58 = vld [vmem:[#allocation5 + $0x140] ss:$16 sps:$4 sm:$0xff]   ;;  %v3540_v28 = vld [vmem:[#allocation5 + $0x88] ss:$16 sps:$4 sm:$0xff]  }
  0x59   :  { %1377 = vmatprep.subr.bf16.mxu1 %v3456_v29  ;;  %1354 = vmatprep.mubr.bf16.mxu0 %v4136_v47  ;;  %v3492_v57 = vld [vmem:[#allocation5 + $0x344] ss:$16 sps:$4 sm:$0xff]   ;;  %v3495_v59 = vld [vmem:[#allocation5 + $0x340] ss:$16 sps:$4 sm:$0xff]   ;;  %v3564_v46 = vld [vmem:[#allocation5 + $0x8] ss:$16 sps:$4 sm:$0xff]  }
  0x5a   :  { %v3496_v60 = vld [vmem:[#allocation5 + $0x124] ss:$16 sps:$4 sm:$0xff]   ;;  %v3500_v62 = vld [vmem:[#allocation5 + $0x120] ss:$16 sps:$4 sm:$0xff]  }
  0x5b   :  { %1337 = vmatpush1.bf16.msra.mxu0 %v3458_v30  ;;  %v3498_v61 = vld [vmem:[#allocation5 + $0x324] ss:$16 sps:$4 sm:$0xff]   ;;  %v3501_v63 = vld [vmem:[#allocation5 + $0x320] ss:$16 sps:$4 sm:$0xff]   ;;  %v3548_v30 = vld [vmem:[#allocation5 + $0x6c] ss:$16 sps:$4 sm:$0xff]  }
  0x5c   :  { %1378 = vmatpush1.bf16.msra.mxu1 %v3459_v31  ;;  %1338 = vmatprep.subr.bf16.mxu0 %v3460_v32  ;;  %v3502_v0 = vld [vmem:[#allocation5 + $0x104] ss:$16 sps:$4 sm:$0xff]   ;;  %v3506_v2 = vld [vmem:[#allocation5 + $0x100] ss:$16 sps:$4 sm:$0xff]  }
  0x5d   :  { %1379 = vmatprep.subr.bf16.mxu1 %v3462_v33  ;;  %v3504_v1 = vld [vmem:[#allocation5 + $0x304] ss:$16 sps:$4 sm:$0xff]   ;;  %v3507_v3 = vld [vmem:[#allocation5 + $0x300] ss:$16 sps:$4 sm:$0xff]  }
  0x5e   :  { %v3514_v4 = vld [vmem:[#allocation5 + $0x4e4] ss:$16 sps:$4 sm:$0xff]   ;;  %v3512_v8 = vld [vmem:[#allocation5 + $0x4e0] ss:$16 sps:$4 sm:$0xff]  }
  0x5f   :  { %1339 = vmatpush2.bf16.msra.mxu0 %v3464_v34  ;;  %v3517_v5 = vld [vmem:[#allocation5 + $0x604] ss:$16 sps:$4 sm:$0xff]   ;;  %v3515_v9 = vld [vmem:[#allocation5 + $0x600] ss:$16 sps:$4 sm:$0xff]   ;;  %v3546_v34 = vld [vmem:[#allocation5 + $0x68] ss:$16 sps:$4 sm:$0xff]  }
  0x60   :  { %1380 = vmatpush2.bf16.msra.mxu1 %v3465_v35  ;;  %1340 = vmatprep.subr.bf16.mxu0 %v3466_v36  ;;  %v3520_v10 = vld [vmem:[#allocation5 + $0x4c4] ss:$16 sps:$4 sm:$0xff]   ;;  %v3518_v12 = vld [vmem:[#allocation5 + $0x4c0] ss:$16 sps:$4 sm:$0xff]   ;;  %v3554_v36 = vld [vmem:[#allocation5 + $0x4c] ss:$16 sps:$4 sm:$0xff]  }
  0x61   :  { %1381 = vmatprep.subr.bf16.mxu1 %v3468_v37  ;;  %v3526_v14 = vld [vmem:[#allocation5 + $0x4a4] ss:$16 sps:$4 sm:$0xff]   ;;  %v3524_v16 = vld [vmem:[#allocation5 + $0x4a0] ss:$16 sps:$4 sm:$0xff]  }
  0x62   :  { %v3533_v19 = vld [vmem:[#allocation5 + $0x484] ss:$16 sps:$4 sm:$0xff]   ;;  %v3531_v21 = vld [vmem:[#allocation5 + $0x480] ss:$16 sps:$4 sm:$0xff]  }
  0x63   :  { %1341 = vmatpush2.bf16.msra.mxu0 %v3470_v38  ;;  %v3539_v23 = vld [vmem:[#allocation5 + $0x464] ss:$16 sps:$4 sm:$0xff]   ;;  %v3537_v25 = vld [vmem:[#allocation5 + $0x460] ss:$16 sps:$4 sm:$0xff]   ;;  %v3552_v38 = vld [vmem:[#allocation5 + $0x48] ss:$16 sps:$4 sm:$0xff]  }
  0x64   :  { %1382 = vmatpush2.bf16.msra.mxu1 %v3471_v39  ;;  %1342 = vmatprep.subr.bf16.mxu0 %v3472_v40  ;;  %v3545_v27 = vld [vmem:[#allocation5 + $0x444] ss:$16 sps:$4 sm:$0xff]   ;;  %v3543_v29 = vld [vmem:[#allocation5 + $0x440] ss:$16 sps:$4 sm:$0xff]   ;;  %v3560_v40 = vld [vmem:[#allocation5 + $0x2c] ss:$16 sps:$4 sm:$0xff]  }
  0x65   :  { %1383 = vmatprep.subr.bf16.mxu1 %v3474_v41  ;;  %v3551_v31 = vld [vmem:[#allocation5 + $0x424] ss:$16 sps:$4 sm:$0xff]   ;;  %v3549_v35 = vld [vmem:[#allocation5 + $0x420] ss:$16 sps:$4 sm:$0xff]  }
  0x66   :  { %v4151_v32 = vld [vmem:[#allocation2 + $0x10] sm:$0xff]  ;;  %v3555_v39 = vld [vmem:[#allocation5 + $0x400] ss:$16 sps:$4 sm:$0xff]  }
  0x67   :  { %1343 = vmatpush2.bf16.msra.mxu0 %v3476_v42  ;;  %v4155_v33 = vcombine.high %v4151_v32, %v4151_v32  ;;  %v3557_v37 = vld [vmem:[#allocation5 + $0x404] ss:$16 sps:$4 sm:$0xff]   ;;  %v3558_v42 = vld [vmem:[#allocation5 + $0x28] ss:$16 sps:$4 sm:$0xff]  }
  0x68   :  { %1384 = vmatpush2.bf16.msra.mxu1 %v3477_v43  ;;  %1344 = vmatprep.subr.bf16.mxu0 %v3478_v44  ;;  %v3563_v41 = vld [vmem:[#allocation5 + $0x5e4] ss:$16 sps:$4 sm:$0xff]   ;;  %v3561_v43 = vld [vmem:[#allocation5 + $0x5e0] ss:$16 sps:$4 sm:$0xff]   ;;  %v3566_v44 = vld [vmem:[#allocation5 + $0xc] ss:$16 sps:$4 sm:$0xff]  }
  0x69   :  { %1385 = vmatprep.subr.bf16.mxu1 %v3480_v45  ;;  %v3569_v45 = vld [vmem:[#allocation5 + $0x5c4] ss:$16 sps:$4 sm:$0xff]  }
  0x6b   :  { %1345 = vmatpush2.bf16.msra.mxu0 %v3482_v49  ;;  %v3575_v49 = vld [vmem:[#allocation5 + $0x5a4] ss:$16 sps:$4 sm:$0xff]  }
  0x6c   :  { %1386 = vmatpush2.bf16.msra.mxu1 %v3483_v50  ;;  %1346 = vmatprep.subr.bf16.mxu0 %v3484_v52  ;;  %v3570_v50 = vld [vmem:[#allocation5 + $0x1e8] ss:$16 sps:$4 sm:$0xff]   ;;  %v3573_v52 = vld [vmem:[#allocation5 + $0x5a0] ss:$16 sps:$4 sm:$0xff]  }
  0x6d   :  { %1387 = vmatprep.subr.bf16.mxu1 %v3486_v53  ;;  %v3578_v53 = vld [vmem:[#allocation5 + $0x1cc] ss:$16 sps:$4 sm:$0xff]  }
  0x6f   :  { %1347 = vmatpush2.bf16.msra.mxu0 %v3488_v54  ;;  %v3581_v54 = vld [vmem:[#allocation5 + $0x584] ss:$16 sps:$4 sm:$0xff]  }
  0x70   :  { %1388 = vmatpush2.bf16.msra.mxu1 %v3489_v55  ;;  %1348 = vmatprep.subr.bf16.mxu0 %v3490_v56  ;;  %v3576_v55 = vld [vmem:[#allocation5 + $0x1c8] ss:$16 sps:$4 sm:$0xff]   ;;  %v3579_v56 = vld [vmem:[#allocation5 + $0x580] ss:$16 sps:$4 sm:$0xff]  }
  0x71   :  { %1389 = vmatprep.subr.bf16.mxu1 %v3492_v57  ;;  %v3584_v57 = vld [vmem:[#allocation5 + $0x1ac] ss:$16 sps:$4 sm:$0xff]  }
  0x73   :  { %1349 = vmatpush2.bf16.msra.mxu0 %v3494_v58  ;;  %v3587_v58 = vld [vmem:[#allocation5 + $0x564] ss:$16 sps:$4 sm:$0xff]  }
  0x74   :  { %1390 = vmatpush2.bf16.msra.mxu1 %v3495_v59  ;;  %1350 = vmatprep.subr.bf16.mxu0 %v3496_v60  ;;  %v3582_v59 = vld [vmem:[#allocation5 + $0x1a8] ss:$16 sps:$4 sm:$0xff]   ;;  %v3585_v60 = vld [vmem:[#allocation5 + $0x560] ss:$16 sps:$4 sm:$0xff]  }
  0x75   :  { %1391 = vmatprep.subr.bf16.mxu1 %v3498_v61  ;;  %v3590_v61 = vld [vmem:[#allocation5 + $0x18c] ss:$16 sps:$4 sm:$0xff]  }
  0x77   :  { %1351 = vmatpush2.bf16.msra.mxu0 %v3500_v62  ;;  %v3593_v62 = vld [vmem:[#allocation5 + $0x544] ss:$16 sps:$4 sm:$0xff]  }
  0x78   :  { %1392 = vmatpush2.bf16.msra.mxu1 %v3501_v63  ;;  %1352 = vmatprep.subr.bf16.mxu0 %v3502_v0  ;;  %v3588_v63 = vld [vmem:[#allocation5 + $0x188] ss:$16 sps:$4 sm:$0xff]   ;;  %v3591_v0 = vld [vmem:[#allocation5 + $0x540] ss:$16 sps:$4 sm:$0xff]  }
  0x79   :  { %1393 = vmatprep.subr.bf16.mxu1 %v3504_v1  ;;  %v3596_v1 = vld [vmem:[#allocation5 + $0x16c] ss:$16 sps:$4 sm:$0xff]  }
  0x7b   :  { %1353 = vmatpush2.bf16.msra.mxu0 %v3506_v2  ;;  %v3599_v2 = vld [vmem:[#allocation5 + $0x524] ss:$16 sps:$4 sm:$0xff]  }
  0x7c   :  { %1394 = vmatpush2.bf16.msra.mxu1 %v3507_v3  ;;  %1404 = vmatprep.subr.bf16.mxu0 %v3514_v4  ;;  %v3594_v3 = vld [vmem:[#allocation5 + $0x168] ss:$16 sps:$4 sm:$0xff]   ;;  %v3597_v4 = vld [vmem:[#allocation5 + $0x520] ss:$16 sps:$4 sm:$0xff]  }
  0x7d   :  { %1459 = vmatprep.subr.bf16.mxu1 %v3517_v5  ;;  %v3602_v5 = vld [vmem:[#allocation5 + $0x14c] ss:$16 sps:$4 sm:$0xff]  }
  0x7e   :  { %1355 = vmatmul.mubr.bf16.vlgmr.msra.gmra.mxu0 %v4142_v6 }
  0x7f   :  { %1396 = vmatmul.mubr.bf16.vlgmr.msra.gmra.mxu1 %v4144_v7  ;;  %1405 = vmatpush1.bf16.msra.mxu0 %v3512_v8  ;;  %v3605_v8 = vld [vmem:[#allocation5 + $0x504] ss:$16 sps:$4 sm:$0xff]  }
  0x80   :  { %1460 = vmatpush1.bf16.msra.mxu1 %v3515_v9  ;;  %1406 = vmatprep.subr.bf16.mxu0 %v3520_v10  ;;  %v3600_v9 = vld [vmem:[#allocation5 + $0x148] ss:$16 sps:$4 sm:$0xff]   ;;  %v3603_v10 = vld [vmem:[#allocation5 + $0x500] ss:$16 sps:$4 sm:$0xff]  }
  0x81   :  { %1477 = vmatprep.mubr.bf16.mxu1 %v4079_v13  ;;  %1486 = vmatprep.subr.bf16.mxu1 %v3523_v11  ;;  %v3610_v11 = vld [vmem:[#allocation5 + $0x12c] ss:$16 sps:$4 sm:$0xff]  }
  0x82   :  { %1436 = vmatprep.mubr.bf16.mxu0 %v4155_v33 }
  0x83   :  { %1407 = vmatpush1.bf16.msra.mxu0 %v3518_v12  ;;  %v3613_v12 = vld [vmem:[#allocation5 + $0x2ec] ss:$16 sps:$4 sm:$0xff]  }
  0x84   :  { %1408 = vmatprep.subr.bf16.mxu0 %v3526_v14  ;;  %v4160_v14 = vcombine.low %v4151_v32, %v4151_v32  ;;  %v3635_v32 = vld [vmem:[#allocation5 + $0x268] ss:$16 sps:$4 sm:$0xff]  }
  0x87   :  { %3194 = vmatmul.mubr.msk.bf16.vlgmr.msra.gmra.mxu1 %vm1318_vm0, %v3527_v17  ;;  %1409 = vmatpush1.bf16.msra.mxu0 %v3524_v16  ;;  %v3611_v16 = vld [vmem:[#allocation5 + $0x2e8] ss:$16 sps:$4 sm:$0xff]   ;;  %v3616_v17 = vld [vmem:[#allocation5 + $0x10c] ss:$16 sps:$4 sm:$0xff]  }
  0x88   :  { %1487 = vmatpush1.bf16.msra.mxu1 %v3521_v15  ;;  %1410 = vmatprep.subr.bf16.mxu0 %v3533_v19  ;;  %v3608_v15 = vld [vmem:[#allocation5 + $0x128] ss:$16 sps:$4 sm:$0xff]  }
  0x89   :  { %1488 = vmatprep.subr.bf16.mxu1 %v3530_v18  ;;  %1518 = vmatprep.mubr.bf16.mxu1 %v4136_v47  ;;  %v3567_v47 = vld [vmem:[#allocation5 + $0x5c0] ss:$16 sps:$4 sm:$0xff]   ;;  %v3619_v18 = vld [vmem:[#allocation5 + $0x2cc] ss:$16 sps:$4 sm:$0xff]   ;;  %v3614_v19 = vld [vmem:[#allocation5 + $0x108] ss:$16 sps:$4 sm:$0xff]  }
  0x8b   :  { %1411 = vmatpush1.bf16.msra.mxu0 %v3531_v21  ;;  %v3622_v21 = vld [vmem:[#allocation5 + $0x4ec] ss:$16 sps:$4 sm:$0xff]  }
  0x8c   :  { %1489 = vmatpush1.bf16.msra.mxu1 %v3528_v20  ;;  %1412 = vmatprep.subr.bf16.mxu0 %v3539_v23  ;;  %v3617_v20 = vld [vmem:[#allocation5 + $0x2c8] ss:$16 sps:$4 sm:$0xff]  }
  0x8d   :  { %1490 = vmatprep.subr.bf16.mxu1 %v3536_v22  ;;  %v3625_v22 = vld [vmem:[#allocation5 + $0x2ac] ss:$16 sps:$4 sm:$0xff]   ;;  %v3620_v23 = vld [vmem:[#allocation5 + $0x4e8] ss:$16 sps:$4 sm:$0xff]  }
  0x8f   :  { %1413 = vmatpush1.bf16.msra.mxu0 %v3537_v25  ;;  %v3628_v25 = vld [vmem:[#allocation5 + $0x4cc] ss:$16 sps:$4 sm:$0xff]  }
  0x90   :  { %1491 = vmatpush1.bf16.msra.mxu1 %v3534_v24  ;;  %1414 = vmatprep.subr.bf16.mxu0 %v3545_v27  ;;  %v3623_v24 = vld [vmem:[#allocation5 + $0x2a8] ss:$16 sps:$4 sm:$0xff]  }
  0x91   :  { %1492 = vmatprep.subr.bf16.mxu1 %v3542_v26  ;;  %v3631_v26 = vld [vmem:[#allocation5 + $0x28c] ss:$16 sps:$4 sm:$0xff]   ;;  %v3626_v27 = vld [vmem:[#allocation5 + $0x4c8] ss:$16 sps:$4 sm:$0xff]  }
  0x93   :  { %1415 = vmatpush1.bf16.msra.mxu0 %v3543_v29  ;;  %v3634_v29 = vld [vmem:[#allocation5 + $0x4ac] ss:$16 sps:$4 sm:$0xff]  }
  0x94   :  { %1493 = vmatpush1.bf16.msra.mxu1 %v3540_v28  ;;  %1416 = vmatprep.subr.bf16.mxu0 %v3551_v31  ;;  %v3629_v28 = vld [vmem:[#allocation5 + $0x288] ss:$16 sps:$4 sm:$0xff]  }
  0x95   :  { %1494 = vmatprep.subr.bf16.mxu1 %v3548_v30  ;;  %v3637_v30 = vld [vmem:[#allocation5 + $0x26c] ss:$16 sps:$4 sm:$0xff]   ;;  %v3632_v31 = vld [vmem:[#allocation5 + $0x4a8] ss:$16 sps:$4 sm:$0xff]  }
  0x97   :  { %1417 = vmatpush1.bf16.msra.mxu0 %v3549_v35  ;;  %v3638_v35 = vld [vmem:[#allocation5 + $0x488] ss:$16 sps:$4 sm:$0xff]  }
  0x98   :  { %1495 = vmatpush1.bf16.msra.mxu1 %v3546_v34  ;;  %1418 = vmatprep.subr.bf16.mxu0 %v3557_v37  ;;  %v3643_v34 = vld [vmem:[#allocation5 + $0x24c] ss:$16 sps:$4 sm:$0xff]  }
  0x99   :  { %1496 = vmatprep.subr.bf16.mxu1 %v3554_v36  ;;  %v3646_v36 = vld [vmem:[#allocation5 + $0x46c] ss:$16 sps:$4 sm:$0xff]  }
  0x9a   :  { %v3649_v37 = vld [vmem:[#allocation5 + $0x22c] ss:$16 sps:$4 sm:$0xff]  }
  0x9b   :  { %1419 = vmatpush1.bf16.msra.mxu0 %v3555_v39  ;;  %v3647_v39 = vld [vmem:[#allocation5 + $0x228] ss:$16 sps:$4 sm:$0xff]  }
  0x9c   :  { %1497 = vmatpush1.bf16.msra.mxu1 %v3552_v38  ;;  %1420 = vmatprep.subr.bf16.mxu0 %v3563_v41  ;;  %v3644_v38 = vld [vmem:[#allocation5 + $0x468] ss:$16 sps:$4 sm:$0xff]  }
  0x9d   :  { %1498 = vmatprep.subr.bf16.mxu1 %v3560_v40  ;;  %v3655_v40 = vld [vmem:[#allocation5 + $0x20c] ss:$16 sps:$4 sm:$0xff]   ;;  %v3650_v41 = vld [vmem:[#allocation5 + $0x448] ss:$16 sps:$4 sm:$0xff]  }
  0x9f   :  { %1421 = vmatpush2.bf16.msra.mxu0 %v3561_v43  ;;  %v3658_v43 = vld [vmem:[#allocation5 + $0x42c] ss:$16 sps:$4 sm:$0xff]  }
  0xa0   :  { %1499 = vmatpush1.bf16.msra.mxu1 %v3558_v42  ;;  %1422 = vmatprep.subr.bf16.mxu0 %v3569_v45  ;;  %v3653_v42 = vld [vmem:[#allocation5 + $0x208] ss:$16 sps:$4 sm:$0xff]  }
  0xa1   :  { %1500 = vmatprep.subr.bf16.mxu1 %v3566_v44  ;;  %v3661_v44 = vld [vmem:[#allocation5 + $0x3ec] ss:$16 sps:$4 sm:$0xff]   ;;  %v3656_v45 = vld [vmem:[#allocation5 + $0x428] ss:$16 sps:$4 sm:$0xff]  }
  0xa3   :  { %1423 = vmatpush2.bf16.msra.mxu0 %v3567_v47  ;;  %v3664_v47 = vld [vmem:[#allocation5 + $0x40c] ss:$16 sps:$4 sm:$0xff]  }
  0xa4   :  { %1501 = vmatpush1.bf16.msra.mxu1 %v3564_v46  ;;  %1424 = vmatprep.subr.bf16.mxu0 %v3575_v49  ;;  %v3659_v46 = vld [vmem:[#allocation5 + $0x3e8] ss:$16 sps:$4 sm:$0xff]  }
  0xa5   :  { %1502 = vmatprep.subr.bf16.mxu1 %v3572_v48  ;;  %v3667_v48 = vld [vmem:[#allocation5 + $0x3cc] ss:$16 sps:$4 sm:$0xff]   ;;  %v3662_v49 = vld [vmem:[#allocation5 + $0x408] ss:$16 sps:$4 sm:$0xff]  }
  0xa7   :  { %1425 = vmatpush2.bf16.msra.mxu0 %v3573_v52  ;;  %v3670_v52 = vld [vmem:[#allocation5 + $0x5ec] ss:$16 sps:$4 sm:$0xff]  }
  0xa8   :  { %1503 = vmatpush2.bf16.msra.mxu1 %v3570_v50  ;;  %1426 = vmatprep.subr.bf16.mxu0 %v3581_v54  ;;  %v3665_v50 = vld [vmem:[#allocation5 + $0x3c8] ss:$16 sps:$4 sm:$0xff]  }
  0xa9   :  { %1504 = vmatprep.subr.bf16.mxu1 %v3578_v53  ;;  %v3673_v53 = vld [vmem:[#allocation5 + $0x3ac] ss:$16 sps:$4 sm:$0xff]   ;;  %v3668_v54 = vld [vmem:[#allocation5 + $0x5e8] ss:$16 sps:$4 sm:$0xff]  }
  0xab   :  { %1427 = vmatpush2.bf16.msra.mxu0 %v3579_v56  ;;  %v3676_v56 = vld [vmem:[#allocation5 + $0x5cc] ss:$16 sps:$4 sm:$0xff]  }
  0xac   :  { %1505 = vmatpush2.bf16.msra.mxu1 %v3576_v55  ;;  %1428 = vmatprep.subr.bf16.mxu0 %v3587_v58  ;;  %v3671_v55 = vld [vmem:[#allocation5 + $0x3a8] ss:$16 sps:$4 sm:$0xff]  }
  0xad   :  { %1506 = vmatprep.subr.bf16.mxu1 %v3584_v57  ;;  %v3679_v57 = vld [vmem:[#allocation5 + $0x38c] ss:$16 sps:$4 sm:$0xff]   ;;  %v3674_v58 = vld [vmem:[#allocation5 + $0x5c8] ss:$16 sps:$4 sm:$0xff]  }
  0xaf   :  { %1429 = vmatpush2.bf16.msra.mxu0 %v3585_v60  ;;  %v3682_v60 = vld [vmem:[#allocation5 + $0x5ac] ss:$16 sps:$4 sm:$0xff]  }
  0xb0   :  { %1507 = vmatpush2.bf16.msra.mxu1 %v3582_v59  ;;  %1430 = vmatprep.subr.bf16.mxu0 %v3593_v62  ;;  %v3677_v59 = vld [vmem:[#allocation5 + $0x388] ss:$16 sps:$4 sm:$0xff]  }
  0xb1   :  { %1508 = vmatprep.subr.bf16.mxu1 %v3590_v61  ;;  %v3685_v61 = vld [vmem:[#allocation5 + $0x36c] ss:$16 sps:$4 sm:$0xff]   ;;  %v3680_v62 = vld [vmem:[#allocation5 + $0x5a8] ss:$16 sps:$4 sm:$0xff]  }
  0xb3   :  { %1431 = vmatpush2.bf16.msra.mxu0 %v3591_v0  ;;  %v3688_v0 = vld [vmem:[#allocation5 + $0x58c] ss:$16 sps:$4 sm:$0xff]  }
  0xb4   :  { %1509 = vmatpush2.bf16.msra.mxu1 %v3588_v63  ;;  %1432 = vmatprep.subr.bf16.mxu0 %v3599_v2  ;;  %v3683_v63 = vld [vmem:[#allocation5 + $0x368] ss:$16 sps:$4 sm:$0xff]  }
  0xb5   :  { %1510 = vmatprep.subr.bf16.mxu1 %v3596_v1  ;;  %v3691_v1 = vld [vmem:[#allocation5 + $0x34c] ss:$16 sps:$4 sm:$0xff]   ;;  %v3686_v2 = vld [vmem:[#allocation5 + $0x588] ss:$16 sps:$4 sm:$0xff]  }
  0xb7   :  { %1433 = vmatpush2.bf16.msra.mxu0 %v3597_v4  ;;  %v3694_v4 = vld [vmem:[#allocation5 + $0x56c] ss:$16 sps:$4 sm:$0xff]  }
  0xb8   :  { %1511 = vmatpush2.bf16.msra.mxu1 %v3594_v3  ;;  %1434 = vmatprep.subr.bf16.mxu0 %v3605_v8  ;;  %v3689_v3 = vld [vmem:[#allocation5 + $0x348] ss:$16 sps:$4 sm:$0xff]  }
  0xb9   :  { %1512 = vmatprep.subr.bf16.mxu1 %v3602_v5  ;;  %v3697_v5 = vld [vmem:[#allocation5 + $0x32c] ss:$16 sps:$4 sm:$0xff]   ;;  %v3692_v8 = vld [vmem:[#allocation5 + $0x568] ss:$16 sps:$4 sm:$0xff]  }
  0xbb   :  { %1435 = vmatpush2.bf16.msra.mxu0 %v3603_v10  ;;  %v3700_v10 = vld [vmem:[#allocation5 + $0x54c] ss:$16 sps:$4 sm:$0xff]  }
  0xbc   :  { %1513 = vmatpush2.bf16.msra.mxu1 %v3600_v9  ;;  %1527 = vmatprep.subr.bf16.mxu0 %v3613_v12  ;;  %v3695_v9 = vld [vmem:[#allocation5 + $0x328] ss:$16 sps:$4 sm:$0xff]  }
  0xbd   :  { %1514 = vmatprep.subr.bf16.mxu1 %v3610_v11  ;;  %v3703_v11 = vld [vmem:[#allocation5 + $0x30c] ss:$16 sps:$4 sm:$0xff]   ;;  %v3698_v12 = vld [vmem:[#allocation5 + $0x548] ss:$16 sps:$4 sm:$0xff]  }
  0xbe   :  { %1437 = vmatmul.mubr.bf16.vlgmr.msra.gmra.mxu0 %v4160_v14 }
  0xbf   :  { %1528 = vmatpush1.bf16.msra.mxu0 %v3611_v16  ;;  %1559 = vmatprep.mubr.bf16.mxu0 %v4138_v51  ;;  %v3640_v51 = vld [vmem:[#allocation5 + $0x48c] ss:$16 sps:$4 sm:$0xff]  }
  0xc0   :  { %1515 = vmatpush2.bf16.msra.mxu1 %v3608_v15  ;;  %1529 = vmatprep.subr.bf16.mxu0 %v3619_v18  ;;  %v3701_v15 = vld [vmem:[#allocation5 + $0x308] ss:$16 sps:$4 sm:$0xff]   ;;  %v3706_v16 = vld [vmem:[#allocation5 + $0x52c] ss:$16 sps:$4 sm:$0xff]  }
  0xc1   :  { %1516 = vmatprep.subr.bf16.mxu1 %v3616_v17  ;;  %v3709_v17 = vld [vmem:[#allocation5 + $0x60c] ss:$16 sps:$4 sm:$0xff]   ;;  %v3704_v18 = vld [vmem:[#allocation5 + $0x528] ss:$16 sps:$4 sm:$0xff]  }
  0xc3   :  { %1530 = vmatpush1.bf16.msra.mxu0 %v3617_v20  ;;  %v3712_v20 = vld [vmem:[#allocation5 + $0x50c] ss:$16 sps:$4 sm:$0xff]  }
  0xc4   :  { %1517 = vmatpush2.bf16.msra.mxu1 %v3614_v19  ;;  %1531 = vmatprep.subr.bf16.mxu0 %v3625_v22  ;;  %v3707_v19 = vld [vmem:[#allocation5 + $0x608] ss:$16 sps:$4 sm:$0xff]  }
  0xc5   :  { %1568 = vmatprep.subr.bf16.mxu1 %v3622_v21  ;;  %v3715_v21 = vld [vmem:[#allocation8 + $0xe4] ss:$16 sps:$4 sm:$0xff]  }
  0xc6   :  { %v3710_v22 = vld [vmem:[#allocation5 + $0x508] ss:$16 sps:$4 sm:$0xff]  }
  0xc7   :  { %1519 = vmatmul.mubr.bf16.vlgmr.msra.gmra.mxu1 %v4142_v6  ;;  %1532 = vmatpush1.bf16.msra.mxu0 %v3623_v24  ;;  %v3641_v6 = vld [vmem:[#allocation5 + $0x248] ss:$16 sps:$4 sm:$0xff]  }
  0xc8   :  { %1569 = vmatpush1.bf16.msra.mxu1 %v3620_v23  ;;  %1533 = vmatprep.subr.bf16.mxu0 %v3631_v26  ;;  %v3713_v23 = vld [vmem:[#allocation8 + $0xe0] ss:$16 sps:$4 sm:$0xff]   ;;  %v3718_v24 = vld [vmem:[#allocation8 + $0xc4] ss:$16 sps:$4 sm:$0xff]   ;;  %v3941_v26 = vld [vmem:[#allocation2 + $0x18] ss:$0 sps:$4 sm:$0xff]  }
  0xc9   :  { %1570 = vmatprep.subr.bf16.mxu1 %v3628_v25  ;;  %1600 = vmatprep.mubr.bf16.mxu1 %v4155_v33  ;;  %v3652_v33 = vld [vmem:[#allocation5 + $0x44c] ss:$16 sps:$4 sm:$0xff]   ;;  %v3716_v25 = vld [vmem:[#allocation8 + $0xc0] ss:$16 sps:$4 sm:$0xff]  }
  0xcb   :  { %1534 = vmatpush1.bf16.msra.mxu0 %v3629_v28  ;;  %v3724_v28 = vld [vmem:[#allocation8 + $0x84] ss:$16 sps:$4 sm:$0xff]  }
  0xcc   :  { %1571 = vmatpush1.bf16.msra.mxu1 %v3626_v27  ;;  %1535 = vmatprep.subr.bf16.mxu0 %v3637_v30  ;;  %v3721_v27 = vld [vmem:[#allocation8 + $0xa4] ss:$16 sps:$4 sm:$0xff]  }
  0xcd   :  { %1572 = vmatprep.subr.bf16.mxu1 %v3634_v29  ;;  %v3722_v29 = vld [vmem:[#allocation8 + $0x80] ss:$16 sps:$4 sm:$0xff]   ;;  %v3769_v30 = vld [vmem:[#allocation8 + $0x2e4] ss:$16 sps:$4 sm:$0xff]  }
  0xcf   :  { %1536 = vmatpush1.bf16.msra.mxu0 %v3635_v32  ;;  %v3773_v32 = vld [vmem:[#allocation8 + $0x2c0] ss:$16 sps:$4 sm:$0xff]  }
  0xd0   :  { %1573 = vmatpush1.bf16.msra.mxu1 %v3632_v31  ;;  %1537 = vmatprep.subr.bf16.mxu0 %v3643_v34  ;;  %v3727_v31 = vld [vmem:[#allocation8 + $0x64] ss:$16 sps:$4 sm:$0xff]  }
  0xd1   :  { %1574 = vmatprep.subr.bf16.mxu1 %v3640_v51  ;;  %v3775_v51 = vld [vmem:[#allocation8 + $0x2c4] ss:$16 sps:$4 sm:$0xff]  }
  0xd2   :  { %v3730_v34 = vld [vmem:[#allocation8 + $0x44] ss:$16 sps:$4 sm:$0xff]  }
  0xd3   :  { %1538 = vmatpush1.bf16.msra.mxu0 %v3641_v6  ;;  %v3779_v6 = vld [vmem:[#allocation8 + $0x2a0] ss:$16 sps:$4 sm:$0xff]  }
  0xd4   :  { %1575 = vmatpush1.bf16.msra.mxu1 %v3638_v35  ;;  %1539 = vmatprep.subr.bf16.mxu0 %v3649_v37  ;;  %v3728_v35 = vld [vmem:[#allocation8 + $0x40] ss:$16 sps:$4 sm:$0xff]   ;;  %v3733_v37 = vld [vmem:[#allocation8 + $0x24] ss:$16 sps:$4 sm:$0xff]  }
  0xd5   :  { %1576 = vmatprep.subr.bf16.mxu1 %v3646_v36  ;;  %v3781_v36 = vld [vmem:[#allocation8 + $0x2a4] ss:$16 sps:$4 sm:$0xff]  }
  0xd7   :  { %1540 = vmatpush1.bf16.msra.mxu0 %v3647_v39  ;;  %v3785_v39 = vld [vmem:[#allocation8 + $0x280] ss:$16 sps:$4 sm:$0xff]  }
  0xd8   :  { %1577 = vmatpush1.bf16.msra.mxu1 %v3644_v38  ;;  %1541 = vmatprep.subr.bf16.mxu0 %v3655_v40  ;;  %v3731_v38 = vld [vmem:[#allocation8 + $0x20] ss:$16 sps:$4 sm:$0xff]   ;;  %v3736_v40 = vld [vmem:[#allocation8 + $0x4] ss:$16 sps:$4 sm:$0xff]  }
  0xd9   :  { %1578 = vmatprep.subr.bf16.mxu1 %v3652_v33  ;;  %v3787_v33 = vld [vmem:[#allocation8 + $0x284] ss:$16 sps:$4 sm:$0xff]  }
  0xdb   :  { %1542 = vmatpush1.bf16.msra.mxu0 %v3653_v42  ;;  %v3791_v42 = vld [vmem:[#allocation8 + $0x260] ss:$16 sps:$4 sm:$0xff]  }
  0xdc   :  { %1579 = vmatpush1.bf16.msra.mxu1 %v3650_v41  ;;  %1543 = vmatprep.subr.bf16.mxu0 %v3661_v44  ;;  %v3734_v41 = vld [vmem:[#allocation8] ss:$16 sps:$4 sm:$0xff]   ;;  %v3739_v44 = vld [vmem:[#allocation8 + $0x1e4] ss:$16 sps:$4 sm:$0xff]  }
  0xdd   :  { %1580 = vmatprep.subr.bf16.mxu1 %v3658_v43  ;;  %v3793_v43 = vld [vmem:[#allocation8 + $0x264] ss:$16 sps:$4 sm:$0xff]  }
  0xdf   :  { %1544 = vmatpush2.bf16.msra.mxu0 %v3659_v46  ;;  %v3797_v46 = vld [vmem:[#allocation8 + $0x240] ss:$16 sps:$4 sm:$0xff]  }
  0xe0   :  { %1581 = vmatpush1.bf16.msra.mxu1 %v3656_v45  ;;  %1545 = vmatprep.subr.bf16.mxu0 %v3667_v48  ;;  %v3737_v45 = vld [vmem:[#allocation8 + $0x1e0] ss:$16 sps:$4 sm:$0xff]   ;;  %v3742_v48 = vld [vmem:[#allocation8 + $0x1c4] ss:$16 sps:$4 sm:$0xff]  }
  0xe1   :  { %1582 = vmatprep.subr.bf16.mxu1 %v3664_v47  ;;  %v3799_v47 = vld [vmem:[#allocation8 + $0x244] ss:$16 sps:$4 sm:$0xff]  }
  0xe3   :  { %1546 = vmatpush2.bf16.msra.mxu0 %v3665_v50  ;;  %v3803_v50 = vld [vmem:[#allocation8 + $0x220] ss:$16 sps:$4 sm:$0xff]  }
  0xe4   :  { %1583 = vmatpush1.bf16.msra.mxu1 %v3662_v49  ;;  %1547 = vmatprep.subr.bf16.mxu0 %v3673_v53  ;;  %v3740_v49 = vld [vmem:[#allocation8 + $0x1c0] ss:$16 sps:$4 sm:$0xff]   ;;  %v3745_v53 = vld [vmem:[#allocation8 + $0x1a4] ss:$16 sps:$4 sm:$0xff]  }
  0xe5   :  { %1584 = vmatprep.subr.bf16.mxu1 %v3670_v52  ;;  %v3805_v52 = vld [vmem:[#allocation8 + $0x224] ss:$16 sps:$4 sm:$0xff]  }
  0xe7   :  { %1548 = vmatpush2.bf16.msra.mxu0 %v3671_v55  ;;  %v3809_v55 = vld [vmem:[#allocation8 + $0x200] ss:$16 sps:$4 sm:$0xff]  }
  0xe8   :  { %1585 = vmatpush2.bf16.msra.mxu1 %v3668_v54  ;;  %1549 = vmatprep.subr.bf16.mxu0 %v3679_v57  ;;  %v3743_v54 = vld [vmem:[#allocation8 + $0x1a0] ss:$16 sps:$4 sm:$0xff]   ;;  %v3748_v57 = vld [vmem:[#allocation8 + $0x184] ss:$16 sps:$4 sm:$0xff]  }
  0xe9   :  { %1586 = vmatprep.subr.bf16.mxu1 %v3676_v56  ;;  %v3811_v56 = vld [vmem:[#allocation8 + $0x204] ss:$16 sps:$4 sm:$0xff]  }
  0xeb   :  { %1550 = vmatpush2.bf16.msra.mxu0 %v3677_v59  ;;  %v3815_v59 = vld [vmem:[#allocation8 + $0x3e0] ss:$16 sps:$4 sm:$0xff]  }
  0xec   :  { %1587 = vmatpush2.bf16.msra.mxu1 %v3674_v58  ;;  %1551 = vmatprep.subr.bf16.mxu0 %v3685_v61  ;;  %v3746_v58 = vld [vmem:[#allocation8 + $0x180] ss:$16 sps:$4 sm:$0xff]   ;;  %v3751_v61 = vld [vmem:[#allocation8 + $0x164] ss:$16 sps:$4 sm:$0xff]  }
  0xed   :  { %1588 = vmatprep.subr.bf16.mxu1 %v3682_v60  ;;  %v3817_v60 = vld [vmem:[#allocation8 + $0x3e4] ss:$16 sps:$4 sm:$0xff]  }
  0xef   :  { %1552 = vmatpush2.bf16.msra.mxu0 %v3683_v63  ;;  %v3821_v63 = vld [vmem:[#allocation8 + $0x3c0] ss:$16 sps:$4 sm:$0xff]  }
  0xf0   :  { %1589 = vmatpush2.bf16.msra.mxu1 %v3680_v62  ;;  %1553 = vmatprep.subr.bf16.mxu0 %v3691_v1  ;;  %v3749_v62 = vld [vmem:[#allocation8 + $0x160] ss:$16 sps:$4 sm:$0xff]   ;;  %v3754_v1 = vld [vmem:[#allocation8 + $0x144] ss:$16 sps:$4 sm:$0xff]  }
  0xf1   :  { %1590 = vmatprep.subr.bf16.mxu1 %v3688_v0  ;;  %v3823_v0 = vld [vmem:[#allocation8 + $0x3c4] ss:$16 sps:$4 sm:$0xff]  }
  0xf3   :  { %1554 = vmatpush2.bf16.msra.mxu0 %v3689_v3  ;;  %v3827_v3 = vld [vmem:[#allocation8 + $0x3a0] ss:$16 sps:$4 sm:$0xff]  }
  0xf4   :  { %1591 = vmatpush2.bf16.msra.mxu1 %v3686_v2  ;;  %1555 = vmatprep.subr.bf16.mxu0 %v3697_v5  ;;  %v3752_v2 = vld [vmem:[#allocation8 + $0x140] ss:$16 sps:$4 sm:$0xff]   ;;  %v3757_v5 = vld [vmem:[#allocation8 + $0x124] ss:$16 sps:$4 sm:$0xff]  }
  0xf5   :  { %1592 = vmatprep.subr.bf16.mxu1 %v3694_v4  ;;  %v3829_v4 = vld [vmem:[#allocation8 + $0x3a4] ss:$16 sps:$4 sm:$0xff]  }
  0xf7   :  { %1556 = vmatpush2.bf16.msra.mxu0 %v3695_v9  ;;  %v3833_v9 = vld [vmem:[#allocation8 + $0x380] ss:$16 sps:$4 sm:$0xff]  }
  0xf8   :  { %1593 = vmatpush2.bf16.msra.mxu1 %v3692_v8  ;;  %1557 = vmatprep.subr.bf16.mxu0 %v3703_v11  ;;  %v3755_v8 = vld [vmem:[#allocation8 + $0x120] ss:$16 sps:$4 sm:$0xff]   ;;  %v3760_v11 = vld [vmem:[#allocation8 + $0x104] ss:$16 sps:$4 sm:$0xff]  }
  0xf9   :  { %1594 = vmatprep.subr.bf16.mxu1 %v3700_v10  ;;  %v3835_v10 = vld [vmem:[#allocation8 + $0x384] ss:$16 sps:$4 sm:$0xff]  }
  0xfb   :  { %1558 = vmatpush2.bf16.msra.mxu0 %v3701_v15 }
  0xfc   :  { %1595 = vmatpush2.bf16.msra.mxu1 %v3698_v12  ;;  %1623 = vmatprep.subr.bf16.mxu0 %v3709_v17  ;;  %v3841_v17 = vld [vmem:[#allocation8 + $0x364] ss:$16 sps:$4 sm:$0xff]  }
  0xfd   :  { %1596 = vmatprep.subr.bf16.mxu1 %v3706_v16  ;;  %v3758_v16 = vld [vmem:[#allocation8 + $0x100] ss:$16 sps:$4 sm:$0xff]  }
  0xfe   :  { %1560 = vmatmul.mubr.bf16.vlgmr.msra.gmra.mxu0 %v4144_v7  ;;  %v3719_v7 = vld [vmem:[#allocation8 + $0xa0] ss:$16 sps:$4 sm:$0xff]  }
  0xff   :  { %1624 = vmatpush1.bf16.msra.mxu0 %v3707_v19  ;;  %1641 = vmatprep.mubr.bf16.mxu0 %v4079_v13  ;;  %v3767_v13 = vld [vmem:[#allocation8 + $0x2e0] ss:$16 sps:$4 sm:$0xff]  }
 0x100   :  { %1597 = vmatpush2.bf16.msra.mxu1 %v3704_v18  ;;  %2448 = vmatprep.subr.bf16.mxu0 %v3715_v21  ;;  %v3839_v21 = vld [vmem:[#allocation8 + $0x360] ss:$16 sps:$4 sm:$0xff]  }
 0x101   :  { %1598 = vmatprep.subr.bf16.mxu1 %v3712_v20  ;;  %v3763_v20 = vld [vmem:[#allocation8 + $0xec] ss:$16 sps:$4 sm:$0xff]  }
 0x104   :  { %1599 = vmatpush2.bf16.msra.mxu1 %v3710_v22 }
 0x105   :  { %2489 = vmatprep.subr.bf16.mxu1 %v3769_v30 }
 0x106   :  { %3195 = vmatmul.mubr.msk.bf16.vlgmr.msra.gmra.mxu0 %vm1318_vm0, %v3941_v26 }
 0x107   :  { %1601 = vmatmul.mubr.bf16.vlgmr.msra.gmra.mxu1 %v4160_v14  ;;  %2449 = vmatpush1.bf16.msra.mxu0 %v3713_v23  ;;  %v3725_v14 = vld [vmem:[#allocation8 + $0x60] ss:$16 sps:$4 sm:$0xff]  }
 0x108   :  { %2450 = vmatprep.subr.bf16.mxu0 %v3718_v24  ;;  %2490 = vmatpush1.bf16.msra.mxu1 %v3767_v13  ;;  %v3847_v24 = vld [vmem:[#allocation8 + $0x344] ss:$16 sps:$4 sm:$0xff]   ;;  %v3851_v13 = vld [vmem:[#allocation8 + $0x320] ss:$16 sps:$4 sm:$0xff]  }
 0x109   :  { %2491 = vmatprep.subr.bf16.mxu1 %v3775_v51  ;;  %v3859_v51 = vld [vmem:[#allocation8 + $0x2ec] ss:$16 sps:$4 sm:$0xff]  }
 0x10b   :  { %2451 = vmatpush1.bf16.msra.mxu0 %v3716_v25 }
 0x10c   :  { %2452 = vmatprep.subr.bf16.mxu0 %v3721_v27  ;;  %2492 = vmatpush1.bf16.msra.mxu1 %v3773_v32  ;;  %v3845_v27 = vld [vmem:[#allocation8 + $0x340] ss:$16 sps:$4 sm:$0xff]  }
 0x10d   :  { %2493 = vmatprep.subr.bf16.mxu1 %v3781_v36  ;;  %v3854_v32 = vld [vmem:[#allocation8 + $0x300] ss:$16 sps:$4 sm:$0xff]   ;;  %v4173_v36 = vld [vmem:[#allocation7] sm:$0xf] }
 0x10f   :  { %2453 = vmatpush1.bf16.msra.mxu0 %v3719_v7 }
 0x110   :  { %2454 = vmatprep.subr.bf16.mxu0 %v3724_v28  ;;  %2494 = vmatpush1.bf16.msra.mxu1 %v3779_v6  ;;  %v3853_v28 = vld [vmem:[#allocation8 + $0x324] ss:$16 sps:$4 sm:$0xff]  }
 0x111   :  { %2495 = vmatprep.subr.bf16.mxu1 %v3787_v33 }
 0x113   :  { %2455 = vmatpush1.bf16.msra.mxu0 %v3722_v29 }
 0x114   :  { %2456 = vmatprep.subr.bf16.mxu0 %v3727_v31  ;;  %2496 = vmatpush1.bf16.msra.mxu1 %v3785_v39  ;;  %v3856_v31 = vld [vmem:[#allocation8 + $0x304] ss:$16 sps:$4 sm:$0xff]  }
 0x115   :  { %2497 = vmatprep.subr.bf16.mxu1 %v3793_v43 }
 0x117   :  { %2457 = vmatpush1.bf16.msra.mxu0 %v3725_v14 }
 0x118   :  { %2458 = vmatprep.subr.bf16.mxu0 %v3730_v34  ;;  %2498 = vmatpush1.bf16.msra.mxu1 %v3791_v42  ;;  %v294_v34 = vlaneseq }
 0x119   :  { %2499 = vmatprep.subr.bf16.mxu1 %v3799_v47 }
 0x11b   :  { %2459 = vmatpush1.bf16.msra.mxu0 %v3728_v35  ;;  %v4170_v35 = vshrl.u32 %v294_v34, 7 }
 0x11c   :  { %2460 = vmatprep.subr.bf16.mxu0 %v3733_v37  ;;  %2500 = vmatpush1.bf16.msra.mxu1 %v3797_v46 }
 0x11d   :  { %2501 = vmatprep.subr.bf16.mxu1 %v3805_v52  ;;  %v296_v6 = vsub.s32 0, %v4170_v35  ;;  %v300_v37 = vsub.s32 1, %v4170_v35 }
 0x11f   :  { %2461 = vmatpush1.bf16.msra.mxu0 %v3731_v38  ;;  %v297_v38 = vrot.slane %v4173_v36, %v296_v6  ;;  %v301_v39 = vrot.slane %v4173_v36, %v300_v37 }
 0x120   :  { %2462 = vmatprep.subr.bf16.mxu0 %v3736_v40  ;;  %2502 = vmatpush1.bf16.msra.mxu1 %v3803_v50 }
 0x121   :  { %2503 = vmatprep.subr.bf16.mxu1 %v3811_v56  ;;  %v3761_v56 = vld [vmem:[#allocation8 + $0xe8] ss:$16 sps:$4 sm:$0xff]  }
 0x123   :  { %2463 = vmatpush1.bf16.msra.mxu0 %v3734_v41 }
 0x124   :  { %2464 = vmatprep.subr.bf16.mxu0 %v3739_v44  ;;  %2504 = vmatpush1.bf16.msra.mxu1 %v3809_v55 }
 0x125   :  { %2505 = vmatprep.subr.bf16.mxu1 %v3817_v60 }
 0x127   :  { %2465 = vmatpush2.bf16.msra.mxu0 %v3737_v45 }
 0x128   :  { %2466 = vmatprep.subr.bf16.mxu0 %v3742_v48  ;;  %2506 = vmatpush2.bf16.msra.mxu1 %v3815_v59  ;;  %v3766_v59 = vld [vmem:[#allocation8 + $0xcc] ss:$16 sps:$4 sm:$0xff]  }
 0x129   :  { %2507 = vmatprep.subr.bf16.mxu1 %v3823_v0  ;;  %v3770_v0 = vld [vmem:[#allocation8 + $0xa8] ss:$16 sps:$4 sm:$0xff]  }
 0x12b   :  { %2467 = vmatpush2.bf16.msra.mxu0 %v3740_v49 }
 0x12c   :  { %2468 = vmatprep.subr.bf16.mxu0 %v3745_v53  ;;  %2508 = vmatpush2.bf16.msra.mxu1 %v3821_v63  ;;  %v3772_v63 = vld [vmem:[#allocation8 + $0xac] ss:$16 sps:$4 sm:$0xff]  }
 0x12d   :  { %2509 = vmatprep.subr.bf16.mxu1 %v3829_v4  ;;  %v3782_v4 = vld [vmem:[#allocation8 + $0x68] ss:$16 sps:$4 sm:$0xff]  }
 0x12f   :  { %2469 = vmatpush2.bf16.msra.mxu0 %v3743_v54 }
 0x130   :  { %2470 = vmatprep.subr.bf16.mxu0 %v3748_v57  ;;  %2510 = vmatpush2.bf16.msra.mxu1 %v3827_v3  ;;  %v3784_v3 = vld [vmem:[#allocation8 + $0x6c] ss:$16 sps:$4 sm:$0xff]  }
 0x131   :  { %2511 = vmatprep.subr.bf16.mxu1 %v3835_v10  ;;  %v3794_v10 = vld [vmem:[#allocation8 + $0x28] ss:$16 sps:$4 sm:$0xff]  }
 0x133   :  { %2471 = vmatpush2.bf16.msra.mxu0 %v3746_v58 }
 0x134   :  { %2472 = vmatprep.subr.bf16.mxu0 %v3751_v61  ;;  %2512 = vmatpush2.bf16.msra.mxu1 %v3833_v9  ;;  %v3764_v61 = vld [vmem:[#allocation8 + $0xc8] ss:$16 sps:$4 sm:$0xff]   ;;  %v3796_v9 = vld [vmem:[#allocation8 + $0x2c] ss:$16 sps:$4 sm:$0xff]  }
 0x135   :  { %2513 = vmatprep.subr.bf16.mxu1 %v3841_v17  ;;  %v3814_v17 = vld [vmem:[#allocation8 + $0x1cc] ss:$16 sps:$4 sm:$0xff]  }
 0x137   :  { %2473 = vmatpush2.bf16.msra.mxu0 %v3749_v62 }
 0x138   :  { %2474 = vmatprep.subr.bf16.mxu0 %v3754_v1  ;;  %2514 = vmatpush2.bf16.msra.mxu1 %v3839_v21  ;;  %v3778_v1 = vld [vmem:[#allocation8 + $0x8c] ss:$16 sps:$4 sm:$0xff]  }
 0x139   :  { %2515 = vmatprep.subr.bf16.mxu1 %v3847_v24  ;;  %v3826_v21 = vld [vmem:[#allocation8 + $0x18c] ss:$16 sps:$4 sm:$0xff]   ;;  %v3830_v24 = vld [vmem:[#allocation8 + $0x168] ss:$16 sps:$4 sm:$0xff]  }
 0x13b   :  { %2475 = vmatpush2.bf16.msra.mxu0 %v3752_v2  ;;  %v3776_v2 = vld [vmem:[#allocation8 + $0x88] ss:$16 sps:$4 sm:$0xff]  }
 0x13c   :  { %2476 = vmatprep.subr.bf16.mxu0 %v3757_v5  ;;  %2516 = vmatpush2.bf16.msra.mxu1 %v3845_v27  ;;  %v3790_v5 = vld [vmem:[#allocation8 + $0x4c] ss:$16 sps:$4 sm:$0xff]   ;;  %v3836_v27 = vld [vmem:[#allocation8 + $0x148] ss:$16 sps:$4 sm:$0xff]  }
 0x13d   :  { %2517 = vmatprep.subr.bf16.mxu1 %v3853_v28  ;;  %v308_v28 = vsub.s32 3, %v4170_v35 }
 0x13e   :  { %v1356_v12 = vpop.f32.mrf.mxu0 }
 0x13f   :  { %v1397_v15 = vpop.f32.mrf.mxu1  ;;  %2477 = vmatpush2.bf16.msra.mxu0 %v3755_v8  ;;  %v1357_v33 = vadd.f32 %v1356_v12, %v297_v38  ;;  %v3788_v8 = vld [vmem:[#allocation8 + $0x48] ss:$16 sps:$4 sm:$0xff]  }
 0x140   :  { %v1358_v18 = vpop.f32.mrf.mxu0  ;;  %2478 = vmatprep.subr.bf16.mxu0 %v3760_v11  ;;  %2518 = vmatpush2.bf16.msra.mxu1 %v3851_v13  ;;  %v3802_v11 = vld [vmem:[#allocation8 + $0xc] ss:$16 sps:$4 sm:$0xff]   ;;  %v3800_v12 = vld [vmem:[#allocation8 + $0x8] ss:$16 sps:$4 sm:$0xff]  }
 0x141   :  { %v1399_v19 = vpop.f32.mrf.mxu1  ;;  %2519 = vmatprep.subr.bf16.mxu1 %v3856_v31  ;;  %v1359_v40 = vadd.f32 %v1358_v18, %v301_v39  ;;  %v1398_v41 = vadd.f32 %v1397_v15, %v1357_v33  ;;  %v3808_v15 = vld [vmem:[#allocation8 + $0x1ec] ss:$16 sps:$4 sm:$0xff]   ;;  %v3812_v18 = vld [vmem:[#allocation8 + $0x1c8] ss:$16 sps:$4 sm:$0xff]  }
 0x142   :  { %v1360_v22 = vpop.f32.mrf.mxu0  ;;  %v3848_v38 = vld [vmem:[#allocation8 + $0x108] ss:$16 sps:$4 sm:$0xff]  }
 0x143   :  { %v1401_v23 = vpop.f32.mrf.mxu1  ;;  %2479 = vmatpush2.bf16.msra.mxu0 %v3758_v16  ;;  %v1400_v43 = vadd.f32 %v1399_v19, %v1359_v40  ;;  %v3806_v16 = vld [vmem:[#allocation8 + $0x1e8] ss:$16 sps:$4 sm:$0xff]   ;;  %v3820_v19 = vld [vmem:[#allocation8 + $0x1ac] ss:$16 sps:$4 sm:$0xff]  }
 0x144   :  { %v1361_v25 = vpop.f32.mrf.mxu0  ;;  %2530 = vmatprep.subr.bf16.mxu0 %v3763_v20  ;;  %2520 = vmatpush2.bf16.msra.mxu1 %v3854_v32  ;;  %v3818_v20 = vld [vmem:[#allocation8 + $0x1a8] ss:$16 sps:$4 sm:$0xff]   ;;  %v3832_v23 = vld [vmem:[#allocation8 + $0x16c] ss:$16 sps:$4 sm:$0xff]   ;;  %v309_v32 = vrot.slane %v4173_v36, %v308_v28 }
 0x145   :  { %v1402_v26 = vpop.f32.mrf.mxu1  ;;  %2571 = vmatprep.subr.bf16.mxu1 %v3859_v51  ;;  %v3824_v22 = vld [vmem:[#allocation8 + $0x188] ss:$16 sps:$4 sm:$0xff]   ;;  %v3838_v25 = vld [vmem:[#allocation8 + $0x14c] ss:$16 sps:$4 sm:$0xff]  }
 0x146   :  { %v304_v26 = vsub.s32 2, %v4170_v35 }
 0x147   :  { %v1479_v7 = vpop.f32.mrf.mxu1 }
 0x148   :  { %v305_v13 = vrot.slane %v4173_v36, %v304_v26 }
 0x149   :  { %v1481_v29 = vpop.f32.mrf.mxu1 }
 0x14b   :  { %v1483_v30 = vpop.f32.mrf.mxu1 }
 0x14c   :  { %v3842_v30 = vld [vmem:[#allocation8 + $0x128] ss:$16 sps:$4 sm:$0xff]  }
 0x14d   :  { %v1484_v14 = vpop.f32.mrf.mxu1 }
 0x14e   :  { %v3850_v14 = vld [vmem:[#allocation8 + $0x10c] ss:$16 sps:$4 sm:$0xff]  }
 0x17e   :  { %v1438_v42 = vpop.f32.mrf.mxu0 }
 0x17f   :  { %v1439_v44 = vadd.f32 %v1438_v42, %v1398_v41 }
 0x180   :  { %v1440_v45 = vpop.f32.mrf.mxu0 }
 0x181   :  { %v1480_v46 = vadd.f32 %v1479_v7, %v1439_v44  ;;  %v1441_v47 = vadd.f32 %v1440_v45, %v1400_v43  ;;  %v3844_v7 = vld [vmem:[#allocation8 + $0x12c] ss:$16 sps:$4 sm:$0xff]  }
 0x182   :  { %v1442_v48 = vpop.f32.mrf.mxu0 }
 0x183   :  { %v1482_v49 = vadd.f32 %v1481_v29, %v1441_v47  ;;  %v1650_v50 = vmax.f32 %v1480_v46, 0.0 }
 0x184   :  { %v1443_v52 = vpop.f32.mrf.mxu0 }
 0x185   :  { %v1651_v53 = vmax.f32 %v1482_v49, 0.0  ;;  %v4184_v57 = vpack.c.bf16 %v1650_v50, %v1650_v50 }
 0x187   :  { %v4182_v54 = vpop.f32.mrf.mxu1  ;;  %v1655_v55 = vpack.c.bf16 %v1651_v53, %v1651_v53 }
 0x188   :  { %v1521_v34 = vadd.f32 %v4182_v54, %v305_v13  ;;  %v3895_v13 = vld [vmem:[#allocation8 + $0x36c] ss:$16 sps:$4 sm:$0xff]  }
 0x189   :  { %v4186_v58 = vpop.f32.mrf.mxu1  ;;  %2480 = vmatprep.mubr.bf16.mxu0 %v1655_v55 }
 0x18a   :  { %2481 = vmatmul.mubr.bf16.vlgmr.msra.gmra.mxu0 %v4184_v57  ;;  %v1523_v33 = vadd.f32 %v4186_v58, %v309_v32  ;;  %v3857_v58 = vld [vmem:[#allocation8 + $0x2e8] ss:$16 sps:$4 sm:$0xff]   ;;  %v3901_v32 = vld [vmem:[#allocation8 + $0x32c] ss:$16 sps:$4 sm:$0xff]  }
 0x18b   :  { %v1524_v60 = vpop.f32.mrf.mxu1  ;;  %2531 = vmatpush1.bf16.msra.mxu0 %v3761_v56  ;;  %2562 = vmatprep.mubr.bf16.mxu0 %v1655_v55 }
 0x18c   :  { %2532 = vmatprep.subr.bf16.mxu0 %v3766_v59  ;;  %v3862_v60 = vld [vmem:[#allocation8 + $0x2cc] ss:$16 sps:$4 sm:$0xff]  }
 0x18d   :  { %v1525_v62 = vpop.f32.mrf.mxu1 }
 0x18e   :  { %v3906_v62 = vld [vmem:[#allocation10 + $0x38] sm:$0xff]  }
 0x18f   :  { %2533 = vmatpush1.bf16.msra.mxu0 %v3764_v61  ;;  %v3905_v61 = vld [vmem:[#allocation10 + $0x78] sm:$0xff]  }
 0x190   :  { %2534 = vmatprep.subr.bf16.mxu0 %v3772_v63  ;;  %v3907_v63 = vld [vmem:[#allocation10 + $0x70] sm:$0xff]  }
 0x193   :  { %2535 = vmatpush1.bf16.msra.mxu0 %v3770_v0  ;;  %v3865_v0 = vld [vmem:[#allocation8 + $0x2ac] ss:$16 sps:$4 sm:$0xff]  }
 0x194   :  { %2536 = vmatprep.subr.bf16.mxu0 %v3778_v1  ;;  %v3908_v1 = vld [vmem:[#allocation10 + $0x30] sm:$0xff]  }
 0x197   :  { %2537 = vmatpush1.bf16.msra.mxu0 %v3776_v2  ;;  %v3909_v2 = vld [vmem:[#allocation10 + $0x68] sm:$0xff]  }
 0x198   :  { %2538 = vmatprep.subr.bf16.mxu0 %v3784_v3  ;;  %v3863_v3 = vld [vmem:[#allocation8 + $0x2a8] ss:$16 sps:$4 sm:$0xff]  }
 0x19b   :  { %2539 = vmatpush1.bf16.msra.mxu0 %v3782_v4  ;;  %v3868_v4 = vld [vmem:[#allocation8 + $0x28c] ss:$16 sps:$4 sm:$0xff]  }
 0x19c   :  { %2540 = vmatprep.subr.bf16.mxu0 %v3790_v5  ;;  %v3910_v5 = vld [vmem:[#allocation10 + $0x28] sm:$0xff]  }
 0x19f   :  { %2541 = vmatpush1.bf16.msra.mxu0 %v3788_v8  ;;  %v3911_v8 = vld [vmem:[#allocation10 + $0x60] sm:$0xff]  }
 0x1a0   :  { %2542 = vmatprep.subr.bf16.mxu0 %v3796_v9  ;;  %v3866_v9 = vld [vmem:[#allocation8 + $0x288] ss:$16 sps:$4 sm:$0xff]  }
 0x1a3   :  { %2543 = vmatpush1.bf16.msra.mxu0 %v3794_v10  ;;  %v3871_v10 = vld [vmem:[#allocation8 + $0x26c] ss:$16 sps:$4 sm:$0xff]  }
 0x1a4   :  { %2544 = vmatprep.subr.bf16.mxu0 %v3802_v11  ;;  %v3912_v11 = vld [vmem:[#allocation10 + $0x20] sm:$0xff]  }
 0x1a7   :  { %2545 = vmatpush1.bf16.msra.mxu0 %v3800_v12  ;;  %v3869_v12 = vld [vmem:[#allocation8 + $0x268] ss:$16 sps:$4 sm:$0xff]  }
 0x1a8   :  { %2546 = vmatprep.subr.bf16.mxu0 %v3808_v15  ;;  %v3874_v15 = vld [vmem:[#allocation8 + $0x24c] ss:$16 sps:$4 sm:$0xff]  }
 0x1ab   :  { %2547 = vmatpush2.bf16.msra.mxu0 %v3806_v16  ;;  %v3872_v16 = vld [vmem:[#allocation8 + $0x248] ss:$16 sps:$4 sm:$0xff]  }
 0x1ac   :  { %2548 = vmatprep.subr.bf16.mxu0 %v3814_v17  ;;  %v3877_v17 = vld [vmem:[#allocation8 + $0x22c] ss:$16 sps:$4 sm:$0xff]  }
 0x1af   :  { %2549 = vmatpush2.bf16.msra.mxu0 %v3812_v18  ;;  %v3875_v18 = vld [vmem:[#allocation8 + $0x228] ss:$16 sps:$4 sm:$0xff]  }
 0x1b0   :  { %2550 = vmatprep.subr.bf16.mxu0 %v3820_v19  ;;  %v3880_v19 = vld [vmem:[#allocation8 + $0x20c] ss:$16 sps:$4 sm:$0xff]  }
 0x1b3   :  { %2551 = vmatpush2.bf16.msra.mxu0 %v3818_v20  ;;  %v3878_v20 = vld [vmem:[#allocation8 + $0x208] ss:$16 sps:$4 sm:$0xff]  }
 0x1b4   :  { %2552 = vmatprep.subr.bf16.mxu0 %v3826_v21  ;;  %v3883_v21 = vld [vmem:[#allocation8 + $0x3ec] ss:$16 sps:$4 sm:$0xff]  }
 0x1b7   :  { %2553 = vmatpush2.bf16.msra.mxu0 %v3824_v22  ;;  %v3881_v22 = vld [vmem:[#allocation8 + $0x3e8] ss:$16 sps:$4 sm:$0xff]  }
 0x1b8   :  { %2554 = vmatprep.subr.bf16.mxu0 %v3832_v23  ;;  %v3886_v23 = vld [vmem:[#allocation8 + $0x3cc] ss:$16 sps:$4 sm:$0xff]  }
 0x1bb   :  { %2555 = vmatpush2.bf16.msra.mxu0 %v3830_v24  ;;  %v3884_v24 = vld [vmem:[#allocation8 + $0x3c8] ss:$16 sps:$4 sm:$0xff]  }
 0x1bc   :  { %2556 = vmatprep.subr.bf16.mxu0 %v3838_v25  ;;  %v3889_v25 = vld [vmem:[#allocation8 + $0x3ac] ss:$16 sps:$4 sm:$0xff]  }
 0x1be   :  { %v1561_v29 = vpop.f32.mrf.mxu0 }
 0x1bf   :  { %2557 = vmatpush2.bf16.msra.mxu0 %v3836_v27  ;;  %v1562_v40 = vadd.f32 %v1561_v29, %v1521_v34  ;;  %v3887_v27 = vld [vmem:[#allocation8 + $0x3a8] ss:$16 sps:$4 sm:$0xff]   ;;  %v3904_v34 = vld [vmem:[#allocation8 + $0x30c] ss:$16 sps:$4 sm:$0xff]  }
 0x1c0   :  { %v1563_v31 = vpop.f32.mrf.mxu0  ;;  %2558 = vmatprep.subr.bf16.mxu0 %v3844_v7  ;;  %v3892_v7 = vld [vmem:[#allocation8 + $0x38c] ss:$16 sps:$4 sm:$0xff]   ;;  %v3890_v29 = vld [vmem:[#allocation8 + $0x388] ss:$16 sps:$4 sm:$0xff]  }
 0x1c1   :  { %v1564_v43 = vadd.f32 %v1563_v31, %v1523_v33  ;;  %v3898_v31 = vld [vmem:[#allocation8 + $0x34c] ss:$16 sps:$4 sm:$0xff]  }
 0x1c2   :  { %v1565_v51 = vpop.f32.mrf.mxu0  ;;  %v3914_v33 = vld [vmem:[#allocation10 + $0x18] sm:$0xff]  }
 0x1c3   :  { %2559 = vmatpush2.bf16.msra.mxu0 %v3842_v30  ;;  %v3893_v30 = vld [vmem:[#allocation8 + $0x368] ss:$16 sps:$4 sm:$0xff]  }
 0x1c4   :  { %v1566_v39 = vpop.f32.mrf.mxu0  ;;  %2560 = vmatprep.subr.bf16.mxu0 %v3850_v14  ;;  %v3896_v14 = vld [vmem:[#allocation8 + $0x348] ss:$16 sps:$4 sm:$0xff]  }
 0x1c5   :  { %v3899_v51 = vld [vmem:[#allocation8 + $0x328] ss:$16 sps:$4 sm:$0xff]  }
 0x1c6   :  { %v1643_v42 = vpop.f32.mrf.mxu0  ;;  %v3913_v39 = vld [vmem:[#allocation10 + $0x58] sm:$0xff]  }
 0x1c7   :  { %v1602_v41 = vpop.f32.mrf.mxu1  ;;  %2561 = vmatpush2.bf16.msra.mxu0 %v3848_v38  ;;  %v3902_v38 = vld [vmem:[#allocation8 + $0x308] ss:$16 sps:$4 sm:$0xff]  }
 0x1c8   :  { %v1603_v44 = vadd.f32 %v1602_v41, %v1562_v40  ;;  %v1645_v46 = vpop.f32.mrf.mxu0  ;;  %3357 = vmatprep.subr.bf16.mxu0 %v3905_v61  ;;  %v3915_v40 = vld [vmem:[#allocation10 + $0x50] sm:$0xff]  }
 0x1c9   :  { %v1604_v45 = vpop.f32.mrf.mxu1  ;;  %v3916_v41 = vld [vmem:[#allocation10 + $0x10] sm:$0xff]  }
 0x1ca   :  { %v1644_v47 = vadd.f32 %v1643_v42, %v1603_v44  ;;  %v1605_v48 = vadd.f32 %v1604_v45, %v1564_v43  ;;  %2563 = vmatmul.mubr.bf16.vlgmr.msra.gmra.mxu0 %v4184_v57  ;;  %v1647_v49 = vpop.f32.mrf.mxu0  ;;  %v3860_v57 = vld [vmem:[#allocation8 + $0x2c8] ss:$16 sps:$4 sm:$0xff]   ;;  %v3919_v44 = vld [vmem:[#allocation10 + $0x40] sm:$0xff]  }
 0x1cb   :  { %v1606_v36 = vpop.f32.mrf.mxu1  ;;  %3358 = vmatpush3.bf16.msra.mxu0 %v3906_v62  ;;  %v3917_v42 = vld [vmem:[#allocation10 + $0x48] sm:$0xff]   ;;  %v3920_v45 = vld [vmem:[#allocation10] sm:$0xff]  }
 0x1cc   :  { %v1646_v50 = vadd.f32 %v1645_v46, %v1605_v48  ;;  %v1652_v52 = vmax.f32 %v1644_v47, 0.0  ;;  %v1648_v54 = vpop.f32.mrf.mxu0  ;;  %3359 = vmatprep.subr.bf16.mxu0 %v3907_v63  ;;  %v3918_v43 = vld [vmem:[#allocation10 + $0x8] sm:$0xff]   ;;  %v3921_v46 = vld [vmem:[#allocation10 + $0xf8] sm:$0xff]   ;;  %v3923_v48 = vld [vmem:[#allocation10 + $0xf0] sm:$0xff]  }
 0x1cd   :  { %v1607_v53 = vpop.f32.mrf.mxu1  ;;  %v3922_v47 = vld [vmem:[#allocation10 + $0xb8] sm:$0xff]   ;;  %v3924_v36 = vld [vmem:[#allocation10 + $0xb0] sm:$0xff]   ;;  %v3925_v49 = vld [vmem:[#allocation10 + $0xe8] sm:$0xff]  }
 0x1ce   :  { %v1653_v55 = vmax.f32 %v1646_v50, 0.0  ;;  %v4200_v59 = vpack.c.bf16 %v1652_v52, %v1652_v52  ;;  %v3926_v50 = vld [vmem:[#allocation10 + $0xa8] sm:$0xff]   ;;  %v3927_v52 = vld [vmem:[#allocation10 + $0xe0] sm:$0xff]   ;;  %v3929_v54 = vld [vmem:[#allocation10 + $0xd8] sm:$0xff]  }
 0x1cf   :  { %3360 = vmatpush3.bf16.msra.mxu0 %v3908_v1  ;;  %v3928_v53 = vld [vmem:[#allocation10 + $0xa0] sm:$0xff]   ;;  %v3933_v63 = vld [vmem:[#allocation10 + $0xc8] sm:$0xff]  }
 0x1d0   :  { %v1657_v56 = vpack.c.bf16 %v1653_v55, %v1653_v55  ;;  %3361 = vmatprep.subr.bf16.mxu0 %v3909_v2  ;;  %v3930_v55 = vld [vmem:[#allocation10 + $0x98] sm:$0xff]   ;;  %v3936_v1 = vld [vmem:[#allocation10 + $0x80] sm:$0xff]  }
 0x1d1   :  { %v1786_v2 = vld [vmem:[%s4225_s4] sm:$0xf] }
 0x1d2   :  { %2521 = vmatprep.mubr.bf16.mxu1 %v1657_v56 }
 0x1d3   :  { %2522 = vmatmul.mubr.bf16.vlgmr.msra.gmra.mxu1 %v4200_v59  ;;  %3362 = vmatpush3.bf16.msra.mxu0 %v3910_v5  ;;  %v1791_v5 = vrot.slane %v1786_v2, %v296_v6  ;;  %v1799_v6 = vrot.slane %v1786_v2, %v304_v26 }
 0x1d4   :  { %2572 = vmatpush1.bf16.msra.mxu1 %v3857_v58  ;;  %2603 = vmatprep.mubr.bf16.mxu1 %v1657_v56  ;;  %v3931_v56 = vld [vmem:[#allocation10 + $0xd0] sm:$0xff]  }
 0x1d5   :  { %2573 = vmatprep.subr.bf16.mxu1 %v3862_v60  ;;  %3363 = vmatprep.subr.bf16.mxu0 %v3911_v8  ;;  %v3932_v58 = vld [vmem:[#allocation10 + $0x90] sm:$0xff]  }
 0x1d7   :  { %3364 = vmatpush3.bf16.msra.mxu0 %v3912_v11 }
 0x1d8   :  { %2574 = vmatpush1.bf16.msra.mxu1 %v3860_v57  ;;  %3365 = vmatprep.subr.bf16.mxu0 %v3913_v39  ;;  %v3934_v57 = vld [vmem:[#allocation10 + $0x88] sm:$0xff]  }
 0x1d9   :  { %2575 = vmatprep.subr.bf16.mxu1 %v3865_v0  ;;  %v3935_v0 = vld [vmem:[#allocation10 + $0xc0] sm:$0xff]  }
 0x1db   :  { %3366 = vmatpush3.bf16.msra.mxu0 %v3914_v33 }
 0x1dc   :  { %2576 = vmatpush1.bf16.msra.mxu1 %v3863_v3  ;;  %3367 = vmatprep.subr.bf16.mxu0 %v3915_v40 }
 0x1dd   :  { %2577 = vmatprep.subr.bf16.mxu1 %v3868_v4 }
 0x1df   :  { %3368 = vmatpush3.bf16.msra.mxu0 %v3916_v41 }
 0x1e0   :  { %2578 = vmatpush1.bf16.msra.mxu1 %v3866_v9  ;;  %3369 = vmatprep.subr.bf16.mxu0 %v3917_v42  ;;  %v1795_v9 = vrot.slane %v1786_v2, %v300_v37  ;;  %v1803_v37 = vrot.slane %v1786_v2, %v308_v28  ;;  %v3324_v28 = vld [vmem:[%s4227_s6] ss:$0 sm:$0xff]  ;;  %s4042_s6 = scalar_lea.vmem %s2981_s29, 64 }
 0x1e1   :  { %2579 = vmatprep.subr.bf16.mxu1 %v3871_v10  ;;  %p4043_p11 = scmp.ne.s32.totalorder %s2981_s29, %s4042_s6  ;;  %p4048_p13 = scmp.lt.s32.totalorder %s4042_s6, %s4042_s6 }
 0x1e3   :  { %3370 = vmatpush3.bf16.msra.mxu0 %v3918_v43  ;;  %p4049_p0 = por %p4048_p13, %p4047_p12 }
 0x1e4   :  { %2580 = vmatpush1.bf16.msra.mxu1 %v3869_v12  ;;  %3371 = vmatprep.subr.bf16.mxu0 %v3919_v44 }
 0x1e5   :  { %2581 = vmatprep.subr.bf16.mxu1 %v3874_v15  ;;  %p4050_p1 = pnand %p4049_p0, %p4043_p11 }
 0x1e7   :  { %3372 = vmatpush3.bf16.msra.mxu0 %v3920_v45 }
 0x1e8   :  { %2582 = vmatpush1.bf16.msra.mxu1 %v3872_v16 }
 0x1e9   :  { %2583 = vmatprep.subr.bf16.mxu1 %v3877_v17 }
 0x1ec   :  { %2584 = vmatpush1.bf16.msra.mxu1 %v3875_v18 }
 0x1ed   :  { %2585 = vmatprep.subr.bf16.mxu1 %v3880_v19 }
 0x1f0   :  { %2586 = vmatpush1.bf16.msra.mxu1 %v3878_v20 }
 0x1f1   :  { %2587 = vmatprep.subr.bf16.mxu1 %v3883_v21 }
 0x1f4   :  { %2588 = vmatpush2.bf16.msra.mxu1 %v3881_v22 }
 0x1f5   :  { %2589 = vmatprep.subr.bf16.mxu1 %v3886_v23 }
 0x1f8   :  { %2590 = vmatpush2.bf16.msra.mxu1 %v3884_v24 }
 0x1f9   :  { %2591 = vmatprep.subr.bf16.mxu1 %v3889_v25 }
 0x1fc   :  { %2592 = vmatpush2.bf16.msra.mxu1 %v3887_v27 }
 0x1fd   :  { %2593 = vmatprep.subr.bf16.mxu1 %v3892_v7 }
 0x200   :  { %2594 = vmatpush2.bf16.msra.mxu1 %v3890_v29 }
 0x201   :  { %2595 = vmatprep.subr.bf16.mxu1 %v3895_v13 }
 0x204   :  { %2596 = vmatpush2.bf16.msra.mxu1 %v3893_v30 }
 0x205   :  { %2597 = vmatprep.subr.bf16.mxu1 %v3898_v31 }
 0x208   :  { %2598 = vmatpush2.bf16.msra.mxu1 %v3896_v14 }
 0x209   :  { %2599 = vmatprep.subr.bf16.mxu1 %v3901_v32 }
 0x20c   :  { %2600 = vmatpush2.bf16.msra.mxu1 %v3899_v51 }
 0x20d   :  { %2601 = vmatprep.subr.bf16.mxu1 %v3904_v34 }
 0x210   :  { %2602 = vmatpush2.bf16.msra.mxu1 %v3902_v38 }
 0x211   :  { %3379 = vmatprep.subr.bf16.mxu1 %v3921_v46 }
 0x213   :  { %2604 = vmatmul.mubr.bf16.vlgmr.msra.gmra.mxu1 %v4200_v59 }
 0x214   :  { %3380 = vmatpush3.bf16.msra.mxu1 %v3922_v47 }
 0x215   :  { %3381 = vmatprep.subr.bf16.mxu1 %v3923_v48 }
 0x218   :  { %3382 = vmatpush3.bf16.msra.mxu1 %v3924_v36 }
 0x219   :  { %3383 = vmatprep.subr.bf16.mxu1 %v3925_v49 }
 0x21c   :  { %3384 = vmatpush3.bf16.msra.mxu1 %v3926_v50 }
 0x21d   :  { %3385 = vmatprep.subr.bf16.mxu1 %v3927_v52 }
 0x220   :  { %3386 = vmatpush3.bf16.msra.mxu1 %v3928_v53 }
 0x221   :  { %3387 = vmatprep.subr.bf16.mxu1 %v3929_v54 }
 0x224   :  { %3388 = vmatpush3.bf16.msra.mxu1 %v3930_v55 }
 0x225   :  { %3389 = vmatprep.subr.bf16.mxu1 %v3931_v56 }
 0x228   :  { %3390 = vmatpush3.bf16.msra.mxu1 %v3932_v58 }
 0x229   :  { %3391 = vmatprep.subr.bf16.mxu1 %v3933_v63 }
 0x22c   :  { %3392 = vmatpush3.bf16.msra.mxu1 %v3934_v57 }
 0x22d   :  { %3393 = vmatprep.subr.bf16.mxu1 %v3935_v0 }
 0x230   :  { %3394 = vmatpush3.bf16.msra.mxu1 %v3936_v1 }
 0x24a   :  { %v2482_v59 = vpop.f32.mrf.mxu0 }
 0x24b   :  { %v2483_v11 = vadd.f32 %v2482_v59, %v1791_v5 }
 0x24c   :  { %v2484_v60 = vpop.f32.mrf.mxu0 }
 0x24d   :  { %v2485_v15 = vadd.f32 %v2484_v60, %v1795_v9 }
 0x24e   :  { %v2486_v61 = vpop.f32.mrf.mxu0 }
 0x250   :  { %v2487_v62 = vpop.f32.mrf.mxu0 }
 0x28a   :  { %v2564_v3 = vpop.f32.mrf.mxu0 }
 0x28b   :  { %v2565_v25 = vadd.f32 %v2564_v3, %v1799_v6 }
 0x28c   :  { %v2566_v4 = vpop.f32.mrf.mxu0 }
 0x28d   :  { %v2567_v7 = vadd.f32 %v2566_v4, %v1803_v37 }
 0x28e   :  { %v2568_v8 = vpop.f32.mrf.mxu0 }
 0x290   :  { %v2569_v10 = vpop.f32.mrf.mxu0 }
 0x293   :  { %v2523_v12 = vpop.f32.mrf.mxu1 }
 0x294   :  { %v2524_v16 = vadd.f32 %v2523_v12, %v2483_v11 }
 0x295   :  { %v2525_v17 = vpop.f32.mrf.mxu1 }
 0x296   :  { %v2526_v18 = vadd.f32 %v2525_v17, %v2485_v15  ;;  %v2612_v19 = vmax.f32 %v2524_v16, 0.0 }
 0x297   :  { %v2527_v20 = vpop.f32.mrf.mxu1 }
 0x298   :  { %v2613_v21 = vmax.f32 %v2526_v18, 0.0  ;;  %v2616_v24 = vpack.c.bf16 %v2612_v19, %v2612_v19 }
 0x299   :  { %v2528_v22 = vpop.f32.mrf.mxu1 }
 0x29a   :  { %v2617_v23 = vpack.c.bf16 %v2613_v21, %v2613_v21 }
 0x29c   :  { %2915 = vmatprep.mubr.bf16.mxu0 %v2617_v23 }
 0x29d   :  { %2916 = vmatmul.mubr.bf16.vlgmr.msra.gmra.mxu0 %v2616_v24 }
 0x2d3   :  { %v2605_v27 = vpop.f32.mrf.mxu1 }
 0x2d4   :  { %v2606_v29 = vadd.f32 %v2605_v27, %v2565_v25 }
 0x2d5   :  { %v2607_v13 = vpop.f32.mrf.mxu1 }
 0x2d6   :  { %v2608_v30 = vadd.f32 %v2607_v13, %v2567_v7  ;;  %v2614_v31 = vmax.f32 %v2606_v29, 0.0 }
 0x2d7   :  { %v2609_v14 = vpop.f32.mrf.mxu1 }
 0x2d8   :  { %v2615_v32 = vmax.f32 %v2608_v30, 0.0  ;;  %v2618_v38 = vpack.c.bf16 %v2614_v31, %v2614_v31 }
 0x2d9   :  { %v2610_v51 = vpop.f32.mrf.mxu1 }
 0x2da   :  { %v2619_v34 = vpack.c.bf16 %v2615_v32, %v2615_v32 }
 0x2dc   :  { %2955 = vmatprep.mubr.bf16.mxu1 %v2619_v34 }
 0x2dd   :  { %2956 = vmatmul.mubr.bf16.vlgmr.msra.gmra.mxu1 %v2618_v38 }
 0x35d   :  { %v3373_v39 = vpop.f32.mrf.mxu0 }
 0x35f   :  { %v3374_v33 = vpop.f32.mrf.mxu0 }
 0x360   :  { %v3375_v35 = vadd.f32 %v3374_v33, %v3373_v39 }
 0x361   :  { %v3376_v26 = vpop.f32.mrf.mxu0 }
 0x362   :  { %v2918_v43 = vadd.f32 %v3375_v35, %v3324_v28 }
 0x363   :  { %v3377_v40 = vpop.f32.mrf.mxu0 }
 0x39d   :  { %v3395_v41 = vpop.f32.mrf.mxu1 }
 0x39f   :  { %v3396_v42 = vpop.f32.mrf.mxu1 }
 0x3a0   :  { %v3397_v44 = vadd.f32 %v3396_v42, %v3395_v41 }
 0x3a1   :  { %v3398_v45 = vpop.f32.mrf.mxu1 }
 0x3a2   :  { %v2958_v46 = vadd.f32 %v3397_v44, %v2918_v43 }
 0x3a3   :  { %v3399_v47 = vpop.f32.mrf.mxu1 }
 0x3a4   :  { %2963 = vmax.xlane.f32.xlu0 %v2958_v46 }
 0x42d   :  { %v2964_v48 = vpop.xlane.xlu0 %2963 }
 0x42e   :  { %v2965_v36 = vsub.f32 %v2958_v46, %v2964_v48 }
 0x430   :  { %v2966_v49 = vmul.f32 1.442695, %v2965_v36 }
 0x432   :  { %3937 = vpow2.f32 %v2966_v49 }
 0x43f   :  { %v3938_v50 = vpop.eup %3937 }
 0x440   :  { %2968 = vadd.xlane.f32.xlu0 %v3938_v50 }
 0x4c9   :  { %v2969_v52 = vpop.xlane.xlu0 %2968 }
 0x4ca   :  { %3939 = vrcp.f32 %v2969_v52 }
 0x4d7   :  { %v3940_v53 = vpop.eup %3939 }
 0x4d8   :  { %v2971_v54 = vmul.f32 %v3940_v53, %v3938_v50 }
 0x4da   :  { %v2972_v55 = vpack.c.bf16 %v2971_v54, %v2971_v54 }
 0x4dc   :  { %2973 = vst [vmem:[#allocation11] sm:$0xf] %v2972_v55 }
 0x4dd   :  { %4053 = shalt.err (!%p4050_p1)
}
 0x4de   :  { %2983 = dma.vmem_to_hbm [thread:$0]  %s2981_s29, 64, %s4228_s7, [#allocation4]  }
 0x4df   :  { %4068 = dma.done.wait [#allocation4], 64  }
 0x4e0   :  { %4069 = vsyncadd [#allocation4], 4294967232 }
 0x4e1   :  { %2987 = vsyncpa [#allocation3], 1 }
 0x4e2   :  { %2988 = vsyncpa [#allocation6], 1 }
 0x4e3   :  { %2989 = vsyncpa [#allocation9], 1 }
 0x4e4   :  { %2990 = vsyncpa [#allocation4], 1 }

// kernel: tpu_custom_call.1
= control target key start
LH: loop header
LB: loop body
LE: loop exit
PB: predicated region body
PF: predicated region fallthrough
CT: control target
= control target key end

     0   :  { %12 = vsyncpa [#allocation3], 0  ;;  %s4221_s0 = inlined_call_operand.hbm [shape: bf16[8,784], index: 0, kind: input, shape index: {}]   ;;  %s4222_s1 = inlined_call_operand.hbm [shape: bf16[784,512], index: 1, kind: input, shape index: {}]   ;;  %s4223_s2 = inlined_call_operand.hbm [shape: f32[1,512], index: 2, kind: input, shape index: {}]   ;;  %s4224_s3 = inlined_call_operand.hbm [shape: bf16[512,512], index: 3, kind: input, shape index: {}]   ;;  %s4225_s4 = inlined_call_operand.vmem [shape: f32[1,512], index: 4, kind: input, shape index: {}]   ;;  %s4226_s5 = inlined_call_operand.hbm [shape: bf16[512,128], index: 5, kind: input, shape index: {}]   ;;  %s4227_s6 = inlined_call_operand.vmem [shape: f32[1,128], index: 6, kind: input, shape index: {}]   ;;  %s4228_s7 = inlined_call_operand.hbm [shape: bf16[8,128], index: 7, kind: output, shape index: {}]  }
   0x1   :  { %13 = vsyncpa [#allocation6], 0 }
   0x2   :  { %14 = vsyncpa [#allocation9], 0 }
   0x3   :  { %15 = vsyncpa [#allocation4], 0  ;;  %s4070_s24 = smov [#allocation5]  }
   0x4   :  { %s31_s25 = sshll.u32 %s4070_s24, 4  ;;  %s32_s25 = int_to_ptr.vmem [resolvable:$true] %s31_s25 }
   0x5   :  { %s3950_s26 = scalar_lea.vmem %s32_s25, 25088  ;;  %p3955_p1 = scmp.lt.s32.totalorder %s32_s25, %s32_s25 }
   0x6   :  { %p3951_p0 = scmp.ne.s32.totalorder %s32_s25, %s3950_s26  ;;  %p3956_p2 = scmp.lt.s32.totalorder %s3950_s26, %s3950_s26 }
   0x8   :  { %p3957_p3 = por %p3956_p2, %p3955_p1 }
   0xa   :  { %p3958_p4 = pnand %p3957_p3, %p3951_p0 }
   0xc   :  { %3961 = shalt.err (!%p3958_p4)
}
   0xd   :  { %s4071_s27 = smov 256   ;;  %s4072_s28 = smov 16  }
   0xe   :  { %37 = dma.hbm_to_vmem [thread:$0]  %s4222_s1, 25088, %s32_s25, [#allocation6], %s4071_s27, %s4071_s27, %s4072_s28  }
   0xf   :  { %s4073_s8 = smov [#allocation8]   ;;  %s4074_s10 = smov [#allocation2]  }
  0x10   :  { %s53_s9 = sshll.u32 %s4073_s8, 4  ;;  %s22_s11 = sshll.u32 %s4074_s10, 4  ;;  %s54_s9 = int_to_ptr.vmem [resolvable:$true] %s53_s9  ;;  %s23_s11 = int_to_ptr.vmem [resolvable:$true] %s22_s11 }
  0x11   :  { %s3970_s12 = scalar_lea.vmem %s54_s9, 16384  ;;  %p3975_p6 = scmp.lt.s32.totalorder %s54_s9, %s54_s9 }
  0x12   :  { %p3971_p5 = scmp.ne.s32.totalorder %s54_s9, %s3970_s12  ;;  %p3976_p7 = scmp.lt.s32.totalorder %s3970_s12, %s3970_s12 }
  0x14   :  { %p3977_p8 = por %p3976_p7, %p3975_p6 }
  0x16   :  { %p3978_p9 = pnand %p3977_p8, %p3971_p5 }
  0x18   :  { %3981 = shalt.err (!%p3978_p9)
}
  0x19   :  { %59 = dma.hbm_to_vmem [thread:$0]  %s4224_s3, 16384, %s54_s9, [#allocation9], %s4071_s27, %s4071_s27, %s4072_s28  }
  0x1a   :  { %s3990_s15 = scalar_lea.vmem %s23_s11, 448  ;;  %p3995_p11 = scmp.lt.s32.totalorder %s23_s11, %s23_s11 }
  0x1b   :  { %p3991_p10 = scmp.ne.s32.totalorder %s23_s11, %s3990_s15  ;;  %p3996_p12 = scmp.lt.s32.totalorder %s3990_s15, %s3990_s15 }
  0x1d   :  { %p3997_p13 = por %p3996_p12, %p3995_p11 }
  0x1f   :  { %p3998_p0 = pnand %p3997_p13, %p3991_p10 }
  0x21   :  { %4001 = shalt.err (!%p3998_p0)
}
  0x22   :  { %25 = dma.hbm_to_vmem [thread:$0]  %s4221_s0, 448, %s23_s11, [#allocation3]  }
  0x23   :  { %s4075_s17 = smov [#allocation7]   ;;  %s4076_s19 = smov [#allocation10]  }
  0x24   :  { %s44_s18 = sshll.u32 %s4075_s17, 4  ;;  %s67_s20 = sshll.u32 %s4076_s19, 4  ;;  %s45_s18 = int_to_ptr.vmem [resolvable:$true] %s44_s18  ;;  %s68_s20 = int_to_ptr.vmem [resolvable:$true] %s67_s20 }
  0x25   :  { %s4010_s21 = scalar_lea.vmem %s45_s18, 64  ;;  %p4015_p2 = scmp.lt.s32.totalorder %s45_s18, %s45_s18 }
  0x26   :  { %p4011_p1 = scmp.ne.s32.totalorder %s45_s18, %s4010_s21  ;;  %p4016_p3 = scmp.lt.s32.totalorder %s4010_s21, %s4010_s21 }
  0x28   :  { %p4017_p4 = por %p4016_p3, %p4015_p2 }
  0x2a   :  { %p4018_p5 = pnand %p4017_p4, %p4011_p1 }
  0x2c   :  { %4021 = shalt.err (!%p4018_p5)
}
  0x2d   :  { %47 = dma.hbm_to_vmem [thread:$0]  %s4223_s2, 64, %s45_s18, [#allocation6]  }
  0x2e   :  { %s4030_s23 = scalar_lea.vmem %s68_s20, 4096  ;;  %p4035_p7 = scmp.lt.s32.totalorder %s68_s20, %s68_s20 }
  0x2f   :  { %p4031_p6 = scmp.ne.s32.totalorder %s68_s20, %s4030_s23  ;;  %p4036_p8 = scmp.lt.s32.totalorder %s4030_s23, %s4030_s23 }
  0x31   :  { %p4037_p9 = por %p4036_p8, %p4035_p7 }
  0x33   :  { %p4038_p10 = pnand %p4037_p9, %p4031_p6 }
  0x35   :  { %4041 = shalt.err (!%p4038_p10)
}
  0x36   :  { %s4077_s0 = smov 64   ;;  %s4078_s24 = smov 4  }
  0x37   :  { %73 = dma.hbm_to_vmem [thread:$0]  %s4226_s5, 4096, %s68_s20, [#allocation9], %s4077_s0, %s4077_s0, %s4078_s24  }
  0x38   :  { %4062 = dma.done.wait [#allocation3], 448  }
  0x39   :  { %4063 = vsyncadd [#allocation3], 4294966848 }
  0x3a   :  { %4064 = dma.done.wait [#allocation6], 25152  }
  0x3b   :  { %4065 = vsyncadd [#allocation6], 4294942144 }
  0x3c   :  { %4066 = dma.done.wait [#allocation9], 20480  }
  0x3d   :  { %4067 = vsyncadd [#allocation9], 4294946816  ;;  %v3412_v0 = vld [vmem:[#allocation5 + $0xe4] ss:$16 sps:$4 sm:$0xff]   ;;  %v3416_v2 = vld [vmem:[#allocation5 + $0xe0] ss:$16 sps:$4 sm:$0xff]  }
  0x3e   :  { %v3414_v1 = vld [vmem:[#allocation5 + $0x2e4] ss:$16 sps:$4 sm:$0xff]   ;;  %1322 = vmatprep.subr.bf16.mxu0 %v3412_v0  ;;  %v3417_v3 = vld [vmem:[#allocation5 + $0x2e0] ss:$16 sps:$4 sm:$0xff]   ;;  %vm1318_vm0 = vcmask 130048   ;;  %s4080_s28 = smov [#allocation11]  }
  0x3f   :  { %1363 = vmatprep.subr.bf16.mxu1 %v3414_v1  ;;  %v3418_v4 = vld [vmem:[#allocation5 + $0xc4] ss:$16 sps:$4 sm:$0xff]   ;;  %1323 = vmatpush1.bf16.msra.mxu0 %v3416_v2  ;;  %v3422_v6 = vld [vmem:[#allocation5 + $0xc0] ss:$16 sps:$4 sm:$0xff]   ;;  %s2980_s29 = sshll.u32 %s4080_s28, 4  ;;  %s2981_s29 = int_to_ptr.vmem [resolvable:$true] %s2980_s29 }
  0x40   :  { %1364 = vmatpush1.bf16.msra.mxu1 %v3417_v3  ;;  %v3420_v5 = vld [vmem:[#allocation5 + $0x2c4] ss:$16 sps:$4 sm:$0xff]   ;;  %1324 = vmatprep.subr.bf16.mxu0 %v3418_v4  ;;  %v3423_v7 = vld [vmem:[#allocation5 + $0x2c0] ss:$16 sps:$4 sm:$0xff]   ;;  %p4047_p12 = scmp.lt.s32.totalorder %s2981_s29, %s2981_s29 }
  0x41   :  { %1365 = vmatprep.subr.bf16.mxu1 %v3420_v5  ;;  %v3424_v8 = vld [vmem:[#allocation5 + $0xa4] ss:$16 sps:$4 sm:$0xff]   ;;  %v3428_v10 = vld [vmem:[#allocation5 + $0xa0] ss:$16 sps:$4 sm:$0xff]  }
  0x42   :  { %v3426_v9 = vld [vmem:[#allocation5 + $0x2a4] ss:$16 sps:$4 sm:$0xff]   ;;  %v3429_v11 = vld [vmem:[#allocation5 + $0x2a0] ss:$16 sps:$4 sm:$0xff]  }
  0x43   :  { %1325 = vmatpush1.bf16.msra.mxu0 %v3422_v6  ;;  %v3430_v12 = vld [vmem:[#allocation5 + $0x84] ss:$16 sps:$4 sm:$0xff]   ;;  %v3434_v14 = vld [vmem:[#allocation5 + $0x80] ss:$16 sps:$4 sm:$0xff]  }
  0x44   :  { %1366 = vmatpush1.bf16.msra.mxu1 %v3423_v7  ;;  %1326 = vmatprep.subr.bf16.mxu0 %v3424_v8  ;;  %v3432_v13 = vld [vmem:[#allocation5 + $0x284] ss:$16 sps:$4 sm:$0xff]   ;;  %v3435_v15 = vld [vmem:[#allocation5 + $0x280] ss:$16 sps:$4 sm:$0xff]  }
  0x45   :  { %1367 = vmatprep.subr.bf16.mxu1 %v3426_v9  ;;  %v3436_v16 = vld [vmem:[#allocation5 + $0x64] ss:$16 sps:$4 sm:$0xff]   ;;  %v3440_v18 = vld [vmem:[#allocation5 + $0x60] ss:$16 sps:$4 sm:$0xff]  }
  0x46   :  { %v3438_v17 = vld [vmem:[#allocation5 + $0x264] ss:$16 sps:$4 sm:$0xff]   ;;  %v3441_v19 = vld [vmem:[#allocation5 + $0x260] ss:$16 sps:$4 sm:$0xff]  }
  0x47   :  { %1327 = vmatpush1.bf16.msra.mxu0 %v3428_v10  ;;  %v3442_v20 = vld [vmem:[#allocation5 + $0x44] ss:$16 sps:$4 sm:$0xff]   ;;  %v3446_v22 = vld [vmem:[#allocation5 + $0x40] ss:$16 sps:$4 sm:$0xff]  }
  0x48   :  { %1368 = vmatpush1.bf16.msra.mxu1 %v3429_v11  ;;  %1328 = vmatprep.subr.bf16.mxu0 %v3430_v12  ;;  %v3444_v21 = vld [vmem:[#allocation5 + $0x244] ss:$16 sps:$4 sm:$0xff]   ;;  %v3447_v23 = vld [vmem:[#allocation5 + $0x240] ss:$16 sps:$4 sm:$0xff]   ;;  %v3523_v11 = vld [vmem:[#allocation5 + $0xec] ss:$16 sps:$4 sm:$0xff]  }
  0x49   :  { %1369 = vmatprep.subr.bf16.mxu1 %v3432_v13  ;;  %v3448_v24 = vld [vmem:[#allocation5 + $0x24] ss:$16 sps:$4 sm:$0xff]   ;;  %v3452_v26 = vld [vmem:[#allocation5 + $0x20] ss:$16 sps:$4 sm:$0xff]   ;;  %v4079_v13 = vmov 0  }
  0x4a   :  { %v3450_v25 = vld [vmem:[#allocation5 + $0x224] ss:$16 sps:$4 sm:$0xff]   ;;  %v3453_v27 = vld [vmem:[#allocation5 + $0x220] ss:$16 sps:$4 sm:$0xff]  }
  0x4b   :  { %1329 = vmatpush1.bf16.msra.mxu0 %v3434_v14  ;;  %v3454_v28 = vld [vmem:[#allocation5 + $0x4] ss:$16 sps:$4 sm:$0xff]   ;;  %v3458_v30 = vld [vmem:[#allocation5] ss:$16 sps:$4 sm:$0xff]  }
  0x4c   :  { %1370 = vmatpush1.bf16.msra.mxu1 %v3435_v15  ;;  %1330 = vmatprep.subr.bf16.mxu0 %v3436_v16  ;;  %v3456_v29 = vld [vmem:[#allocation5 + $0x204] ss:$16 sps:$4 sm:$0xff]   ;;  %v3459_v31 = vld [vmem:[#allocation5 + $0x200] ss:$16 sps:$4 sm:$0xff]   ;;  %v3521_v15 = vld [vmem:[#allocation5 + $0xe8] ss:$16 sps:$4 sm:$0xff]  }
  0x4d   :  { %1371 = vmatprep.subr.bf16.mxu1 %v3438_v17  ;;  %v3460_v32 = vld [vmem:[#allocation5 + $0x1e4] ss:$16 sps:$4 sm:$0xff]   ;;  %v3464_v34 = vld [vmem:[#allocation5 + $0x1e0] ss:$16 sps:$4 sm:$0xff]   ;;  %v3527_v17 = vld [vmem:[#allocation2 + $0x18] ss:$0 sps:$4 sm:$0xff]  }
  0x4e   :  { %v3462_v33 = vld [vmem:[#allocation5 + $0x3e4] ss:$16 sps:$4 sm:$0xff]   ;;  %v3465_v35 = vld [vmem:[#allocation5 + $0x3e0] ss:$16 sps:$4 sm:$0xff]  }
  0x4f   :  { %1331 = vmatpush1.bf16.msra.mxu0 %v3440_v18  ;;  %v3466_v36 = vld [vmem:[#allocation5 + $0x1c4] ss:$16 sps:$4 sm:$0xff]   ;;  %v3470_v38 = vld [vmem:[#allocation5 + $0x1c0] ss:$16 sps:$4 sm:$0xff]   ;;  %v3530_v18 = vld [vmem:[#allocation5 + $0xcc] ss:$16 sps:$4 sm:$0xff]  }
  0x50   :  { %1372 = vmatpush1.bf16.msra.mxu1 %v3441_v19  ;;  %1332 = vmatprep.subr.bf16.mxu0 %v3442_v20  ;;  %v3468_v37 = vld [vmem:[#allocation5 + $0x3c4] ss:$16 sps:$4 sm:$0xff]   ;;  %v3471_v39 = vld [vmem:[#allocation5 + $0x3c0] ss:$16 sps:$4 sm:$0xff]   ;;  %v3528_v20 = vld [vmem:[#allocation5 + $0xc8] ss:$16 sps:$4 sm:$0xff]  }
  0x51   :  { %1373 = vmatprep.subr.bf16.mxu1 %v3444_v21  ;;  %v3472_v40 = vld [vmem:[#allocation5 + $0x1a4] ss:$16 sps:$4 sm:$0xff]   ;;  %v3476_v42 = vld [vmem:[#allocation5 + $0x1a0] ss:$16 sps:$4 sm:$0xff]  }
  0x52   :  { %v3474_v41 = vld [vmem:[#allocation5 + $0x3a4] ss:$16 sps:$4 sm:$0xff]   ;;  %v3477_v43 = vld [vmem:[#allocation5 + $0x3a0] ss:$16 sps:$4 sm:$0xff]  }
  0x53   :  { %1333 = vmatpush1.bf16.msra.mxu0 %v3446_v22  ;;  %v3478_v44 = vld [vmem:[#allocation5 + $0x184] ss:$16 sps:$4 sm:$0xff]   ;;  %v93_v48 = vld [vmem:[#allocation2 + $0x8] sm:$0xff] }
  0x54   :  { %1374 = vmatpush1.bf16.msra.mxu1 %v3447_v23  ;;  %1334 = vmatprep.subr.bf16.mxu0 %v3448_v24  ;;  %v3480_v45 = vld [vmem:[#allocation5 + $0x384] ss:$16 sps:$4 sm:$0xff]   ;;  %v3482_v49 = vld [vmem:[#allocation5 + $0x180] ss:$16 sps:$4 sm:$0xff]   ;;  %v4138_v51 = vcombine.high %v93_v48, %v93_v48  ;;  %v4144_v7 = vcombine.low %v93_v48, %v93_v48  ;;  %v3536_v22 = vld [vmem:[#allocation5 + $0xac] ss:$16 sps:$4 sm:$0xff]  }
  0x55   :  { %1375 = vmatprep.subr.bf16.mxu1 %v3450_v25  ;;  %v92_v46 = vld [vmem:[#allocation2] sm:$0xff]  ;;  %v3483_v50 = vld [vmem:[#allocation5 + $0x380] ss:$16 sps:$4 sm:$0xff]   ;;  %v3572_v48 = vld [vmem:[#allocation5 + $0x1ec] ss:$16 sps:$4 sm:$0xff]  }
  0x56   :  { %v4136_v47 = vcombine.high %v92_v46, %v92_v46  ;;  %v3484_v52 = vld [vmem:[#allocation5 + $0x164] ss:$16 sps:$4 sm:$0xff]   ;;  %1395 = vmatprep.mubr.bf16.mxu1 %v4138_v51  ;;  %v3488_v54 = vld [vmem:[#allocation5 + $0x160] ss:$16 sps:$4 sm:$0xff]   ;;  %v4142_v6 = vcombine.low %v92_v46, %v92_v46  ;;  %v3534_v24 = vld [vmem:[#allocation5 + $0xa8] ss:$16 sps:$4 sm:$0xff]  }
  0x57   :  { %1335 = vmatpush1.bf16.msra.mxu0 %v3452_v26  ;;  %v3486_v53 = vld [vmem:[#allocation5 + $0x364] ss:$16 sps:$4 sm:$0xff]   ;;  %v3489_v55 = vld [vmem:[#allocation5 + $0x360] ss:$16 sps:$4 sm:$0xff]   ;;  %v3542_v26 = vld [vmem:[#allocation5 + $0x8c] ss:$16 sps:$4 sm:$0xff]  }
  0x58   :  { %1376 = vmatpush1.bf16.msra.mxu1 %v3453_v27  ;;  %1336 = vmatprep.subr.bf16.mxu0 %v3454_v28  ;;  %v3490_v56 = vld [vmem:[#allocation5 + $0x144] ss:$16 sps:$4 sm:$0xff]   ;;  %v3494_v58 = vld [vmem:[#allocation5 + $0x140] ss:$16 sps:$4 sm:$0xff]   ;;  %v3540_v28 = vld [vmem:[#allocation5 + $0x88] ss:$16 sps:$4 sm:$0xff]  }
  0x59   :  { %1377 = vmatprep.subr.bf16.mxu1 %v3456_v29  ;;  %1354 = vmatprep.mubr.bf16.mxu0 %v4136_v47  ;;  %v3492_v57 = vld [vmem:[#allocation5 + $0x344] ss:$16 sps:$4 sm:$0xff]   ;;  %v3495_v59 = vld [vmem:[#allocation5 + $0x340] ss:$16 sps:$4 sm:$0xff]   ;;  %v3564_v46 = vld [vmem:[#allocation5 + $0x8] ss:$16 sps:$4 sm:$0xff]  }
  0x5a   :  { %v3496_v60 = vld [vmem:[#allocation5 + $0x124] ss:$16 sps:$4 sm:$0xff]   ;;  %v3500_v62 = vld [vmem:[#allocation5 + $0x120] ss:$16 sps:$4 sm:$0xff]  }
  0x5b   :  { %1337 = vmatpush1.bf16.msra.mxu0 %v3458_v30  ;;  %v3498_v61 = vld [vmem:[#allocation5 + $0x324] ss:$16 sps:$4 sm:$0xff]   ;;  %v3501_v63 = vld [vmem:[#allocation5 + $0x320] ss:$16 sps:$4 sm:$0xff]   ;;  %v3548_v30 = vld [vmem:[#allocation5 + $0x6c] ss:$16 sps:$4 sm:$0xff]  }
  0x5c   :  { %1378 = vmatpush1.bf16.msra.mxu1 %v3459_v31  ;;  %1338 = vmatprep.subr.bf16.mxu0 %v3460_v32  ;;  %v3502_v0 = vld [vmem:[#allocation5 + $0x104] ss:$16 sps:$4 sm:$0xff]   ;;  %v3506_v2 = vld [vmem:[#allocation5 + $0x100] ss:$16 sps:$4 sm:$0xff]  }
  0x5d   :  { %1379 = vmatprep.subr.bf16.mxu1 %v3462_v33  ;;  %v3504_v1 = vld [vmem:[#allocation5 + $0x304] ss:$16 sps:$4 sm:$0xff]   ;;  %v3507_v3 = vld [vmem:[#allocation5 + $0x300] ss:$16 sps:$4 sm:$0xff]  }
  0x5e   :  { %v3514_v4 = vld [vmem:[#allocation5 + $0x4e4] ss:$16 sps:$4 sm:$0xff]   ;;  %v3512_v8 = vld [vmem:[#allocation5 + $0x4e0] ss:$16 sps:$4 sm:$0xff]  }
  0x5f   :  { %1339 = vmatpush2.bf16.msra.mxu0 %v3464_v34  ;;  %v3517_v5 = vld [vmem:[#allocation5 + $0x604] ss:$16 sps:$4 sm:$0xff]   ;;  %v3515_v9 = vld [vmem:[#allocation5 + $0x600] ss:$16 sps:$4 sm:$0xff]   ;;  %v3546_v34 = vld [vmem:[#allocation5 + $0x68] ss:$16 sps:$4 sm:$0xff]  }
  0x60   :  { %1380 = vmatpush2.bf16.msra.mxu1 %v3465_v35  ;;  %1340 = vmatprep.subr.bf16.mxu0 %v3466_v36  ;;  %v3520_v10 = vld [vmem:[#allocation5 + $0x4c4] ss:$16 sps:$4 sm:$0xff]   ;;  %v3518_v12 = vld [vmem:[#allocation5 + $0x4c0] ss:$16 sps:$4 sm:$0xff]   ;;  %v3554_v36 = vld [vmem:[#allocation5 + $0x4c] ss:$16 sps:$4 sm:$0xff]  }
  0x61   :  { %1381 = vmatprep.subr.bf16.mxu1 %v3468_v37  ;;  %v3526_v14 = vld [vmem:[#allocation5 + $0x4a4] ss:$16 sps:$4 sm:$0xff]   ;;  %v3524_v16 = vld [vmem:[#allocation5 + $0x4a0] ss:$16 sps:$4 sm:$0xff]  }
  0x62   :  { %v3533_v19 = vld [vmem:[#allocation5 + $0x484] ss:$16 sps:$4 sm:$0xff]   ;;  %v3531_v21 = vld [vmem:[#allocation5 + $0x480] ss:$16 sps:$4 sm:$0xff]  }
  0x63   :  { %1341 = vmatpush2.bf16.msra.mxu0 %v3470_v38  ;;  %v3539_v23 = vld [vmem:[#allocation5 + $0x464] ss:$16 sps:$4 sm:$0xff]   ;;  %v3537_v25 = vld [vmem:[#allocation5 + $0x460] ss:$16 sps:$4 sm:$0xff]   ;;  %v3552_v38 = vld [vmem:[#allocation5 + $0x48] ss:$16 sps:$4 sm:$0xff]  }
  0x64   :  { %1382 = vmatpush2.bf16.msra.mxu1 %v3471_v39  ;;  %1342 = vmatprep.subr.bf16.mxu0 %v3472_v40  ;;  %v3545_v27 = vld [vmem:[#allocation5 + $0x444] ss:$16 sps:$4 sm:$0xff]   ;;  %v3543_v29 = vld [vmem:[#allocation5 + $0x440] ss:$16 sps:$4 sm:$0xff]   ;;  %v3560_v40 = vld [vmem:[#allocation5 + $0x2c] ss:$16 sps:$4 sm:$0xff]  }
  0x65   :  { %1383 = vmatprep.subr.bf16.mxu1 %v3474_v41  ;;  %v3551_v31 = vld [vmem:[#allocation5 + $0x424] ss:$16 sps:$4 sm:$0xff]   ;;  %v3549_v35 = vld [vmem:[#allocation5 + $0x420] ss:$16 sps:$4 sm:$0xff]  }
  0x66   :  { %v4151_v32 = vld [vmem:[#allocation2 + $0x10] sm:$0xff]  ;;  %v3555_v39 = vld [vmem:[#allocation5 + $0x400] ss:$16 sps:$4 sm:$0xff]  }
  0x67   :  { %1343 = vmatpush2.bf16.msra.mxu0 %v3476_v42  ;;  %v4155_v33 = vcombine.high %v4151_v32, %v4151_v32  ;;  %v3557_v37 = vld [vmem:[#allocation5 + $0x404] ss:$16 sps:$4 sm:$0xff]   ;;  %v3558_v42 = vld [vmem:[#allocation5 + $0x28] ss:$16 sps:$4 sm:$0xff]  }
  0x68   :  { %1384 = vmatpush2.bf16.msra.mxu1 %v3477_v43  ;;  %1344 = vmatprep.subr.bf16.mxu0 %v3478_v44  ;;  %v3563_v41 = vld [vmem:[#allocation5 + $0x5e4] ss:$16 sps:$4 sm:$0xff]   ;;  %v3561_v43 = vld [vmem:[#allocation5 + $0x5e0] ss:$16 sps:$4 sm:$0xff]   ;;  %v3566_v44 = vld [vmem:[#allocation5 + $0xc] ss:$16 sps:$4 sm:$0xff]  }
  0x69   :  { %1385 = vmatprep.subr.bf16.mxu1 %v3480_v45  ;;  %v3569_v45 = vld [vmem:[#allocation5 + $0x5c4] ss:$16 sps:$4 sm:$0xff]  }
  0x6b   :  { %1345 = vmatpush2.bf16.msra.mxu0 %v3482_v49  ;;  %v3575_v49 = vld [vmem:[#allocation5 + $0x5a4] ss:$16 sps:$4 sm:$0xff]  }
  0x6c   :  { %1386 = vmatpush2.bf16.msra.mxu1 %v3483_v50  ;;  %1346 = vmatprep.subr.bf16.mxu0 %v3484_v52  ;;  %v3570_v50 = vld [vmem:[#allocation5 + $0x1e8] ss:$16 sps:$4 sm:$0xff]   ;;  %v3573_v52 = vld [vmem:[#allocation5 + $0x5a0] ss:$16 sps:$4 sm:$0xff]  }
  0x6d   :  { %1387 = vmatprep.subr.bf16.mxu1 %v3486_v53  ;;  %v3578_v53 = vld [vmem:[#allocation5 + $0x1cc] ss:$16 sps:$4 sm:$0xff]  }
  0x6f   :  { %1347 = vmatpush2.bf16.msra.mxu0 %v3488_v54  ;;  %v3581_v54 = vld [vmem:[#allocation5 + $0x584] ss:$16 sps:$4 sm:$0xff]  }
  0x70   :  { %1388 = vmatpush2.bf16.msra.mxu1 %v3489_v55  ;;  %1348 = vmatprep.subr.bf16.mxu0 %v3490_v56  ;;  %v3576_v55 = vld [vmem:[#allocation5 + $0x1c8] ss:$16 sps:$4 sm:$0xff]   ;;  %v3579_v56 = vld [vmem:[#allocation5 + $0x580] ss:$16 sps:$4 sm:$0xff]  }
  0x71   :  { %1389 = vmatprep.subr.bf16.mxu1 %v3492_v57  ;;  %v3584_v57 = vld [vmem:[#allocation5 + $0x1ac] ss:$16 sps:$4 sm:$0xff]  }
  0x73   :  { %1349 = vmatpush2.bf16.msra.mxu0 %v3494_v58  ;;  %v3587_v58 = vld [vmem:[#allocation5 + $0x564] ss:$16 sps:$4 sm:$0xff]  }
  0x74   :  { %1390 = vmatpush2.bf16.msra.mxu1 %v3495_v59  ;;  %1350 = vmatprep.subr.bf16.mxu0 %v3496_v60  ;;  %v3582_v59 = vld [vmem:[#allocation5 + $0x1a8] ss:$16 sps:$4 sm:$0xff]   ;;  %v3585_v60 = vld [vmem:[#allocation5 + $0x560] ss:$16 sps:$4 sm:$0xff]  }
  0x75   :  { %1391 = vmatprep.subr.bf16.mxu1 %v3498_v61  ;;  %v3590_v61 = vld [vmem:[#allocation5 + $0x18c] ss:$16 sps:$4 sm:$0xff]  }
  0x77   :  { %1351 = vmatpush2.bf16.msra.mxu0 %v3500_v62  ;;  %v3593_v62 = vld [vmem:[#allocation5 + $0x544] ss:$16 sps:$4 sm:$0xff]  }
  0x78   :  { %1392 = vmatpush2.bf16.msra.mxu1 %v3501_v63  ;;  %1352 = vmatprep.subr.bf16.mxu0 %v3502_v0  ;;  %v3588_v63 = vld [vmem:[#allocation5 + $0x188] ss:$16 sps:$4 sm:$0xff]   ;;  %v3591_v0 = vld [vmem:[#allocation5 + $0x540] ss:$16 sps:$4 sm:$0xff]  }
  0x79   :  { %1393 = vmatprep.subr.bf16.mxu1 %v3504_v1  ;;  %v3596_v1 = vld [vmem:[#allocation5 + $0x16c] ss:$16 sps:$4 sm:$0xff]  }
  0x7b   :  { %1353 = vmatpush2.bf16.msra.mxu0 %v3506_v2  ;;  %v3599_v2 = vld [vmem:[#allocation5 + $0x524] ss:$16 sps:$4 sm:$0xff]  }
  0x7c   :  { %1394 = vmatpush2.bf16.msra.mxu1 %v3507_v3  ;;  %1404 = vmatprep.subr.bf16.mxu0 %v3514_v4  ;;  %v3594_v3 = vld [vmem:[#allocation5 + $0x168] ss:$16 sps:$4 sm:$0xff]   ;;  %v3597_v4 = vld [vmem:[#allocation5 + $0x520] ss:$16 sps:$4 sm:$0xff]  }
  0x7d   :  { %1459 = vmatprep.subr.bf16.mxu1 %v3517_v5  ;;  %v3602_v5 = vld [vmem:[#allocation5 + $0x14c] ss:$16 sps:$4 sm:$0xff]  }
  0x7e   :  { %1355 = vmatmul.mubr.bf16.vlgmr.msra.gmra.mxu0 %v4142_v6 }
  0x7f   :  { %1396 = vmatmul.mubr.bf16.vlgmr.msra.gmra.mxu1 %v4144_v7  ;;  %1405 = vmatpush1.bf16.msra.mxu0 %v3512_v8  ;;  %v3605_v8 = vld [vmem:[#allocation5 + $0x504] ss:$16 sps:$4 sm:$0xff]  }
  0x80   :  { %1460 = vmatpush1.bf16.msra.mxu1 %v3515_v9  ;;  %1406 = vmatprep.subr.bf16.mxu0 %v3520_v10  ;;  %v3600_v9 = vld [vmem:[#allocation5 + $0x148] ss:$16 sps:$4 sm:$0xff]   ;;  %v3603_v10 = vld [vmem:[#allocation5 + $0x500] ss:$16 sps:$4 sm:$0xff]  }
  0x81   :  { %1477 = vmatprep.mubr.bf16.mxu1 %v4079_v13  ;;  %1486 = vmatprep.subr.bf16.mxu1 %v3523_v11  ;;  %v3610_v11 = vld [vmem:[#allocation5 + $0x12c] ss:$16 sps:$4 sm:$0xff]  }
  0x82   :  { %1436 = vmatprep.mubr.bf16.mxu0 %v4155_v33 }
  0x83   :  { %1407 = vmatpush1.bf16.msra.mxu0 %v3518_v12  ;;  %v3613_v12 = vld [vmem:[#allocation5 + $0x2ec] ss:$16 sps:$4 sm:$0xff]  }
  0x84   :  { %1408 = vmatprep.subr.bf16.mxu0 %v3526_v14  ;;  %v4160_v14 = vcombine.low %v4151_v32, %v4151_v32  ;;  %v3635_v32 = vld [vmem:[#allocation5 + $0x268] ss:$16 sps:$4 sm:$0xff]  }
  0x87   :  { %3194 = vmatmul.mubr.msk.bf16.vlgmr.msra.gmra.mxu1 %vm1318_vm0, %v3527_v17  ;;  %1409 = vmatpush1.bf16.msra.mxu0 %v3524_v16  ;;  %v3611_v16 = vld [vmem:[#allocation5 + $0x2e8] ss:$16 sps:$4 sm:$0xff]   ;;  %v3616_v17 = vld [vmem:[#allocation5 + $0x10c] ss:$16 sps:$4 sm:$0xff]  }
  0x88   :  { %1487 = vmatpush1.bf16.msra.mxu1 %v3521_v15  ;;  %1410 = vmatprep.subr.bf16.mxu0 %v3533_v19  ;;  %v3608_v15 = vld [vmem:[#allocation5 + $0x128] ss:$16 sps:$4 sm:$0xff]  }
  0x89   :  { %1488 = vmatprep.subr.bf16.mxu1 %v3530_v18  ;;  %1518 = vmatprep.mubr.bf16.mxu1 %v4136_v47  ;;  %v3567_v47 = vld [vmem:[#allocation5 + $0x5c0] ss:$16 sps:$4 sm:$0xff]   ;;  %v3619_v18 = vld [vmem:[#allocation5 + $0x2cc] ss:$16 sps:$4 sm:$0xff]   ;;  %v3614_v19 = vld [vmem:[#allocation5 + $0x108] ss:$16 sps:$4 sm:$0xff]  }
  0x8b   :  { %1411 = vmatpush1.bf16.msra.mxu0 %v3531_v21  ;;  %v3622_v21 = vld [vmem:[#allocation5 + $0x4ec] ss:$16 sps:$4 sm:$0xff]  }
  0x8c   :  { %1489 = vmatpush1.bf16.msra.mxu1 %v3528_v20  ;;  %1412 = vmatprep.subr.bf16.mxu0 %v3539_v23  ;;  %v3617_v20 = vld [vmem:[#allocation5 + $0x2c8] ss:$16 sps:$4 sm:$0xff]  }
  0x8d   :  { %1490 = vmatprep.subr.bf16.mxu1 %v3536_v22  ;;  %v3625_v22 = vld [vmem:[#allocation5 + $0x2ac] ss:$16 sps:$4 sm:$0xff]   ;;  %v3620_v23 = vld [vmem:[#allocation5 + $0x4e8] ss:$16 sps:$4 sm:$0xff]  }
  0x8f   :  { %1413 = vmatpush1.bf16.msra.mxu0 %v3537_v25  ;;  %v3628_v25 = vld [vmem:[#allocation5 + $0x4cc] ss:$16 sps:$4 sm:$0xff]  }
  0x90   :  { %1491 = vmatpush1.bf16.msra.mxu1 %v3534_v24  ;;  %1414 = vmatprep.subr.bf16.mxu0 %v3545_v27  ;;  %v3623_v24 = vld [vmem:[#allocation5 + $0x2a8] ss:$16 sps:$4 sm:$0xff]  }
  0x91   :  { %1492 = vmatprep.subr.bf16.mxu1 %v3542_v26  ;;  %v3631_v26 = vld [vmem:[#allocation5 + $0x28c] ss:$16 sps:$4 sm:$0xff]   ;;  %v3626_v27 = vld [vmem:[#allocation5 + $0x4c8] ss:$16 sps:$4 sm:$0xff]  }
  0x93   :  { %1415 = vmatpush1.bf16.msra.mxu0 %v3543_v29  ;;  %v3634_v29 = vld [vmem:[#allocation5 + $0x4ac] ss:$16 sps:$4 sm:$0xff]  }
  0x94   :  { %1493 = vmatpush1.bf16.msra.mxu1 %v3540_v28  ;;  %1416 = vmatprep.subr.bf16.mxu0 %v3551_v31  ;;  %v3629_v28 = vld [vmem:[#allocation5 + $0x288] ss:$16 sps:$4 sm:$0xff]  }
  0x95   :  { %1494 = vmatprep.subr.bf16.mxu1 %v3548_v30  ;;  %v3637_v30 = vld [vmem:[#allocation5 + $0x26c] ss:$16 sps:$4 sm:$0xff]   ;;  %v3632_v31 = vld [vmem:[#allocation5 + $0x4a8] ss:$16 sps:$4 sm:$0xff]  }
  0x97   :  { %1417 = vmatpush1.bf16.msra.mxu0 %v3549_v35  ;;  %v3638_v35 = vld [vmem:[#allocation5 + $0x488] ss:$16 sps:$4 sm:$0xff]  }
  0x98   :  { %1495 = vmatpush1.bf16.msra.mxu1 %v3546_v34  ;;  %1418 = vmatprep.subr.bf16.mxu0 %v3557_v37  ;;  %v3643_v34 = vld [vmem:[#allocation5 + $0x24c] ss:$16 sps:$4 sm:$0xff]  }
  0x99   :  { %1496 = vmatprep.subr.bf16.mxu1 %v3554_v36  ;;  %v3646_v36 = vld [vmem:[#allocation5 + $0x46c] ss:$16 sps:$4 sm:$0xff]  }
  0x9a   :  { %v3649_v37 = vld [vmem:[#allocation5 + $0x22c] ss:$16 sps:$4 sm:$0xff]  }
  0x9b   :  { %1419 = vmatpush1.bf16.msra.mxu0 %v3555_v39  ;;  %v3647_v39 = vld [vmem:[#allocation5 + $0x228] ss:$16 sps:$4 sm:$0xff]  }
  0x9c   :  { %1497 = vmatpush1.bf16.msra.mxu1 %v3552_v38  ;;  %1420 = vmatprep.subr.bf16.mxu0 %v3563_v41  ;;  %v3644_v38 = vld [vmem:[#allocation5 + $0x468] ss:$16 sps:$4 sm:$0xff]  }
  0x9d   :  { %1498 = vmatprep.subr.bf16.mxu1 %v3560_v40  ;;  %v3655_v40 = vld [vmem:[#allocation5 + $0x20c] ss:$16 sps:$4 sm:$0xff]   ;;  %v3650_v41 = vld [vmem:[#allocation5 + $0x448] ss:$16 sps:$4 sm:$0xff]  }
  0x9f   :  { %1421 = vmatpush2.bf16.msra.mxu0 %v3561_v43  ;;  %v3658_v43 = vld [vmem:[#allocation5 + $0x42c] ss:$16 sps:$4 sm:$0xff]  }
  0xa0   :  { %1499 = vmatpush1.bf16.msra.mxu1 %v3558_v42  ;;  %1422 = vmatprep.subr.bf16.mxu0 %v3569_v45  ;;  %v3653_v42 = vld [vmem:[#allocation5 + $0x208] ss:$16 sps:$4 sm:$0xff]  }
  0xa1   :  { %1500 = vmatprep.subr.bf16.mxu1 %v3566_v44  ;;  %v3661_v44 = vld [vmem:[#allocation5 + $0x3ec] ss:$16 sps:$4 sm:$0xff]   ;;  %v3656_v45 = vld [vmem:[#allocation5 + $0x428] ss:$16 sps:$4 sm:$0xff]  }
  0xa3   :  { %1423 = vmatpush2.bf16.msra.mxu0 %v3567_v47  ;;  %v3664_v47 = vld [vmem:[#allocation5 + $0x40c] ss:$16 sps:$4 sm:$0xff]  }
  0xa4   :  { %1501 = vmatpush1.bf16.msra.mxu1 %v3564_v46  ;;  %1424 = vmatprep.subr.bf16.mxu0 %v3575_v49  ;;  %v3659_v46 = vld [vmem:[#allocation5 + $0x3e8] ss:$16 sps:$4 sm:$0xff]  }
  0xa5   :  { %1502 = vmatprep.subr.bf16.mxu1 %v3572_v48  ;;  %v3667_v48 = vld [vmem:[#allocation5 + $0x3cc] ss:$16 sps:$4 sm:$0xff]   ;;  %v3662_v49 = vld [vmem:[#allocation5 + $0x408] ss:$16 sps:$4 sm:$0xff]  }
  0xa7   :  { %1425 = vmatpush2.bf16.msra.mxu0 %v3573_v52  ;;  %v3670_v52 = vld [vmem:[#allocation5 + $0x5ec] ss:$16 sps:$4 sm:$0xff]  }
  0xa8   :  { %1503 = vmatpush2.bf16.msra.mxu1 %v3570_v50  ;;  %1426 = vmatprep.subr.bf16.mxu0 %v3581_v54  ;;  %v3665_v50 = vld [vmem:[#allocation5 + $0x3c8] ss:$16 sps:$4 sm:$0xff]  }
  0xa9   :  { %1504 = vmatprep.subr.bf16.mxu1 %v3578_v53  ;;  %v3673_v53 = vld [vmem:[#allocation5 + $0x3ac] ss:$16 sps:$4 sm:$0xff]   ;;  %v3668_v54 = vld [vmem:[#allocation5 + $0x5e8] ss:$16 sps:$4 sm:$0xff]  }
  0xab   :  { %1427 = vmatpush2.bf16.msra.mxu0 %v3579_v56  ;;  %v3676_v56 = vld [vmem:[#allocation5 + $0x5cc] ss:$16 sps:$4 sm:$0xff]  }
  0xac   :  { %1505 = vmatpush2.bf16.msra.mxu1 %v3576_v55  ;;  %1428 = vmatprep.subr.bf16.mxu0 %v3587_v58  ;;  %v3671_v55 = vld [vmem:[#allocation5 + $0x3a8] ss:$16 sps:$4 sm:$0xff]  }
  0xad   :  { %1506 = vmatprep.subr.bf16.mxu1 %v3584_v57  ;;  %v3679_v57 = vld [vmem:[#allocation5 + $0x38c] ss:$16 sps:$4 sm:$0xff]   ;;  %v3674_v58 = vld [vmem:[#allocation5 + $0x5c8] ss:$16 sps:$4 sm:$0xff]  }
  0xaf   :  { %1429 = vmatpush2.bf16.msra.mxu0 %v3585_v60  ;;  %v3682_v60 = vld [vmem:[#allocation5 + $0x5ac] ss:$16 sps:$4 sm:$0xff]  }
  0xb0   :  { %1507 = vmatpush2.bf16.msra.mxu1 %v3582_v59  ;;  %1430 = vmatprep.subr.bf16.mxu0 %v3593_v62  ;;  %v3677_v59 = vld [vmem:[#allocation5 + $0x388] ss:$16 sps:$4 sm:$0xff]  }
  0xb1   :  { %1508 = vmatprep.subr.bf16.mxu1 %v3590_v61  ;;  %v3685_v61 = vld [vmem:[#allocation5 + $0x36c] ss:$16 sps:$4 sm:$0xff]   ;;  %v3680_v62 = vld [vmem:[#allocation5 + $0x5a8] ss:$16 sps:$4 sm:$0xff]  }
  0xb3   :  { %1431 = vmatpush2.bf16.msra.mxu0 %v3591_v0  ;;  %v3688_v0 = vld [vmem:[#allocation5 + $0x58c] ss:$16 sps:$4 sm:$0xff]  }
  0xb4   :  { %1509 = vmatpush2.bf16.msra.mxu1 %v3588_v63  ;;  %1432 = vmatprep.subr.bf16.mxu0 %v3599_v2  ;;  %v3683_v63 = vld [vmem:[#allocation5 + $0x368] ss:$16 sps:$4 sm:$0xff]  }
  0xb5   :  { %1510 = vmatprep.subr.bf16.mxu1 %v3596_v1  ;;  %v3691_v1 = vld [vmem:[#allocation5 + $0x34c] ss:$16 sps:$4 sm:$0xff]   ;;  %v3686_v2 = vld [vmem:[#allocation5 + $0x588] ss:$16 sps:$4 sm:$0xff]  }
  0xb7   :  { %1433 = vmatpush2.bf16.msra.mxu0 %v3597_v4  ;;  %v3694_v4 = vld [vmem:[#allocation5 + $0x56c] ss:$16 sps:$4 sm:$0xff]  }
  0xb8   :  { %1511 = vmatpush2.bf16.msra.mxu1 %v3594_v3  ;;  %1434 = vmatprep.subr.bf16.mxu0 %v3605_v8  ;;  %v3689_v3 = vld [vmem:[#allocation5 + $0x348] ss:$16 sps:$4 sm:$0xff]  }
  0xb9   :  { %1512 = vmatprep.subr.bf16.mxu1 %v3602_v5  ;;  %v3697_v5 = vld [vmem:[#allocation5 + $0x32c] ss:$16 sps:$4 sm:$0xff]   ;;  %v3692_v8 = vld [vmem:[#allocation5 + $0x568] ss:$16 sps:$4 sm:$0xff]  }
  0xbb   :  { %1435 = vmatpush2.bf16.msra.mxu0 %v3603_v10  ;;  %v3700_v10 = vld [vmem:[#allocation5 + $0x54c] ss:$16 sps:$4 sm:$0xff]  }
  0xbc   :  { %1513 = vmatpush2.bf16.msra.mxu1 %v3600_v9  ;;  %1527 = vmatprep.subr.bf16.mxu0 %v3613_v12  ;;  %v3695_v9 = vld [vmem:[#allocation5 + $0x328] ss:$16 sps:$4 sm:$0xff]  }
  0xbd   :  { %1514 = vmatprep.subr.bf16.mxu1 %v3610_v11  ;;  %v3703_v11 = vld [vmem:[#allocation5 + $0x30c] ss:$16 sps:$4 sm:$0xff]   ;;  %v3698_v12 = vld [vmem:[#allocation5 + $0x548] ss:$16 sps:$4 sm:$0xff]  }
  0xbe   :  { %1437 = vmatmul.mubr.bf16.vlgmr.msra.gmra.mxu0 %v4160_v14 }
  0xbf   :  { %1528 = vmatpush1.bf16.msra.mxu0 %v3611_v16  ;;  %1559 = vmatprep.mubr.bf16.mxu0 %v4138_v51  ;;  %v3640_v51 = vld [vmem:[#allocation5 + $0x48c] ss:$16 sps:$4 sm:$0xff]  }
  0xc0   :  { %1515 = vmatpush2.bf16.msra.mxu1 %v3608_v15  ;;  %1529 = vmatprep.subr.bf16.mxu0 %v3619_v18  ;;  %v3701_v15 = vld [vmem:[#allocation5 + $0x308] ss:$16 sps:$4 sm:$0xff]   ;;  %v3706_v16 = vld [vmem:[#allocation5 + $0x52c] ss:$16 sps:$4 sm:$0xff]  }
  0xc1   :  { %1516 = vmatprep.subr.bf16.mxu1 %v3616_v17  ;;  %v3709_v17 = vld [vmem:[#allocation5 + $0x60c] ss:$16 sps:$4 sm:$0xff]   ;;  %v3704_v18 = vld [vmem:[#allocation5 + $0x528] ss:$16 sps:$4 sm:$0xff]  }
  0xc3   :  { %1530 = vmatpush1.bf16.msra.mxu0 %v3617_v20  ;;  %v3712_v20 = vld [vmem:[#allocation5 + $0x50c] ss:$16 sps:$4 sm:$0xff]  }
  0xc4   :  { %1517 = vmatpush2.bf16.msra.mxu1 %v3614_v19  ;;  %1531 = vmatprep.subr.bf16.mxu0 %v3625_v22  ;;  %v3707_v19 = vld [vmem:[#allocation5 + $0x608] ss:$16 sps:$4 sm:$0xff]  }
  0xc5   :  { %1568 = vmatprep.subr.bf16.mxu1 %v3622_v21  ;;  %v3715_v21 = vld [vmem:[#allocation8 + $0xe4] ss:$16 sps:$4 sm:$0xff]  }
  0xc6   :  { %v3710_v22 = vld [vmem:[#allocation5 + $0x508] ss:$16 sps:$4 sm:$0xff]  }
  0xc7   :  { %1519 = vmatmul.mubr.bf16.vlgmr.msra.gmra.mxu1 %v4142_v6  ;;  %1532 = vmatpush1.bf16.msra.mxu0 %v3623_v24  ;;  %v3641_v6 = vld [vmem:[#allocation5 + $0x248] ss:$16 sps:$4 sm:$0xff]  }
  0xc8   :  { %1569 = vmatpush1.bf16.msra.mxu1 %v3620_v23  ;;  %1533 = vmatprep.subr.bf16.mxu0 %v3631_v26  ;;  %v3713_v23 = vld [vmem:[#allocation8 + $0xe0] ss:$16 sps:$4 sm:$0xff]   ;;  %v3718_v24 = vld [vmem:[#allocation8 + $0xc4] ss:$16 sps:$4 sm:$0xff]   ;;  %v3941_v26 = vld [vmem:[#allocation2 + $0x18] ss:$0 sps:$4 sm:$0xff]  }
  0xc9   :  { %1570 = vmatprep.subr.bf16.mxu1 %v3628_v25  ;;  %1600 = vmatprep.mubr.bf16.mxu1 %v4155_v33  ;;  %v3652_v33 = vld [vmem:[#allocation5 + $0x44c] ss:$16 sps:$4 sm:$0xff]   ;;  %v3716_v25 = vld [vmem:[#allocation8 + $0xc0] ss:$16 sps:$4 sm:$0xff]  }
  0xcb   :  { %1534 = vmatpush1.bf16.msra.mxu0 %v3629_v28  ;;  %v3724_v28 = vld [vmem:[#allocation8 + $0x84] ss:$16 sps:$4 sm:$0xff]  }
  0xcc   :  { %1571 = vmatpush1.bf16.msra.mxu1 %v3626_v27  ;;  %1535 = vmatprep.subr.bf16.mxu0 %v3637_v30  ;;  %v3721_v27 = vld [vmem:[#allocation8 + $0xa4] ss:$16 sps:$4 sm:$0xff]  }
  0xcd   :  { %1572 = vmatprep.subr.bf16.mxu1 %v3634_v29  ;;  %v3722_v29 = vld [vmem:[#allocation8 + $0x80] ss:$16 sps:$4 sm:$0xff]   ;;  %v3769_v30 = vld [vmem:[#allocation8 + $0x2e4] ss:$16 sps:$4 sm:$0xff]  }
  0xcf   :  { %1536 = vmatpush1.bf16.msra.mxu0 %v3635_v32  ;;  %v3773_v32 = vld [vmem:[#allocation8 + $0x2c0] ss:$16 sps:$4 sm:$0xff]  }
  0xd0   :  { %1573 = vmatpush1.bf16.msra.mxu1 %v3632_v31  ;;  %1537 = vmatprep.subr.bf16.mxu0 %v3643_v34  ;;  %v3727_v31 = vld [vmem:[#allocation8 + $0x64] ss:$16 sps:$4 sm:$0xff]  }
  0xd1   :  { %1574 = vmatprep.subr.bf16.mxu1 %v3640_v51  ;;  %v3775_v51 = vld [vmem:[#allocation8 + $0x2c4] ss:$16 sps:$4 sm:$0xff]  }
  0xd2   :  { %v3730_v34 = vld [vmem:[#allocation8 + $0x44] ss:$16 sps:$4 sm:$0xff]  }
  0xd3   :  { %1538 = vmatpush1.bf16.msra.mxu0 %v3641_v6  ;;  %v3779_v6 = vld [vmem:[#allocation8 + $0x2a0] ss:$16 sps:$4 sm:$0xff]  }
  0xd4   :  { %1575 = vmatpush1.bf16.msra.mxu1 %v3638_v35  ;;  %1539 = vmatprep.subr.bf16.mxu0 %v3649_v37  ;;  %v3728_v35 = vld [vmem:[#allocation8 + $0x40] ss:$16 sps:$4 sm:$0xff]   ;;  %v3733_v37 = vld [vmem:[#allocation8 + $0x24] ss:$16 sps:$4 sm:$0xff]  }
  0xd5   :  { %1576 = vmatprep.subr.bf16.mxu1 %v3646_v36  ;;  %v3781_v36 = vld [vmem:[#allocation8 + $0x2a4] ss:$16 sps:$4 sm:$0xff]  }
  0xd7   :  { %1540 = vmatpush1.bf16.msra.mxu0 %v3647_v39  ;;  %v3785_v39 = vld [vmem:[#allocation8 + $0x280] ss:$16 sps:$4 sm:$0xff]  }
  0xd8   :  { %1577 = vmatpush1.bf16.msra.mxu1 %v3644_v38  ;;  %1541 = vmatprep.subr.bf16.mxu0 %v3655_v40  ;;  %v3731_v38 = vld [vmem:[#allocation8 + $0x20] ss:$16 sps:$4 sm:$0xff]   ;;  %v3736_v40 = vld [vmem:[#allocation8 + $0x4] ss:$16 sps:$4 sm:$0xff]  }
  0xd9   :  { %1578 = vmatprep.subr.bf16.mxu1 %v3652_v33  ;;  %v3787_v33 = vld [vmem:[#allocation8 + $0x284] ss:$16 sps:$4 sm:$0xff]  }
  0xdb   :  { %1542 = vmatpush1.bf16.msra.mxu0 %v3653_v42  ;;  %v3791_v42 = vld [vmem:[#allocation8 + $0x260] ss:$16 sps:$4 sm:$0xff]  }
  0xdc   :  { %1579 = vmatpush1.bf16.msra.mxu1 %v3650_v41  ;;  %1543 = vmatprep.subr.bf16.mxu0 %v3661_v44  ;;  %v3734_v41 = vld [vmem:[#allocation8] ss:$16 sps:$4 sm:$0xff]   ;;  %v3739_v44 = vld [vmem:[#allocation8 + $0x1e4] ss:$16 sps:$4 sm:$0xff]  }
  0xdd   :  { %1580 = vmatprep.subr.bf16.mxu1 %v3658_v43  ;;  %v3793_v43 = vld [vmem:[#allocation8 + $0x264] ss:$16 sps:$4 sm:$0xff]  }
  0xdf   :  { %1544 = vmatpush2.bf16.msra.mxu0 %v3659_v46  ;;  %v3797_v46 = vld [vmem:[#allocation8 + $0x240] ss:$16 sps:$4 sm:$0xff]  }
  0xe0   :  { %1581 = vmatpush1.bf16.msra.mxu1 %v3656_v45  ;;  %1545 = vmatprep.subr.bf16.mxu0 %v3667_v48  ;;  %v3737_v45 = vld [vmem:[#allocation8 + $0x1e0] ss:$16 sps:$4 sm:$0xff]   ;;  %v3742_v48 = vld [vmem:[#allocation8 + $0x1c4] ss:$16 sps:$4 sm:$0xff]  }
  0xe1   :  { %1582 = vmatprep.subr.bf16.mxu1 %v3664_v47  ;;  %v3799_v47 = vld [vmem:[#allocation8 + $0x244] ss:$16 sps:$4 sm:$0xff]  }
  0xe3   :  { %1546 = vmatpush2.bf16.msra.mxu0 %v3665_v50  ;;  %v3803_v50 = vld [vmem:[#allocation8 + $0x220] ss:$16 sps:$4 sm:$0xff]  }
  0xe4   :  { %1583 = vmatpush1.bf16.msra.mxu1 %v3662_v49  ;;  %1547 = vmatprep.subr.bf16.mxu0 %v3673_v53  ;;  %v3740_v49 = vld [vmem:[#allocation8 + $0x1c0] ss:$16 sps:$4 sm:$0xff]   ;;  %v3745_v53 = vld [vmem:[#allocation8 + $0x1a4] ss:$16 sps:$4 sm:$0xff]  }
  0xe5   :  { %1584 = vmatprep.subr.bf16.mxu1 %v3670_v52  ;;  %v3805_v52 = vld [vmem:[#allocation8 + $0x224] ss:$16 sps:$4 sm:$0xff]  }
  0xe7   :  { %1548 = vmatpush2.bf16.msra.mxu0 %v3671_v55  ;;  %v3809_v55 = vld [vmem:[#allocation8 + $0x200] ss:$16 sps:$4 sm:$0xff]  }
  0xe8   :  { %1585 = vmatpush2.bf16.msra.mxu1 %v3668_v54  ;;  %1549 = vmatprep.subr.bf16.mxu0 %v3679_v57  ;;  %v3743_v54 = vld [vmem:[#allocation8 + $0x1a0] ss:$16 sps:$4 sm:$0xff]   ;;  %v3748_v57 = vld [vmem:[#allocation8 + $0x184] ss:$16 sps:$4 sm:$0xff]  }
  0xe9   :  { %1586 = vmatprep.subr.bf16.mxu1 %v3676_v56  ;;  %v3811_v56 = vld [vmem:[#allocation8 + $0x204] ss:$16 sps:$4 sm:$0xff]  }
  0xeb   :  { %1550 = vmatpush2.bf16.msra.mxu0 %v3677_v59  ;;  %v3815_v59 = vld [vmem:[#allocation8 + $0x3e0] ss:$16 sps:$4 sm:$0xff]  }
  0xec   :  { %1587 = vmatpush2.bf16.msra.mxu1 %v3674_v58  ;;  %1551 = vmatprep.subr.bf16.mxu0 %v3685_v61  ;;  %v3746_v58 = vld [vmem:[#allocation8 + $0x180] ss:$16 sps:$4 sm:$0xff]   ;;  %v3751_v61 = vld [vmem:[#allocation8 + $0x164] ss:$16 sps:$4 sm:$0xff]  }
  0xed   :  { %1588 = vmatprep.subr.bf16.mxu1 %v3682_v60  ;;  %v3817_v60 = vld [vmem:[#allocation8 + $0x3e4] ss:$16 sps:$4 sm:$0xff]  }
  0xef   :  { %1552 = vmatpush2.bf16.msra.mxu0 %v3683_v63  ;;  %v3821_v63 = vld [vmem:[#allocation8 + $0x3c0] ss:$16 sps:$4 sm:$0xff]  }
  0xf0   :  { %1589 = vmatpush2.bf16.msra.mxu1 %v3680_v62  ;;  %1553 = vmatprep.subr.bf16.mxu0 %v3691_v1  ;;  %v3749_v62 = vld [vmem:[#allocation8 + $0x160] ss:$16 sps:$4 sm:$0xff]   ;;  %v3754_v1 = vld [vmem:[#allocation8 + $0x144] ss:$16 sps:$4 sm:$0xff]  }
  0xf1   :  { %1590 = vmatprep.subr.bf16.mxu1 %v3688_v0  ;;  %v3823_v0 = vld [vmem:[#allocation8 + $0x3c4] ss:$16 sps:$4 sm:$0xff]  }
  0xf3   :  { %1554 = vmatpush2.bf16.msra.mxu0 %v3689_v3  ;;  %v3827_v3 = vld [vmem:[#allocation8 + $0x3a0] ss:$16 sps:$4 sm:$0xff]  }
  0xf4   :  { %1591 = vmatpush2.bf16.msra.mxu1 %v3686_v2  ;;  %1555 = vmatprep.subr.bf16.mxu0 %v3697_v5  ;;  %v3752_v2 = vld [vmem:[#allocation8 + $0x140] ss:$16 sps:$4 sm:$0xff]   ;;  %v3757_v5 = vld [vmem:[#allocation8 + $0x124] ss:$16 sps:$4 sm:$0xff]  }
  0xf5   :  { %1592 = vmatprep.subr.bf16.mxu1 %v3694_v4  ;;  %v3829_v4 = vld [vmem:[#allocation8 + $0x3a4] ss:$16 sps:$4 sm:$0xff]  }
  0xf7   :  { %1556 = vmatpush2.bf16.msra.mxu0 %v3695_v9  ;;  %v3833_v9 = vld [vmem:[#allocation8 + $0x380] ss:$16 sps:$4 sm:$0xff]  }
  0xf8   :  { %1593 = vmatpush2.bf16.msra.mxu1 %v3692_v8  ;;  %1557 = vmatprep.subr.bf16.mxu0 %v3703_v11  ;;  %v3755_v8 = vld [vmem:[#allocation8 + $0x120] ss:$16 sps:$4 sm:$0xff]   ;;  %v3760_v11 = vld [vmem:[#allocation8 + $0x104] ss:$16 sps:$4 sm:$0xff]  }
  0xf9   :  { %1594 = vmatprep.subr.bf16.mxu1 %v3700_v10  ;;  %v3835_v10 = vld [vmem:[#allocation8 + $0x384] ss:$16 sps:$4 sm:$0xff]  }
  0xfb   :  { %1558 = vmatpush2.bf16.msra.mxu0 %v3701_v15 }
  0xfc   :  { %1595 = vmatpush2.bf16.msra.mxu1 %v3698_v12  ;;  %1623 = vmatprep.subr.bf16.mxu0 %v3709_v17  ;;  %v3841_v17 = vld [vmem:[#allocation8 + $0x364] ss:$16 sps:$4 sm:$0xff]  }
  0xfd   :  { %1596 = vmatprep.subr.bf16.mxu1 %v3706_v16  ;;  %v3758_v16 = vld [vmem:[#allocation8 + $0x100] ss:$16 sps:$4 sm:$0xff]  }
  0xfe   :  { %1560 = vmatmul.mubr.bf16.vlgmr.msra.gmra.mxu0 %v4144_v7  ;;  %v3719_v7 = vld [vmem:[#allocation8 + $0xa0] ss:$16 sps:$4 sm:$0xff]  }
  0xff   :  { %1624 = vmatpush1.bf16.msra.mxu0 %v3707_v19  ;;  %1641 = vmatprep.mubr.bf16.mxu0 %v4079_v13  ;;  %v3767_v13 = vld [vmem:[#allocation8 + $0x2e0] ss:$16 sps:$4 sm:$0xff]  }
 0x100   :  { %1597 = vmatpush2.bf16.msra.mxu1 %v3704_v18  ;;  %2448 = vmatprep.subr.bf16.mxu0 %v3715_v21  ;;  %v3839_v21 = vld [vmem:[#allocation8 + $0x360] ss:$16 sps:$4 sm:$0xff]  }
 0x101   :  { %1598 = vmatprep.subr.bf16.mxu1 %v3712_v20  ;;  %v3763_v20 = vld [vmem:[#allocation8 + $0xec] ss:$16 sps:$4 sm:$0xff]  }
 0x104   :  { %1599 = vmatpush2.bf16.msra.mxu1 %v3710_v22 }
 0x105   :  { %2489 = vmatprep.subr.bf16.mxu1 %v3769_v30 }
 0x106   :  { %3195 = vmatmul.mubr.msk.bf16.vlgmr.msra.gmra.mxu0 %vm1318_vm0, %v3941_v26 }
 0x107   :  { %1601 = vmatmul.mubr.bf16.vlgmr.msra.gmra.mxu1 %v4160_v14  ;;  %2449 = vmatpush1.bf16.msra.mxu0 %v3713_v23  ;;  %v3725_v14 = vld [vmem:[#allocation8 + $0x60] ss:$16 sps:$4 sm:$0xff]  }
 0x108   :  { %2450 = vmatprep.subr.bf16.mxu0 %v3718_v24  ;;  %2490 = vmatpush1.bf16.msra.mxu1 %v3767_v13  ;;  %v3847_v24 = vld [vmem:[#allocation8 + $0x344] ss:$16 sps:$4 sm:$0xff]   ;;  %v3851_v13 = vld [vmem:[#allocation8 + $0x320] ss:$16 sps:$4 sm:$0xff]  }
 0x109   :  { %2491 = vmatprep.subr.bf16.mxu1 %v3775_v51  ;;  %v3859_v51 = vld [vmem:[#allocation8 + $0x2ec] ss:$16 sps:$4 sm:$0xff]  }
 0x10b   :  { %2451 = vmatpush1.bf16.msra.mxu0 %v3716_v25 }
 0x10c   :  { %2452 = vmatprep.subr.bf16.mxu0 %v3721_v27  ;;  %2492 = vmatpush1.bf16.msra.mxu1 %v3773_v32  ;;  %v3845_v27 = vld [vmem:[#allocation8 + $0x340] ss:$16 sps:$4 sm:$0xff]  }
 0x10d   :  { %2493 = vmatprep.subr.bf16.mxu1 %v3781_v36  ;;  %v3854_v32 = vld [vmem:[#allocation8 + $0x300] ss:$16 sps:$4 sm:$0xff]   ;;  %v4173_v36 = vld [vmem:[#allocation7] sm:$0xf] }
 0x10f   :  { %2453 = vmatpush1.bf16.msra.mxu0 %v3719_v7 }
 0x110   :  { %2454 = vmatprep.subr.bf16.mxu0 %v3724_v28  ;;  %2494 = vmatpush1.bf16.msra.mxu1 %v3779_v6  ;;  %v3853_v28 = vld [vmem:[#allocation8 + $0x324] ss:$16 sps:$4 sm:$0xff]  }
 0x111   :  { %2495 = vmatprep.subr.bf16.mxu1 %v3787_v33 }
 0x113   :  { %2455 = vmatpush1.bf16.msra.mxu0 %v3722_v29 }
 0x114   :  { %2456 = vmatprep.subr.bf16.mxu0 %v3727_v31  ;;  %2496 = vmatpush1.bf16.msra.mxu1 %v3785_v39  ;;  %v3856_v31 = vld [vmem:[#allocation8 + $0x304] ss:$16 sps:$4 sm:$0xff]  }
 0x115   :  { %2497 = vmatprep.subr.bf16.mxu1 %v3793_v43 }
 0x117   :  { %2457 = vmatpush1.bf16.msra.mxu0 %v3725_v14 }
 0x118   :  { %2458 = vmatprep.subr.bf16.mxu0 %v3730_v34  ;;  %2498 = vmatpush1.bf16.msra.mxu1 %v3791_v42  ;;  %v294_v34 = vlaneseq }
 0x119   :  { %2499 = vmatprep.subr.bf16.mxu1 %v3799_v47 }
 0x11b   :  { %2459 = vmatpush1.bf16.msra.mxu0 %v3728_v35  ;;  %v4170_v35 = vshrl.u32 %v294_v34, 7 }
 0x11c   :  { %2460 = vmatprep.subr.bf16.mxu0 %v3733_v37  ;;  %2500 = vmatpush1.bf16.msra.mxu1 %v3797_v46 }
 0x11d   :  { %2501 = vmatprep.subr.bf16.mxu1 %v3805_v52  ;;  %v296_v6 = vsub.s32 0, %v4170_v35  ;;  %v300_v37 = vsub.s32 1, %v4170_v35 }
 0x11f   :  { %2461 = vmatpush1.bf16.msra.mxu0 %v3731_v38  ;;  %v297_v38 = vrot.slane %v4173_v36, %v296_v6  ;;  %v301_v39 = vrot.slane %v4173_v36, %v300_v37 }
 0x120   :  { %2462 = vmatprep.subr.bf16.mxu0 %v3736_v40  ;;  %2502 = vmatpush1.bf16.msra.mxu1 %v3803_v50 }
 0x121   :  { %2503 = vmatprep.subr.bf16.mxu1 %v3811_v56  ;;  %v3761_v56 = vld [vmem:[#allocation8 + $0xe8] ss:$16 sps:$4 sm:$0xff]  }
 0x123   :  { %2463 = vmatpush1.bf16.msra.mxu0 %v3734_v41 }
 0x124   :  { %2464 = vmatprep.subr.bf16.mxu0 %v3739_v44  ;;  %2504 = vmatpush1.bf16.msra.mxu1 %v3809_v55 }
 0x125   :  { %2505 = vmatprep.subr.bf16.mxu1 %v3817_v60 }
 0x127   :  { %2465 = vmatpush2.bf16.msra.mxu0 %v3737_v45 }
 0x128   :  { %2466 = vmatprep.subr.bf16.mxu0 %v3742_v48  ;;  %2506 = vmatpush2.bf16.msra.mxu1 %v3815_v59  ;;  %v3766_v59 = vld [vmem:[#allocation8 + $0xcc] ss:$16 sps:$4 sm:$0xff]  }
 0x129   :  { %2507 = vmatprep.subr.bf16.mxu1 %v3823_v0  ;;  %v3770_v0 = vld [vmem:[#allocation8 + $0xa8] ss:$16 sps:$4 sm:$0xff]  }
 0x12b   :  { %2467 = vmatpush2.bf16.msra.mxu0 %v3740_v49 }
 0x12c   :  { %2468 = vmatprep.subr.bf16.mxu0 %v3745_v53  ;;  %2508 = vmatpush2.bf16.msra.mxu1 %v3821_v63  ;;  %v3772_v63 = vld [vmem:[#allocation8 + $0xac] ss:$16 sps:$4 sm:$0xff]  }
 0x12d   :  { %2509 = vmatprep.subr.bf16.mxu1 %v3829_v4  ;;  %v3782_v4 = vld [vmem:[#allocation8 + $0x68] ss:$16 sps:$4 sm:$0xff]  }
 0x12f   :  { %2469 = vmatpush2.bf16.msra.mxu0 %v3743_v54 }
 0x130   :  { %2470 = vmatprep.subr.bf16.mxu0 %v3748_v57  ;;  %2510 = vmatpush2.bf16.msra.mxu1 %v3827_v3  ;;  %v3784_v3 = vld [vmem:[#allocation8 + $0x6c] ss:$16 sps:$4 sm:$0xff]  }
 0x131   :  { %2511 = vmatprep.subr.bf16.mxu1 %v3835_v10  ;;  %v3794_v10 = vld [vmem:[#allocation8 + $0x28] ss:$16 sps:$4 sm:$0xff]  }
 0x133   :  { %2471 = vmatpush2.bf16.msra.mxu0 %v3746_v58 }
 0x134   :  { %2472 = vmatprep.subr.bf16.mxu0 %v3751_v61  ;;  %2512 = vmatpush2.bf16.msra.mxu1 %v3833_v9  ;;  %v3764_v61 = vld [vmem:[#allocation8 + $0xc8] ss:$16 sps:$4 sm:$0xff]   ;;  %v3796_v9 = vld [vmem:[#allocation8 + $0x2c] ss:$16 sps:$4 sm:$0xff]  }
 0x135   :  { %2513 = vmatprep.subr.bf16.mxu1 %v3841_v17  ;;  %v3814_v17 = vld [vmem:[#allocation8 + $0x1cc] ss:$16 sps:$4 sm:$0xff]  }
 0x137   :  { %2473 = vmatpush2.bf16.msra.mxu0 %v3749_v62 }
 0x138   :  { %2474 = vmatprep.subr.bf16.mxu0 %v3754_v1  ;;  %2514 = vmatpush2.bf16.msra.mxu1 %v3839_v21  ;;  %v3778_v1 = vld [vmem:[#allocation8 + $0x8c] ss:$16 sps:$4 sm:$0xff]  }
 0x139   :  { %2515 = vmatprep.subr.bf16.mxu1 %v3847_v24  ;;  %v3826_v21 = vld [vmem:[#allocation8 + $0x18c] ss:$16 sps:$4 sm:$0xff]   ;;  %v3830_v24 = vld [vmem:[#allocation8 + $0x168] ss:$16 sps:$4 sm:$0xff]  }
 0x13b   :  { %2475 = vmatpush2.bf16.msra.mxu0 %v3752_v2  ;;  %v3776_v2 = vld [vmem:[#allocation8 + $0x88] ss:$16 sps:$4 sm:$0xff]  }
 0x13c   :  { %2476 = vmatprep.subr.bf16.mxu0 %v3757_v5  ;;  %2516 = vmatpush2.bf16.msra.mxu1 %v3845_v27  ;;  %v3790_v5 = vld [vmem:[#allocation8 + $0x4c] ss:$16 sps:$4 sm:$0xff]   ;;  %v3836_v27 = vld [vmem:[#allocation8 + $0x148] ss:$16 sps:$4 sm:$0xff]  }
 0x13d   :  { %2517 = vmatprep.subr.bf16.mxu1 %v3853_v28  ;;  %v308_v28 = vsub.s32 3, %v4170_v35 }
 0x13e   :  { %v1356_v12 = vpop.f32.mrf.mxu0 }
 0x13f   :  { %v1397_v15 = vpop.f32.mrf.mxu1  ;;  %2477 = vmatpush2.bf16.msra.mxu0 %v3755_v8  ;;  %v1357_v33 = vadd.f32 %v1356_v12, %v297_v38  ;;  %v3788_v8 = vld [vmem:[#allocation8 + $0x48] ss:$16 sps:$4 sm:$0xff]  }
 0x140   :  { %v1358_v18 = vpop.f32.mrf.mxu0  ;;  %2478 = vmatprep.subr.bf16.mxu0 %v3760_v11  ;;  %2518 = vmatpush2.bf16.msra.mxu1 %v3851_v13  ;;  %v3802_v11 = vld [vmem:[#allocation8 + $0xc] ss:$16 sps:$4 sm:$0xff]   ;;  %v3800_v12 = vld [vmem:[#allocation8 + $0x8] ss:$16 sps:$4 sm:$0xff]  }
 0x141   :  { %v1399_v19 = vpop.f32.mrf.mxu1  ;;  %2519 = vmatprep.subr.bf16.mxu1 %v3856_v31  ;;  %v1359_v40 = vadd.f32 %v1358_v18, %v301_v39  ;;  %v1398_v41 = vadd.f32 %v1397_v15, %v1357_v33  ;;  %v3808_v15 = vld [vmem:[#allocation8 + $0x1ec] ss:$16 sps:$4 sm:$0xff]   ;;  %v3812_v18 = vld [vmem:[#allocation8 + $0x1c8] ss:$16 sps:$4 sm:$0xff]  }
 0x142   :  { %v1360_v22 = vpop.f32.mrf.mxu0  ;;  %v3848_v38 = vld [vmem:[#allocation8 + $0x108] ss:$16 sps:$4 sm:$0xff]  }
 0x143   :  { %v1401_v23 = vpop.f32.mrf.mxu1  ;;  %2479 = vmatpush2.bf16.msra.mxu0 %v3758_v16  ;;  %v1400_v43 = vadd.f32 %v1399_v19, %v1359_v40  ;;  %v3806_v16 = vld [vmem:[#allocation8 + $0x1e8] ss:$16 sps:$4 sm:$0xff]   ;;  %v3820_v19 = vld [vmem:[#allocation8 + $0x1ac] ss:$16 sps:$4 sm:$0xff]  }
 0x144   :  { %v1361_v25 = vpop.f32.mrf.mxu0  ;;  %2530 = vmatprep.subr.bf16.mxu0 %v3763_v20  ;;  %2520 = vmatpush2.bf16.msra.mxu1 %v3854_v32  ;;  %v3818_v20 = vld [vmem:[#allocation8 + $0x1a8] ss:$16 sps:$4 sm:$0xff]   ;;  %v3832_v23 = vld [vmem:[#allocation8 + $0x16c] ss:$16 sps:$4 sm:$0xff]   ;;  %v309_v32 = vrot.slane %v4173_v36, %v308_v28 }
 0x145   :  { %v1402_v26 = vpop.f32.mrf.mxu1  ;;  %2571 = vmatprep.subr.bf16.mxu1 %v3859_v51  ;;  %v3824_v22 = vld [vmem:[#allocation8 + $0x188] ss:$16 sps:$4 sm:$0xff]   ;;  %v3838_v25 = vld [vmem:[#allocation8 + $0x14c] ss:$16 sps:$4 sm:$0xff]  }
 0x146   :  { %v304_v26 = vsub.s32 2, %v4170_v35 }
 0x147   :  { %v1479_v7 = vpop.f32.mrf.mxu1 }
 0x148   :  { %v305_v13 = vrot.slane %v4173_v36, %v304_v26 }
 0x149   :  { %v1481_v29 = vpop.f32.mrf.mxu1 }
 0x14b   :  { %v1483_v30 = vpop.f32.mrf.mxu1 }
 0x14c   :  { %v3842_v30 = vld [vmem:[#allocation8 + $0x128] ss:$16 sps:$4 sm:$0xff]  }
 0x14d   :  { %v1484_v14 = vpop.f32.mrf.mxu1 }
 0x14e   :  { %v3850_v14 = vld [vmem:[#allocation8 + $0x10c] ss:$16 sps:$4 sm:$0xff]  }
 0x17e   :  { %v1438_v42 = vpop.f32.mrf.mxu0 }
 0x17f   :  { %v1439_v44 = vadd.f32 %v1438_v42, %v1398_v41 }
 0x180   :  { %v1440_v45 = vpop.f32.mrf.mxu0 }
 0x181   :  { %v1480_v46 = vadd.f32 %v1479_v7, %v1439_v44  ;;  %v1441_v47 = vadd.f32 %v1440_v45, %v1400_v43  ;;  %v3844_v7 = vld [vmem:[#allocation8 + $0x12c] ss:$16 sps:$4 sm:$0xff]  }
 0x182   :  { %v1442_v48 = vpop.f32.mrf.mxu0 }
 0x183   :  { %v1482_v49 = vadd.f32 %v1481_v29, %v1441_v47  ;;  %v1650_v50 = vmax.f32 %v1480_v46, 0.0 }
 0x184   :  { %v1443_v52 = vpop.f32.mrf.mxu0 }
 0x185   :  { %v1651_v53 = vmax.f32 %v1482_v49, 0.0  ;;  %v4184_v57 = vpack.c.bf16 %v1650_v50, %v1650_v50 }
 0x187   :  { %v4182_v54 = vpop.f32.mrf.mxu1  ;;  %v1655_v55 = vpack.c.bf16 %v1651_v53, %v1651_v53 }
 0x188   :  { %v1521_v34 = vadd.f32 %v4182_v54, %v305_v13  ;;  %v3895_v13 = vld [vmem:[#allocation8 + $0x36c] ss:$16 sps:$4 sm:$0xff]  }
 0x189   :  { %v4186_v58 = vpop.f32.mrf.mxu1  ;;  %2480 = vmatprep.mubr.bf16.mxu0 %v1655_v55 }
 0x18a   :  { %2481 = vmatmul.mubr.bf16.vlgmr.msra.gmra.mxu0 %v4184_v57  ;;  %v1523_v33 = vadd.f32 %v4186_v58, %v309_v32  ;;  %v3857_v58 = vld [vmem:[#allocation8 + $0x2e8] ss:$16 sps:$4 sm:$0xff]   ;;  %v3901_v32 = vld [vmem:[#allocation8 + $0x32c] ss:$16 sps:$4 sm:$0xff]  }
 0x18b   :  { %v1524_v60 = vpop.f32.mrf.mxu1  ;;  %2531 = vmatpush1.bf16.msra.mxu0 %v3761_v56  ;;  %2562 = vmatprep.mubr.bf16.mxu0 %v1655_v55 }
 0x18c   :  { %2532 = vmatprep.subr.bf16.mxu0 %v3766_v59  ;;  %v3862_v60 = vld [vmem:[#allocation8 + $0x2cc] ss:$16 sps:$4 sm:$0xff]  }
 0x18d   :  { %v1525_v62 = vpop.f32.mrf.mxu1 }
 0x18e   :  { %v3906_v62 = vld [vmem:[#allocation10 + $0x38] sm:$0xff]  }
 0x18f   :  { %2533 = vmatpush1.bf16.msra.mxu0 %v3764_v61  ;;  %v3905_v61 = vld [vmem:[#allocation10 + $0x78] sm:$0xff]  }
 0x190   :  { %2534 = vmatprep.subr.bf16.mxu0 %v3772_v63  ;;  %v3907_v63 = vld [vmem:[#allocation10 + $0x70] sm:$0xff]  }
 0x193   :  { %2535 = vmatpush1.bf16.msra.mxu0 %v3770_v0  ;;  %v3865_v0 = vld [vmem:[#allocation8 + $0x2ac] ss:$16 sps:$4 sm:$0xff]  }
 0x194   :  { %2536 = vmatprep.subr.bf16.mxu0 %v3778_v1  ;;  %v3908_v1 = vld [vmem:[#allocation10 + $0x30] sm:$0xff]  }
 0x197   :  { %2537 = vmatpush1.bf16.msra.mxu0 %v3776_v2  ;;  %v3909_v2 = vld [vmem:[#allocation10 + $0x68] sm:$0xff]  }
 0x198   :  { %2538 = vmatprep.subr.bf16.mxu0 %v3784_v3  ;;  %v3863_v3 = vld [vmem:[#allocation8 + $0x2a8] ss:$16 sps:$4 sm:$0xff]  }
 0x19b   :  { %2539 = vmatpush1.bf16.msra.mxu0 %v3782_v4  ;;  %v3868_v4 = vld [vmem:[#allocation8 + $0x28c] ss:$16 sps:$4 sm:$0xff]  }
 0x19c   :  { %2540 = vmatprep.subr.bf16.mxu0 %v3790_v5  ;;  %v3910_v5 = vld [vmem:[#allocation10 + $0x28] sm:$0xff]  }
 0x19f   :  { %2541 = vmatpush1.bf16.msra.mxu0 %v3788_v8  ;;  %v3911_v8 = vld [vmem:[#allocation10 + $0x60] sm:$0xff]  }
 0x1a0   :  { %2542 = vmatprep.subr.bf16.mxu0 %v3796_v9  ;;  %v3866_v9 = vld [vmem:[#allocation8 + $0x288] ss:$16 sps:$4 sm:$0xff]  }
 0x1a3   :  { %2543 = vmatpush1.bf16.msra.mxu0 %v3794_v10  ;;  %v3871_v10 = vld [vmem:[#allocation8 + $0x26c] ss:$16 sps:$4 sm:$0xff]  }
 0x1a4   :  { %2544 = vmatprep.subr.bf16.mxu0 %v3802_v11  ;;  %v3912_v11 = vld [vmem:[#allocation10 + $0x20] sm:$0xff]  }
 0x1a7   :  { %2545 = vmatpush1.bf16.msra.mxu0 %v3800_v12  ;;  %v3869_v12 = vld [vmem:[#allocation8 + $0x268] ss:$16 sps:$4 sm:$0xff]  }
 0x1a8   :  { %2546 = vmatprep.subr.bf16.mxu0 %v3808_v15  ;;  %v3874_v15 = vld [vmem:[#allocation8 + $0x24c] ss:$16 sps:$4 sm:$0xff]  }
 0x1ab   :  { %2547 = vmatpush2.bf16.msra.mxu0 %v3806_v16  ;;  %v3872_v16 = vld [vmem:[#allocation8 + $0x248] ss:$16 sps:$4 sm:$0xff]  }
 0x1ac   :  { %2548 = vmatprep.subr.bf16.mxu0 %v3814_v17  ;;  %v3877_v17 = vld [vmem:[#allocation8 + $0x22c] ss:$16 sps:$4 sm:$0xff]  }
 0x1af   :  { %2549 = vmatpush2.bf16.msra.mxu0 %v3812_v18  ;;  %v3875_v18 = vld [vmem:[#allocation8 + $0x228] ss:$16 sps:$4 sm:$0xff]  }
 0x1b0   :  { %2550 = vmatprep.subr.bf16.mxu0 %v3820_v19  ;;  %v3880_v19 = vld [vmem:[#allocation8 + $0x20c] ss:$16 sps:$4 sm:$0xff]  }
 0x1b3   :  { %2551 = vmatpush2.bf16.msra.mxu0 %v3818_v20  ;;  %v3878_v20 = vld [vmem:[#allocation8 + $0x208] ss:$16 sps:$4 sm:$0xff]  }
 0x1b4   :  { %2552 = vmatprep.subr.bf16.mxu0 %v3826_v21  ;;  %v3883_v21 = vld [vmem:[#allocation8 + $0x3ec] ss:$16 sps:$4 sm:$0xff]  }
 0x1b7   :  { %2553 = vmatpush2.bf16.msra.mxu0 %v3824_v22  ;;  %v3881_v22 = vld [vmem:[#allocation8 + $0x3e8] ss:$16 sps:$4 sm:$0xff]  }
 0x1b8   :  { %2554 = vmatprep.subr.bf16.mxu0 %v3832_v23  ;;  %v3886_v23 = vld [vmem:[#allocation8 + $0x3cc] ss:$16 sps:$4 sm:$0xff]  }
 0x1bb   :  { %2555 = vmatpush2.bf16.msra.mxu0 %v3830_v24  ;;  %v3884_v24 = vld [vmem:[#allocation8 + $0x3c8] ss:$16 sps:$4 sm:$0xff]  }
 0x1bc   :  { %2556 = vmatprep.subr.bf16.mxu0 %v3838_v25  ;;  %v3889_v25 = vld [vmem:[#allocation8 + $0x3ac] ss:$16 sps:$4 sm:$0xff]  }
 0x1be   :  { %v1561_v29 = vpop.f32.mrf.mxu0 }
 0x1bf   :  { %2557 = vmatpush2.bf16.msra.mxu0 %v3836_v27  ;;  %v1562_v40 = vadd.f32 %v1561_v29, %v1521_v34  ;;  %v3887_v27 = vld [vmem:[#allocation8 + $0x3a8] ss:$16 sps:$4 sm:$0xff]   ;;  %v3904_v34 = vld [vmem:[#allocation8 + $0x30c] ss:$16 sps:$4 sm:$0xff]  }
 0x1c0   :  { %v1563_v31 = vpop.f32.mrf.mxu0  ;;  %2558 = vmatprep.subr.bf16.mxu0 %v3844_v7  ;;  %v3892_v7 = vld [vmem:[#allocation8 + $0x38c] ss:$16 sps:$4 sm:$0xff]   ;;  %v3890_v29 = vld [vmem:[#allocation8 + $0x388] ss:$16 sps:$4 sm:$0xff]  }
 0x1c1   :  { %v1564_v43 = vadd.f32 %v1563_v31, %v1523_v33  ;;  %v3898_v31 = vld [vmem:[#allocation8 + $0x34c] ss:$16 sps:$4 sm:$0xff]  }
 0x1c2   :  { %v1565_v51 = vpop.f32.mrf.mxu0  ;;  %v3914_v33 = vld [vmem:[#allocation10 + $0x18] sm:$0xff]  }
 0x1c3   :  { %2559 = vmatpush2.bf16.msra.mxu0 %v3842_v30  ;;  %v3893_v30 = vld [vmem:[#allocation8 + $0x368] ss:$16 sps:$4 sm:$0xff]  }
 0x1c4   :  { %v1566_v39 = vpop.f32.mrf.mxu0  ;;  %2560 = vmatprep.subr.bf16.mxu0 %v3850_v14  ;;  %v3896_v14 = vld [vmem:[#allocation8 + $0x348] ss:$16 sps:$4 sm:$0xff]  }
 0x1c5   :  { %v3899_v51 = vld [vmem:[#allocation8 + $0x328] ss:$16 sps:$4 sm:$0xff]  }
 0x1c6   :  { %v1643_v42 = vpop.f32.mrf.mxu0  ;;  %v3913_v39 = vld [vmem:[#allocation10 + $0x58] sm:$0xff]  }
 0x1c7   :  { %v1602_v41 = vpop.f32.mrf.mxu1  ;;  %2561 = vmatpush2.bf16.msra.mxu0 %v3848_v38  ;;  %v3902_v38 = vld [vmem:[#allocation8 + $0x308] ss:$16 sps:$4 sm:$0xff]  }
 0x1c8   :  { %v1603_v44 = vadd.f32 %v1602_v41, %v1562_v40  ;;  %v1645_v46 = vpop.f32.mrf.mxu0  ;;  %3357 = vmatprep.subr.bf16.mxu0 %v3905_v61  ;;  %v3915_v40 = vld [vmem:[#allocation10 + $0x50] sm:$0xff]  }
 0x1c9   :  { %v1604_v45 = vpop.f32.mrf.mxu1  ;;  %v3916_v41 = vld [vmem:[#allocation10 + $0x10] sm:$0xff]  }
 0x1ca   :  { %v1644_v47 = vadd.f32 %v1643_v42, %v1603_v44  ;;  %v1605_v48 = vadd.f32 %v1604_v45, %v1564_v43  ;;  %2563 = vmatmul.mubr.bf16.vlgmr.msra.gmra.mxu0 %v4184_v57  ;;  %v1647_v49 = vpop.f32.mrf.mxu0  ;;  %v3860_v57 = vld [vmem:[#allocation8 + $0x2c8] ss:$16 sps:$4 sm:$0xff]   ;;  %v3919_v44 = vld [vmem:[#allocation10 + $0x40] sm:$0xff]  }
 0x1cb   :  { %v1606_v36 = vpop.f32.mrf.mxu1  ;;  %3358 = vmatpush3.bf16.msra.mxu0 %v3906_v62  ;;  %v3917_v42 = vld [vmem:[#allocation10 + $0x48] sm:$0xff]   ;;  %v3920_v45 = vld [vmem:[#allocation10] sm:$0xff]  }
 0x1cc   :  { %v1646_v50 = vadd.f32 %v1645_v46, %v1605_v48  ;;  %v1652_v52 = vmax.f32 %v1644_v47, 0.0  ;;  %v1648_v54 = vpop.f32.mrf.mxu0  ;;  %3359 = vmatprep.subr.bf16.mxu0 %v3907_v63  ;;  %v3918_v43 = vld [vmem:[#allocation10 + $0x8] sm:$0xff]   ;;  %v3921_v46 = vld [vmem:[#allocation10 + $0xf8] sm:$0xff]   ;;  %v3923_v48 = vld [vmem:[#allocation10 + $0xf0] sm:$0xff]  }
 0x1cd   :  { %v1607_v53 = vpop.f32.mrf.mxu1  ;;  %v3922_v47 = vld [vmem:[#allocation10 + $0xb8] sm:$0xff]   ;;  %v3924_v36 = vld [vmem:[#allocation10 + $0xb0] sm:$0xff]   ;;  %v3925_v49 = vld [vmem:[#allocation10 + $0xe8] sm:$0xff]  }
 0x1ce   :  { %v1653_v55 = vmax.f32 %v1646_v50, 0.0  ;;  %v4200_v59 = vpack.c.bf16 %v1652_v52, %v1652_v52  ;;  %v3926_v50 = vld [vmem:[#allocation10 + $0xa8] sm:$0xff]   ;;  %v3927_v52 = vld [vmem:[#allocation10 + $0xe0] sm:$0xff]   ;;  %v3929_v54 = vld [vmem:[#allocation10 + $0xd8] sm:$0xff]  }
 0x1cf   :  { %3360 = vmatpush3.bf16.msra.mxu0 %v3908_v1  ;;  %v3928_v53 = vld [vmem:[#allocation10 + $0xa0] sm:$0xff]   ;;  %v3933_v63 = vld [vmem:[#allocation10 + $0xc8] sm:$0xff]  }
 0x1d0   :  { %v1657_v56 = vpack.c.bf16 %v1653_v55, %v1653_v55  ;;  %3361 = vmatprep.subr.bf16.mxu0 %v3909_v2  ;;  %v3930_v55 = vld [vmem:[#allocation10 + $0x98] sm:$0xff]   ;;  %v3936_v1 = vld [vmem:[#allocation10 + $0x80] sm:$0xff]  }
 0x1d1   :  { %v1786_v2 = vld [vmem:[%s4225_s4] sm:$0xf] }
 0x1d2   :  { %2521 = vmatprep.mubr.bf16.mxu1 %v1657_v56 }
 0x1d3   :  { %2522 = vmatmul.mubr.bf16.vlgmr.msra.gmra.mxu1 %v4200_v59  ;;  %3362 = vmatpush3.bf16.msra.mxu0 %v3910_v5  ;;  %v1791_v5 = vrot.slane %v1786_v2, %v296_v6  ;;  %v1799_v6 = vrot.slane %v1786_v2, %v304_v26 }
 0x1d4   :  { %2572 = vmatpush1.bf16.msra.mxu1 %v3857_v58  ;;  %2603 = vmatprep.mubr.bf16.mxu1 %v1657_v56  ;;  %v3931_v56 = vld [vmem:[#allocation10 + $0xd0] sm:$0xff]  }
 0x1d5   :  { %2573 = vmatprep.subr.bf16.mxu1 %v3862_v60  ;;  %3363 = vmatprep.subr.bf16.mxu0 %v3911_v8  ;;  %v3932_v58 = vld [vmem:[#allocation10 + $0x90] sm:$0xff]  }
 0x1d7   :  { %3364 = vmatpush3.bf16.msra.mxu0 %v3912_v11 }
 0x1d8   :  { %2574 = vmatpush1.bf16.msra.mxu1 %v3860_v57  ;;  %3365 = vmatprep.subr.bf16.mxu0 %v3913_v39  ;;  %v3934_v57 = vld [vmem:[#allocation10 + $0x88] sm:$0xff]  }
 0x1d9   :  { %2575 = vmatprep.subr.bf16.mxu1 %v3865_v0  ;;  %v3935_v0 = vld [vmem:[#allocation10 + $0xc0] sm:$0xff]  }
 0x1db   :  { %3366 = vmatpush3.bf16.msra.mxu0 %v3914_v33 }
 0x1dc   :  { %2576 = vmatpush1.bf16.msra.mxu1 %v3863_v3  ;;  %3367 = vmatprep.subr.bf16.mxu0 %v3915_v40 }
 0x1dd   :  { %2577 = vmatprep.subr.bf16.mxu1 %v3868_v4 }
 0x1df   :  { %3368 = vmatpush3.bf16.msra.mxu0 %v3916_v41 }
 0x1e0   :  { %2578 = vmatpush1.bf16.msra.mxu1 %v3866_v9  ;;  %3369 = vmatprep.subr.bf16.mxu0 %v3917_v42  ;;  %v1795_v9 = vrot.slane %v1786_v2, %v300_v37  ;;  %v1803_v37 = vrot.slane %v1786_v2, %v308_v28  ;;  %v3324_v28 = vld [vmem:[%s4227_s6] ss:$0 sm:$0xff]  ;;  %s4042_s6 = scalar_lea.vmem %s2981_s29, 64 }
 0x1e1   :  { %2579 = vmatprep.subr.bf16.mxu1 %v3871_v10  ;;  %p4043_p11 = scmp.ne.s32.totalorder %s2981_s29, %s4042_s6  ;;  %p4048_p13 = scmp.lt.s32.totalorder %s4042_s6, %s4042_s6 }
 0x1e3   :  { %3370 = vmatpush3.bf16.msra.mxu0 %v3918_v43  ;;  %p4049_p0 = por %p4048_p13, %p4047_p12 }
 0x1e4   :  { %2580 = vmatpush1.bf16.msra.mxu1 %v3869_v12  ;;  %3371 = vmatprep.subr.bf16.mxu0 %v3919_v44 }
 0x1e5   :  { %2581 = vmatprep.subr.bf16.mxu1 %v3874_v15  ;;  %p4050_p1 = pnand %p4049_p0, %p4043_p11 }
 0x1e7   :  { %3372 = vmatpush3.bf16.msra.mxu0 %v3920_v45 }
 0x1e8   :  { %2582 = vmatpush1.bf16.msra.mxu1 %v3872_v16 }
 0x1e9   :  { %2583 = vmatprep.subr.bf16.mxu1 %v3877_v17 }
 0x1ec   :  { %2584 = vmatpush1.bf16.msra.mxu1 %v3875_v18 }
 0x1ed   :  { %2585 = vmatprep.subr.bf16.mxu1 %v3880_v19 }
 0x1f0   :  { %2586 = vmatpush1.bf16.msra.mxu1 %v3878_v20 }
 0x1f1   :  { %2587 = vmatprep.subr.bf16.mxu1 %v3883_v21 }
 0x1f4   :  { %2588 = vmatpush2.bf16.msra.mxu1 %v3881_v22 }
 0x1f5   :  { %2589 = vmatprep.subr.bf16.mxu1 %v3886_v23 }
 0x1f8   :  { %2590 = vmatpush2.bf16.msra.mxu1 %v3884_v24 }
 0x1f9   :  { %2591 = vmatprep.subr.bf16.mxu1 %v3889_v25 }
 0x1fc   :  { %2592 = vmatpush2.bf16.msra.mxu1 %v3887_v27 }
 0x1fd   :  { %2593 = vmatprep.subr.bf16.mxu1 %v3892_v7 }
 0x200   :  { %2594 = vmatpush2.bf16.msra.mxu1 %v3890_v29 }
 0x201   :  { %2595 = vmatprep.subr.bf16.mxu1 %v3895_v13 }
 0x204   :  { %2596 = vmatpush2.bf16.msra.mxu1 %v3893_v30 }
 0x205   :  { %2597 = vmatprep.subr.bf16.mxu1 %v3898_v31 }
 0x208   :  { %2598 = vmatpush2.bf16.msra.mxu1 %v3896_v14 }
 0x209   :  { %2599 = vmatprep.subr.bf16.mxu1 %v3901_v32 }
 0x20c   :  { %2600 = vmatpush2.bf16.msra.mxu1 %v3899_v51 }
 0x20d   :  { %2601 = vmatprep.subr.bf16.mxu1 %v3904_v34 }
 0x210   :  { %2602 = vmatpush2.bf16.msra.mxu1 %v3902_v38 }
 0x211   :  { %3379 = vmatprep.subr.bf16.mxu1 %v3921_v46 }
 0x213   :  { %2604 = vmatmul.mubr.bf16.vlgmr.msra.gmra.mxu1 %v4200_v59 }
 0x214   :  { %3380 = vmatpush3.bf16.msra.mxu1 %v3922_v47 }
 0x215   :  { %3381 = vmatprep.subr.bf16.mxu1 %v3923_v48 }
 0x218   :  { %3382 = vmatpush3.bf16.msra.mxu1 %v3924_v36 }
 0x219   :  { %3383 = vmatprep.subr.bf16.mxu1 %v3925_v49 }
 0x21c   :  { %3384 = vmatpush3.bf16.msra.mxu1 %v3926_v50 }
 0x21d   :  { %3385 = vmatprep.subr.bf16.mxu1 %v3927_v52 }
 0x220   :  { %3386 = vmatpush3.bf16.msra.mxu1 %v3928_v53 }
 0x221   :  { %3387 = vmatprep.subr.bf16.mxu1 %v3929_v54 }
 0x224   :  { %3388 = vmatpush3.bf16.msra.mxu1 %v3930_v55 }
 0x225   :  { %3389 = vmatprep.subr.bf16.mxu1 %v3931_v56 }
 0x228   :  { %3390 = vmatpush3.bf16.msra.mxu1 %v3932_v58 }
 0x229   :  { %3391 = vmatprep.subr.bf16.mxu1 %v3933_v63 }
 0x22c   :  { %3392 = vmatpush3.bf16.msra.mxu1 %v3934_v57 }
 0x22d   :  { %3393 = vmatprep.subr.bf16.mxu1 %v3935_v0 }
 0x230   :  { %3394 = vmatpush3.bf16.msra.mxu1 %v3936_v1 }
 0x24a   :  { %v2482_v59 = vpop.f32.mrf.mxu0 }
 0x24b   :  { %v2483_v11 = vadd.f32 %v2482_v59, %v1791_v5 }
 0x24c   :  { %v2484_v60 = vpop.f32.mrf.mxu0 }
 0x24d   :  { %v2485_v15 = vadd.f32 %v2484_v60, %v1795_v9 }
 0x24e   :  { %v2486_v61 = vpop.f32.mrf.mxu0 }
 0x250   :  { %v2487_v62 = vpop.f32.mrf.mxu0 }
 0x28a   :  { %v2564_v3 = vpop.f32.mrf.mxu0 }
 0x28b   :  { %v2565_v25 = vadd.f32 %v2564_v3, %v1799_v6 }
 0x28c   :  { %v2566_v4 = vpop.f32.mrf.mxu0 }
 0x28d   :  { %v2567_v7 = vadd.f32 %v2566_v4, %v1803_v37 }
 0x28e   :  { %v2568_v8 = vpop.f32.mrf.mxu0 }
 0x290   :  { %v2569_v10 = vpop.f32.mrf.mxu0 }
 0x293   :  { %v2523_v12 = vpop.f32.mrf.mxu1 }
 0x294   :  { %v2524_v16 = vadd.f32 %v2523_v12, %v2483_v11 }
 0x295   :  { %v2525_v17 = vpop.f32.mrf.mxu1 }
 0x296   :  { %v2526_v18 = vadd.f32 %v2525_v17, %v2485_v15  ;;  %v2612_v19 = vmax.f32 %v2524_v16, 0.0 }
 0x297   :  { %v2527_v20 = vpop.f32.mrf.mxu1 }
 0x298   :  { %v2613_v21 = vmax.f32 %v2526_v18, 0.0  ;;  %v2616_v24 = vpack.c.bf16 %v2612_v19, %v2612_v19 }
 0x299   :  { %v2528_v22 = vpop.f32.mrf.mxu1 }
 0x29a   :  { %v2617_v23 = vpack.c.bf16 %v2613_v21, %v2613_v21 }
 0x29c   :  { %2915 = vmatprep.mubr.bf16.mxu0 %v2617_v23 }
 0x29d   :  { %2916 = vmatmul.mubr.bf16.vlgmr.msra.gmra.mxu0 %v2616_v24 }
 0x2d3   :  { %v2605_v27 = vpop.f32.mrf.mxu1 }
 0x2d4   :  { %v2606_v29 = vadd.f32 %v2605_v27, %v2565_v25 }
 0x2d5   :  { %v2607_v13 = vpop.f32.mrf.mxu1 }
 0x2d6   :  { %v2608_v30 = vadd.f32 %v2607_v13, %v2567_v7  ;;  %v2614_v31 = vmax.f32 %v2606_v29, 0.0 }
 0x2d7   :  { %v2609_v14 = vpop.f32.mrf.mxu1 }
 0x2d8   :  { %v2615_v32 = vmax.f32 %v2608_v30, 0.0  ;;  %v2618_v38 = vpack.c.bf16 %v2614_v31, %v2614_v31 }
 0x2d9   :  { %v2610_v51 = vpop.f32.mrf.mxu1 }
 0x2da   :  { %v2619_v34 = vpack.c.bf16 %v2615_v32, %v2615_v32 }
 0x2dc   :  { %2955 = vmatprep.mubr.bf16.mxu1 %v2619_v34 }
 0x2dd   :  { %2956 = vmatmul.mubr.bf16.vlgmr.msra.gmra.mxu1 %v2618_v38 }
 0x35d   :  { %v3373_v39 = vpop.f32.mrf.mxu0 }
 0x35f   :  { %v3374_v33 = vpop.f32.mrf.mxu0 }
 0x360   :  { %v3375_v35 = vadd.f32 %v3374_v33, %v3373_v39 }
 0x361   :  { %v3376_v26 = vpop.f32.mrf.mxu0 }
 0x362   :  { %v2918_v43 = vadd.f32 %v3375_v35, %v3324_v28 }
 0x363   :  { %v3377_v40 = vpop.f32.mrf.mxu0 }
 0x39d   :  { %v3395_v41 = vpop.f32.mrf.mxu1 }
 0x39f   :  { %v3396_v42 = vpop.f32.mrf.mxu1 }
 0x3a0   :  { %v3397_v44 = vadd.f32 %v3396_v42, %v3395_v41 }
 0x3a1   :  { %v3398_v45 = vpop.f32.mrf.mxu1 }
 0x3a2   :  { %v2958_v46 = vadd.f32 %v3397_v44, %v2918_v43 }
 0x3a3   :  { %v3399_v47 = vpop.f32.mrf.mxu1 }
 0x3a4   :  { %2963 = vmax.xlane.f32.xlu0 %v2958_v46 }
 0x42d   :  { %v2964_v48 = vpop.xlane.xlu0 %2963 }
 0x42e   :  { %v2965_v36 = vsub.f32 %v2958_v46, %v2964_v48 }
 0x430   :  { %v2966_v49 = vmul.f32 1.442695, %v2965_v36 }
 0x432   :  { %3937 = vpow2.f32 %v2966_v49 }
 0x43f   :  { %v3938_v50 = vpop.eup %3937 }
 0x440   :  { %2968 = vadd.xlane.f32.xlu0 %v3938_v50 }
 0x4c9   :  { %v2969_v52 = vpop.xlane.xlu0 %2968 }
 0x4ca   :  { %3939 = vrcp.f32 %v2969_v52 }
 0x4d7   :  { %v3940_v53 = vpop.eup %3939 }
 0x4d8   :  { %v2971_v54 = vmul.f32 %v3940_v53, %v3938_v50 }
 0x4da   :  { %v2972_v55 = vpack.c.bf16 %v2971_v54, %v2971_v54 }
 0x4dc   :  { %2973 = vst [vmem:[#allocation11] sm:$0xf] %v2972_v55 }
 0x4dd   :  { %4053 = shalt.err (!%p4050_p1)
}
 0x4de   :  { %2983 = dma.vmem_to_hbm [thread:$0]  %s2981_s29, 64, %s4228_s7, [#allocation4]  }
 0x4df   :  { %4068 = dma.done.wait [#allocation4], 64  }
 0x4e0   :  { %4069 = vsyncadd [#allocation4], 4294967232 }
 0x4e1   :  { %2987 = vsyncpa [#allocation3], 1 }
 0x4e2   :  { %2988 = vsyncpa [#allocation6], 1 }
 0x4e3   :  { %2989 = vsyncpa [#allocation9], 1 }
 0x4e4   :  { %2990 = vsyncpa [#allocation4], 1 }

</bundles_post_ra>
